<compile_context>
chip_gen: v7x
topology: tpu7x:2x2x1
jax: 0.10.0
libtpu: 0.0.40
codegen_flags: <defaults>
</compile_context>

<pallas_src>
import functools

import jax
import jax.numpy as jnp
import numpy as np
from jax.experimental import pallas as pl
from jax.experimental.pallas import tpu as pltpu

N_ENC = 53        # 52 card slots + 1 current-card encoding
N_CARDS = 52
N_RANKS = 13      # synthetic card_predictor output size
ADITIONAL = 1
FC_IN = 1 + 1 + ADITIONAL     # = 3, matches nn.Linear(1 + 1 + aditional, 3)
FC_HID = 3

_HIGHEST = jax.lax.Precision.HIGHEST


def _replace_or_flip_kernel(x_ref, wpz_ref, bp_ref, scores_ref, fc_ref,
                            out_ref):
    """One batch-major tile: x_ref is (bt, 53), out_ref is (bt, 1)."""
    x = x_ref[...]                                                # (bt, 53)

    # --- card_predictor(game_encoded[:52]): Linear(52->13) + softmax (MXU) ---
    # wpz has row 52 zeroed, so the full-tile matmul equals x[:, :52] @ wp.
    logits = jnp.dot(x, wpz_ref[...],
                     preferred_element_type=jnp.float32,
                     precision=_HIGHEST)                          # (bt, 13)
    logits = logits + bp_ref[...]                                 # (1,13) bcast

    m = jnp.max(logits, axis=-1, keepdims=True)                   # (bt, 1) XLU
    e = jnp.exp(logits - m)                                       # (bt, 13) EUP
    denom = jnp.sum(e, axis=-1, keepdims=True)                    # (bt, 1)
    weighted = jnp.sum(scores_ref[...] * e, axis=-1, keepdims=True)
    # EUP reciprocal + one Newton step (keeps f32 accuracy), then multiply.
    inv = pl.reciprocal(denom, approx=True)
    inv = inv * (2.0 - denom * inv)
    likely = weighted * inv                                       # (bt, 1)

    # --- current card: Card.static_score(Card.decode(x)) := x - 2 ------------
    # TODO(synk): replace with the real Card decode/score when available.
    last = x[:, N_ENC - 1:N_ENC]                                  # (bt, 1)
    cur = last - 2.0

    # --- pair flag: two 3-wide slab compares OR'd + one lane any-reduce -------
    # pair=1 iff some own slot i is empty, its partner (i±3) is non-empty and
    # the partner equals the current-card encoding.
    a = x[:, 0:3]                                                 # own slots 0..2
    b = x[:, 3:6]                                                 # own slots 3..5
    cond = jnp.logical_or(
        jnp.logical_and(jnp.logical_and(b != 0.0, a == 0.0), b == last),
        jnp.logical_and(jnp.logical_and(a != 0.0, b == 0.0), a == last))
    pair = jnp.max(cond.astype(jnp.float32), axis=-1, keepdims=True)  # (bt, 1)

    # --- fc_stack on the VPU: Linear(3,3)+ReLU, Linear(3,1)+Tanh --------------
    # fc_ref (SMEM, 16 f32): w1 row-major (in,out) at [0:9], b1 at [9:12],
    #                        w2 at [12:15], b2 at [15].
    h = []
    for j in range(FC_HID):
        hj = (likely * fc_ref[0 * FC_HID + j]
              + cur * fc_ref[1 * FC_HID + j]
              + pair * fc_ref[2 * FC_HID + j]
              + fc_ref[9 + j])
        h.append(jnp.maximum(hj, 0.0))
    y = h[0] * fc_ref[12] + h[1] * fc_ref[13] + h[2] * fc_ref[14] + fc_ref[15]
    out_ref[...] = jnp.tanh(y)                                    # (bt, 1)


def _pallas_forward(ge, wpz, bp, scores, fc_flat, bt):
    B = ge.shape[0]
    grid = (pl.cdiv(B, bt),)        # ragged last tile handled by Pallas
    return pl.pallas_call(
        _replace_or_flip_kernel,
        out_shape=jax.ShapeDtypeStruct((B, 1), jnp.float32),
        grid=grid,
        in_specs=[
            pl.BlockSpec((bt, N_ENC), lambda i: (i, 0)),           # batch tile
            pl.BlockSpec((N_ENC, N_RANKS), lambda i: (0, 0)),      # resident
            pl.BlockSpec((1, N_RANKS), lambda i: (0, 0)),          # resident
            pl.BlockSpec((1, N_RANKS), lambda i: (0, 0)),          # resident
            pl.BlockSpec(memory_space=pltpu.MemorySpace.SMEM),     # 16 fc scalars
        ],
        out_specs=pl.BlockSpec((bt, 1), lambda i: (i, 0)),
        compiler_params=pltpu.CompilerParams(
            dimension_semantics=("parallel",)),
    )(ge, wpz, bp, scores, fc_flat)


@functools.partial(jax.jit, static_argnames=("batch_tile",))
def replace_or_flip_forward_batched(game_encoded, params, batch_tile=4096):
    """game_encoded: (B, 53) f32 -> (B,) f32 (one tanh score per game state).

    batch_tile: rows per grid step.  2048-8192 amortizes the ~0.35us per-step
    overhead against the HBM stream on all of v5e/v6e/v7x (per-step VMEM is
    only ~0.5-2 MiB double-buffered, never a constraint).  Must be a multiple
    of 8 when B > batch_tile; a multiple of 512 is recommended so the grid
    still has several steps for the v7x megacore split at production B.
    """
    ge = jnp.asarray(game_encoded, jnp.float32)          # (B, 53) batch-major
    B = ge.shape[0]
    if B <= batch_tile:
        bt = B                                           # single full block
    else:
        if batch_tile % 8 != 0:
            raise ValueError("batch_tile must be a multiple of 8")
        bt = batch_tile

    wp = jnp.asarray(params["wp"], jnp.float32)                       # (52, 13)
    wpz = jnp.zeros((N_ENC, N_RANKS), jnp.float32).at[:N_CARDS, :].set(wp)
    bp = jnp.asarray(params["bp"], jnp.float32).reshape(1, N_RANKS)
    scores = jnp.asarray(params["scores"], jnp.float32).reshape(1, N_RANKS)
    fc_flat = jnp.concatenate([
        jnp.asarray(params["w1"], jnp.float32).reshape(-1),           # 9
        jnp.asarray(params["b1"], jnp.float32).reshape(-1),           # 3
        jnp.asarray(params["w2"], jnp.float32).reshape(-1),           # 3
        jnp.asarray(params["b2"], jnp.float32).reshape(-1),           # 1
    ])

    out = _pallas_forward(ge, wpz, bp, scores, fc_flat, bt)           # (B, 1)
    return out[:, 0]


def replace_or_flip_forward(game_encoded, params):
    """Single game (53,) -> (1,), matching the torch module's output shape."""
    out = replace_or_flip_forward_batched(
        jnp.asarray(game_encoded, jnp.float32).reshape(1, N_ENC), params)
    return out.reshape(1)


def reference_forward(game_encoded, params):
    """Pure-JAX reference for one (53,) game vector, mirroring the torch code."""
    x52 = game_encoded[:N_CARDS]
    logits = jnp.dot(x52, params["wp"], precision=_HIGHEST) + params["bp"]
    probs = jax.nn.softmax(logits)
    likely = jnp.sum(params["scores"] * probs)
    last = game_encoded[N_ENC - 1]
    cur = last - 2.0
    pair = jnp.float32(0.0)
    for i in range(6):
        other = i + 3 if i < 3 else i - 3
        cond = ((game_encoded[other] != 0.0) & (game_encoded[i] == 0.0)
                & (game_encoded[other] == last))
        pair = jnp.where(cond, jnp.float32(1.0), pair)
    comb = jnp.stack([likely, cur, pair])
    h = jnp.maximum(jnp.dot(comb, params["w1"], precision=_HIGHEST)
                    + params["b1"], 0.0)
    y = jnp.tanh(jnp.dot(h, params["w2"], precision=_HIGHEST) + params["b2"])
    return y[0]


def make_params():
    key = jax.random.PRNGKey(0)
    k1, k2, k3, k4, k5, k6 = jax.random.split(key, 6)
    return {
        # synthetic card_predictor: Linear(52 -> 13) (softmax applied in-kernel)
        "wp": (jax.random.normal(k1, (N_CARDS, N_RANKS)) * 0.1).astype(jnp.float32),
        "bp": (jax.random.normal(k2, (N_RANKS,)) * 0.1).astype(jnp.float32),
        # synthetic SCORES: one score per rank
        "scores": jnp.arange(N_RANKS, dtype=jnp.float32) - 2.0,
        # fc_stack: Linear(3,3) + ReLU, Linear(3,1) + Tanh  (weights are (in,out))
        "w1": (jax.random.normal(k3, (FC_IN, FC_HID)) * 0.5).astype(jnp.float32),
        "b1": (jax.random.normal(k4, (FC_HID,)) * 0.1).astype(jnp.float32),
        "w2": (jax.random.normal(k5, (FC_HID, 1)) * 0.5).astype(jnp.float32),
        "b2": (jax.random.normal(k6, (1,)) * 0.1).astype(jnp.float32),
    }


if __name__ == "__main__":
    params = make_params()

    key = jax.random.PRNGKey(0)
    B = 300                                       # small test batch
    ge_batch = jax.random.randint(key, (B, N_ENC), 0, 13).astype(jnp.float32)
    # Exercise both pair branches:
    #  row 0: own slot 0 empty, partner slot 3 matches the current card.
    ge_batch = (ge_batch.at[0, 0].set(0.0).at[0, 3].set(7.0)
                .at[0, N_ENC - 1].set(7.0))
    #  row 1: own slot 4 empty, partner slot 1 matches the current card.
    ge_batch = (ge_batch.at[1, 4].set(0.0).at[1, 1].set(5.0)
                .at[1, N_ENC - 1].set(5.0))

    y_ref = jax.vmap(lambda g: reference_forward(g, params))(ge_batch)

    # Multi-tile path with a ragged last block: bt=128 -> grid (3,), last
    # tile covers 44 valid rows.
    y_multi = jax.block_until_ready(
        replace_or_flip_forward_batched(ge_batch, params, batch_tile=128))
    np.testing.assert_allclose(np.asarray(y_multi), np.asarray(y_ref),
                               rtol=1e-3, atol=1e-3)

    # Single-block path (B <= batch_tile, default 4096): block equals full dims.
    y_single_block = jax.block_until_ready(
        replace_or_flip_forward_batched(ge_batch, params))
    np.testing.assert_allclose(np.asarray(y_single_block), np.asarray(y_ref),
                               rtol=1e-3, atol=1e-3)

    # Single-game path (B = 1), matching the torch module's (1,) output.
    y_one = jax.block_until_ready(replace_or_flip_forward(ge_batch[0], params))
    np.testing.assert_allclose(np.asarray(y_one), np.asarray(y_ref[0:1]),
                               rtol=1e-3, atol=1e-3)

    print("KERNEL_OK")
</pallas_src>

<mosaic_0001>
module attributes {stable_mosaic.version = 11 : i64} {
  func.func @_replace_or_flip_kernel(%arg0: i32, %arg1: memref<128x53xf32, #tpu.memory_space<vmem>>, %arg2: memref<53x13xf32, #tpu.memory_space<vmem>>, %arg3: memref<1x13xf32, #tpu.memory_space<vmem>>, %arg4: memref<1x13xf32, #tpu.memory_space<vmem>>, %arg5: memref<16xf32, #tpu.memory_space<smem>>, %arg6: memref<128x1xf32, #tpu.memory_space<vmem>>) attributes {dimension_semantics = [#tpu.dimension_semantics<parallel>], iteration_bounds = array<i64: 3>, scalar_prefetch = 0 : i64, scratch_operands = 0 : i64, tpu.core_type = #tpu.core_type<tc>, window_params = [{transform_indices = @transform_0, window_bounds = array<i64: 128, 53>}, {pipeline_mode = #tpu.pipeline_mode<synchronous>, transform_indices = @transform_1, window_bounds = array<i64: 53, 13>}, {pipeline_mode = #tpu.pipeline_mode<synchronous>, transform_indices = @transform_2, window_bounds = array<i64: 1, 13>}, {pipeline_mode = #tpu.pipeline_mode<synchronous>, transform_indices = @transform_3, window_bounds = array<i64: 1, 13>}, {transform_indices = @transform_4, window_bounds = array<i64: 16>}, {transform_indices = @transform_5, window_bounds = array<i64: 128, 1>}]} {
    %c0 = arith.constant 0 : index
    %c0_0 = arith.constant 0 : index
    %0 = vector.load %arg1[%c0, %c0_0] : memref<128x53xf32, #tpu.memory_space<vmem>>, vector<128x53xf32>
    %c0_1 = arith.constant 0 : index
    %c0_2 = arith.constant 0 : index
    %1 = vector.load %arg2[%c0_1, %c0_2] : memref<53x13xf32, #tpu.memory_space<vmem>>, vector<53x13xf32>
    %cst = arith.constant dense<0.000000e+00> : vector<128x13xf32>
    %2 = tpu.matmul %0, %1, %cst {dimension_numbers = #tpu.dot_dimension_numbers<[1], [0], [0], [1], [0, 0, 1, 1], [], []>, precision = #tpu.contract_precision<fp32>} : vector<128x53xf32>, vector<53x13xf32>, vector<128x13xf32> -> vector<128x13xf32>
    %c0_3 = arith.constant 0 : index
    %c0_4 = arith.constant 0 : index
    %3 = vector.load %arg3[%c0_3, %c0_4] : memref<1x13xf32, #tpu.memory_space<vmem>>, vector<1x13xf32>
    %4 = vector.broadcast %3 : vector<1x13xf32> to vector<128x13xf32>
    %5 = arith.addf %2, %4 : vector<128x13xf32>
    %cst_5 = arith.constant dense<0xFF800000> : vector<128xf32>
    %6 = vector.multi_reduction <maximumf>, %5, %cst_5 [1] : vector<128x13xf32> to vector<128xf32>
    %7 = vector.shape_cast %6 : vector<128xf32> to vector<128x1xf32>
    %8 = vector.broadcast %7 : vector<128x1xf32> to vector<128x13xf32>
    %9 = arith.subf %5, %8 : vector<128x13xf32>
    %10 = math.exp %9 : vector<128x13xf32>
    %cst_6 = arith.constant dense<0.000000e+00> : vector<128xf32>
    %11 = vector.multi_reduction <add>, %10, %cst_6 [1] : vector<128x13xf32> to vector<128xf32>
    %12 = vector.shape_cast %11 : vector<128xf32> to vector<128x1xf32>
    %c0_7 = arith.constant 0 : index
    %c0_8 = arith.constant 0 : index
    %13 = vector.load %arg4[%c0_7, %c0_8] : memref<1x13xf32, #tpu.memory_space<vmem>>, vector<1x13xf32>
    %14 = vector.broadcast %13 : vector<1x13xf32> to vector<128x13xf32>
    %15 = arith.mulf %14, %10 : vector<128x13xf32>
    %cst_9 = arith.constant dense<0.000000e+00> : vector<128xf32>
    %16 = vector.multi_reduction <add>, %15, %cst_9 [1] : vector<128x13xf32> to vector<128xf32>
    %17 = vector.shape_cast %16 : vector<128xf32> to vector<128x1xf32>
    %18 = tpu.reciprocal %12 {approx = true} : vector<128x1xf32> -> vector<128x1xf32>
    %19 = arith.mulf %12, %18 : vector<128x1xf32>
    %cst_10 = arith.constant 2.000000e+00 : f32
    %20 = vector.broadcast %cst_10 : f32 to vector<128x1xf32>
    %21 = arith.subf %20, %19 : vector<128x1xf32>
    %22 = arith.mulf %18, %21 : vector<128x1xf32>
    %23 = arith.mulf %17, %22 : vector<128x1xf32>
    %24 = vector.extract_strided_slice %0 {offsets = [0, 52], sizes = [128, 1], strides = [1, 1]} : vector<128x53xf32> to vector<128x1xf32>
    %cst_11 = arith.constant 2.000000e+00 : f32
    %25 = vector.broadcast %cst_11 : f32 to vector<128x1xf32>
    %26 = arith.subf %24, %25 : vector<128x1xf32>
    %27 = vector.extract_strided_slice %0 {offsets = [0, 0], sizes = [128, 3], strides = [1, 1]} : vector<128x53xf32> to vector<128x3xf32>
    %28 = vector.extract_strided_slice %0 {offsets = [0, 3], sizes = [128, 3], strides = [1, 1]} : vector<128x53xf32> to vector<128x3xf32>
    %cst_12 = arith.constant 0.000000e+00 : f32
    %29 = vector.broadcast %cst_12 : f32 to vector<128x3xf32>
    %30 = arith.cmpf one, %28, %29 : vector<128x3xf32>
    %cst_13 = arith.constant 0.000000e+00 : f32
    %31 = vector.broadcast %cst_13 : f32 to vector<128x3xf32>
    %32 = arith.cmpf oeq, %27, %31 : vector<128x3xf32>
    %33 = arith.andi %30, %32 : vector<128x3xi1>
    %34 = vector.broadcast %24 : vector<128x1xf32> to vector<128x3xf32>
    %35 = arith.cmpf oeq, %28, %34 : vector<128x3xf32>
    %36 = arith.andi %33, %35 : vector<128x3xi1>
    %cst_14 = arith.constant 0.000000e+00 : f32
    %37 = vector.broadcast %cst_14 : f32 to vector<128x3xf32>
    %38 = arith.cmpf one, %27, %37 : vector<128x3xf32>
    %cst_15 = arith.constant 0.000000e+00 : f32
    %39 = vector.broadcast %cst_15 : f32 to vector<128x3xf32>
    %40 = arith.cmpf oeq, %28, %39 : vector<128x3xf32>
    %41 = arith.andi %38, %40 : vector<128x3xi1>
    %42 = vector.broadcast %24 : vector<128x1xf32> to vector<128x3xf32>
    %43 = arith.cmpf oeq, %27, %42 : vector<128x3xf32>
    %44 = arith.andi %41, %43 : vector<128x3xi1>
    %45 = arith.ori %36, %44 : vector<128x3xi1>
    %46 = arith.extui %45 : vector<128x3xi1> to vector<128x3xi32>
    %47 = arith.sitofp %46 : vector<128x3xi32> to vector<128x3xf32>
    %cst_16 = arith.constant dense<0xFF800000> : vector<128xf32>
    %48 = vector.multi_reduction <maximumf>, %47, %cst_16 [1] : vector<128x3xf32> to vector<128xf32>
    %49 = vector.shape_cast %48 : vector<128xf32> to vector<128x1xf32>
    %c0_17 = arith.constant 0 : index
    %50 = memref.load %arg5[%c0_17] : memref<16xf32, #tpu.memory_space<smem>>
    %51 = vector.broadcast %50 : f32 to vector<128x1xf32>
    %52 = arith.mulf %23, %51 : vector<128x1xf32>
    %c3 = arith.constant 3 : index
    %53 = memref.load %arg5[%c3] : memref<16xf32, #tpu.memory_space<smem>>
    %54 = vector.broadcast %53 : f32 to vector<128x1xf32>
    %55 = arith.mulf %26, %54 : vector<128x1xf32>
    %56 = arith.addf %52, %55 : vector<128x1xf32>
    %c6 = arith.constant 6 : index
    %57 = memref.load %arg5[%c6] : memref<16xf32, #tpu.memory_space<smem>>
    %58 = vector.broadcast %57 : f32 to vector<128x1xf32>
    %59 = arith.mulf %49, %58 : vector<128x1xf32>
    %60 = arith.addf %56, %59 : vector<128x1xf32>
    %c9 = arith.constant 9 : index
    %61 = memref.load %arg5[%c9] : memref<16xf32, #tpu.memory_space<smem>>
    %62 = vector.broadcast %61 : f32 to vector<128x1xf32>
    %63 = arith.addf %60, %62 : vector<128x1xf32>
    %cst_18 = arith.constant 0.000000e+00 : f32
    %64 = vector.broadcast %cst_18 : f32 to vector<128x1xf32>
    %65 = arith.maximumf %63, %64 : vector<128x1xf32>
    %c1 = arith.constant 1 : index
    %66 = memref.load %arg5[%c1] : memref<16xf32, #tpu.memory_space<smem>>
    %67 = vector.broadcast %66 : f32 to vector<128x1xf32>
    %68 = arith.mulf %23, %67 : vector<128x1xf32>
    %c4 = arith.constant 4 : index
    %69 = memref.load %arg5[%c4] : memref<16xf32, #tpu.memory_space<smem>>
    %70 = vector.broadcast %69 : f32 to vector<128x1xf32>
    %71 = arith.mulf %26, %70 : vector<128x1xf32>
    %72 = arith.addf %68, %71 : vector<128x1xf32>
    %c7 = arith.constant 7 : index
    %73 = memref.load %arg5[%c7] : memref<16xf32, #tpu.memory_space<smem>>
    %74 = vector.broadcast %73 : f32 to vector<128x1xf32>
    %75 = arith.mulf %49, %74 : vector<128x1xf32>
    %76 = arith.addf %72, %75 : vector<128x1xf32>
    %c10 = arith.constant 10 : index
    %77 = memref.load %arg5[%c10] : memref<16xf32, #tpu.memory_space<smem>>
    %78 = vector.broadcast %77 : f32 to vector<128x1xf32>
    %79 = arith.addf %76, %78 : vector<128x1xf32>
    %cst_19 = arith.constant 0.000000e+00 : f32
    %80 = vector.broadcast %cst_19 : f32 to vector<128x1xf32>
    %81 = arith.maximumf %79, %80 : vector<128x1xf32>
    %c2 = arith.constant 2 : index
    %82 = memref.load %arg5[%c2] : memref<16xf32, #tpu.memory_space<smem>>
    %83 = vector.broadcast %82 : f32 to vector<128x1xf32>
    %84 = arith.mulf %23, %83 : vector<128x1xf32>
    %c5 = arith.constant 5 : index
    %85 = memref.load %arg5[%c5] : memref<16xf32, #tpu.memory_space<smem>>
    %86 = vector.broadcast %85 : f32 to vector<128x1xf32>
    %87 = arith.mulf %26, %86 : vector<128x1xf32>
    %88 = arith.addf %84, %87 : vector<128x1xf32>
    %c8 = arith.constant 8 : index
    %89 = memref.load %arg5[%c8] : memref<16xf32, #tpu.memory_space<smem>>
    %90 = vector.broadcast %89 : f32 to vector<128x1xf32>
    %91 = arith.mulf %49, %90 : vector<128x1xf32>
    %92 = arith.addf %88, %91 : vector<128x1xf32>
    %c11 = arith.constant 11 : index
    %93 = memref.load %arg5[%c11] : memref<16xf32, #tpu.memory_space<smem>>
    %94 = vector.broadcast %93 : f32 to vector<128x1xf32>
    %95 = arith.addf %92, %94 : vector<128x1xf32>
    %cst_20 = arith.constant 0.000000e+00 : f32
    %96 = vector.broadcast %cst_20 : f32 to vector<128x1xf32>
    %97 = arith.maximumf %95, %96 : vector<128x1xf32>
    %c12 = arith.constant 12 : index
    %98 = memref.load %arg5[%c12] : memref<16xf32, #tpu.memory_space<smem>>
    %99 = vector.broadcast %98 : f32 to vector<128x1xf32>
    %100 = arith.mulf %65, %99 : vector<128x1xf32>
    %c13 = arith.constant 13 : index
    %101 = memref.load %arg5[%c13] : memref<16xf32, #tpu.memory_space<smem>>
    %102 = vector.broadcast %101 : f32 to vector<128x1xf32>
    %103 = arith.mulf %81, %102 : vector<128x1xf32>
    %104 = arith.addf %100, %103 : vector<128x1xf32>
    %c14 = arith.constant 14 : index
    %105 = memref.load %arg5[%c14] : memref<16xf32, #tpu.memory_space<smem>>
    %106 = vector.broadcast %105 : f32 to vector<128x1xf32>
    %107 = arith.mulf %97, %106 : vector<128x1xf32>
    %108 = arith.addf %104, %107 : vector<128x1xf32>
    %c15 = arith.constant 15 : index
    %109 = memref.load %arg5[%c15] : memref<16xf32, #tpu.memory_space<smem>>
    %110 = vector.broadcast %109 : f32 to vector<128x1xf32>
    %111 = arith.addf %108, %110 : vector<128x1xf32>
    %112 = math.tanh %111 : vector<128x1xf32>
    %c0_21 = arith.constant 0 : index
    %c0_22 = arith.constant 0 : index
    %113 = vector.load %arg6[%c0_21, %c0_22] : memref<128x1xf32, #tpu.memory_space<vmem>>, vector<128x1xf32>
    tpu.vector_store %arg6[%c0_21, %c0_22], %112 {strides = array<i32>} : memref<128x1xf32, #tpu.memory_space<vmem>>, vector<128x1xf32>,
    return
  }
  func.func @transform_0(%arg0: i32) -> (i32, i32) {
    %c0_i32 = arith.constant 0 : i32
    %c0_i32_0 = arith.constant 0 : i32
    return %arg0, %c0_i32 : i32, i32
  }
  func.func @transform_1(%arg0: i32) -> (i32, i32) {
    %c0_i32 = arith.constant 0 : i32
    %c0_i32_0 = arith.constant 0 : i32
    %c0_i32_1 = arith.constant 0 : i32
    return %c0_i32, %c0_i32_0 : i32, i32
  }
  func.func @transform_2(%arg0: i32) -> (i32, i32) {
    %c0_i32 = arith.constant 0 : i32
    %c0_i32_0 = arith.constant 0 : i32
    %c0_i32_1 = arith.constant 0 : i32
    return %c0_i32, %c0_i32_0 : i32, i32
  }
  func.func @transform_3(%arg0: i32) -> (i32, i32) {
    %c0_i32 = arith.constant 0 : i32
    %c0_i32_0 = arith.constant 0 : i32
    %c0_i32_1 = arith.constant 0 : i32
    return %c0_i32, %c0_i32_0 : i32, i32
  }
  func.func @transform_4(%arg0: i32) -> i32 {
    %c0_i32 = arith.constant 0 : i32
    %c0_i32_0 = arith.constant 0 : i32
    return %c0_i32 : i32
  }
  func.func @transform_5(%arg0: i32) -> (i32, i32) {
    %c0_i32 = arith.constant 0 : i32
    %c0_i32_0 = arith.constant 0 : i32
    return %arg0, %c0_i32 : i32, i32
  }
}

</mosaic_0001>

<bundles_post_ra>
// kernel: replace_or_flip_forward_batched.1
= control target key start
LH: loop header
LB: loop body
LE: loop exit
PB: predicated region body
PF: predicated region fallthrough
CT: control target
= control target key end

     0   :  { %10 = vsyncpa [#allocation3], 0  ;;  %s4096_s18 = smov 0   ;;  %s4098_s19 = smov 0   ;;  %s6190_s0 = inlined_call_operand.vmem [shape: f32[300,53], index: 0, kind: input, shape index: {}]   ;;  %s6191_s1 = inlined_call_operand.vmem [shape: f32[53,13], index: 1, kind: input, shape index: {}]   ;;  %s6192_s2 = inlined_call_operand.vmem [shape: f32[1,13], index: 2, kind: input, shape index: {}]   ;;  %s6193_s3 = inlined_call_operand.vmem [shape: f32[1,13], index: 3, kind: input, shape index: {}]   ;;  %s6194_s4 = inlined_call_operand.vmem [shape: f32[16], index: 4, kind: input, shape index: {}]   ;;  %s6195_s5 = inlined_call_operand.vmem [shape: f32[300,1], index: 5, kind: output, shape index: {}]  }
   0x1   :  { %s4100_s20 = smov 0  }
   0x2 LB: > { %s4109_s21 = sadd.s32 4294967295, %s4025_s20   ;;  %s4111_s22 = sadd.s32 1, %s4025_s20   ;;  %s4025_s20 = sphi %s4100_s20, %s6480_s20   ;;  %s4021_s19 = sphi %s4098_s19, %s6479_s19   ;;  %s4017_s18 = sphi %s4096_s18, %s6478_s18  }
   0x3   : > { %s130_s23 = ssub.s32 %s4025_s20, %s4111_s22  ;;  %s133_s24 = sadd.s32 1, %s4021_s19 }
   0x4   : > { %p131_p0 = scmp.eq.s32.totalorder %s130_s23, 0  ;;  %p143_p1 = scmp.ne.s32.totalorder %s4021_s19, %s4017_s18 }
   0x5   : > { %p144_p2 = scmp.eq.s32.totalorder %s4109_s21, 2  ;;  %p3122_p3 = scmp.ge.s32.totalorder %s4025_s20, 1 }
   0x6   : > { %s4119_s25 = scalar_select %p131_p0, %s4021_s19, %s133_s24  }
   0x7   : > { %p4121_p4 = por %p144_p2, %p143_p1  ;;  %p157_p5 = scmp.lt.s32.totalorder %s4025_s20, 4 }
   0x8   : > { %p3741_p6 = scmp.eq.s32.totalorder %s4109_s21, 0  ;;  %s179_s30 = sshll.u32 %s6194_s4, 4  ;;  %s180_s30 = int_to_ptr.vmem [resolvable:$true] %s179_s30 }
   0x9   : > { %p4126_p7 = pnand %p3122_p3, %p157_p5  ;;  %s3952_s6 = scalar_lea.vmem %s180_s30, 16 }
   0xa   : > { %p3953_p10 = scmp.ne.s32.totalorder %s180_s30, %s3952_s6  ;;  %p3960_p0 = scmp.lt.s32.totalorder %s180_s30, %s180_s30 }
   0xb   : > { %p3737_p8 = pneg %p4126_p7  ;;  %p3961_p1 = scmp.lt.s32.totalorder %s3952_s6, %s3952_s6 }
   0xd   : > { %p3738_p9 = pnand %p3741_p6, %p3737_p8  ;;  %p3962_p2 = por %p3961_p1, %p3960_p0 }
   0xf   : > { %p3954_p11 = pneg %p3738_p9 }
  0x11   : > { %p3955_p12 = pnand %p3954_p11, %p3953_p10 }
  0x13   : > { %p3956_p13 = pneg %p3955_p12 }
  0x15   : > { %p3963_p3 = pnand %p3962_p2, %p3956_p13 }
  0x17   : > { %3966 = shalt.err (!%p3963_p3)
}
  0x18   : > { %s4059_s7 = smov [#allocation2]   ;;  %209 = sbr.rel (%p4126_p7) target bundleno = 958 (0x3be), region = 40 }
  0x19   : > { %3740 = dma.vmem_to_smem (!%p3738_p9), %s180_s30, 16, %s4059_s7, [#allocation3]  }
  0x1f   : > { %4012 = dma.done.wait (%p3741_p6), [#allocation3], 16  }
  0x20   : > { %4014 = vsyncadd (%p3741_p6), [#allocation3], 4294967280 }
  0x21   : > { %215 = sfence }
  0x22   : > { %v276_v0 = vld [vmem:[%s6191_s1] sm:$0xff]  ;;  %v277_v1 = vld [vmem:[%s6191_s1 + $0x8] sm:$0xff]  ;;  %s4150_s12 = sshll.u32 %s4109_s21, 4  ;;  %v278_v2 = vld [vmem:[%s6191_s1 + $0x10] sm:$0xff]  ;;  %vm339_vm0 = vcmask 1044480   ;;  %v4060_v5 = vmov 52  }
  0x23   : > { %v344_v3 = vand.u32 4294901760, %v276_v0  ;;  %v347_v4 = vand.u32 4294901760, %v277_v1  ;;  %3839 = vset.pattern.permute.xlu0 %v4060_v5  ;;  %3838 = vset.pattern.permute.xlu1 %v4060_v5  ;;  %p246_p5 = scmp.lt.s32.totalorder %s4150_s12, 37  ;;  %v279_v6 = vld [vmem:[%s6191_s1 + $0x18] sm:$0xff]  ;;  %v350_v7 = vand.u32 4294901760, %v278_v2  ;;  %v280_v8 = vld [vmem:[%s6191_s1 + $0x20] sm:$0xff] }
  0x24   : > { %v353_v9 = vand.u32 4294901760, %v279_v6  ;;  %v281_v10 = vld [vmem:[%s6191_s1 + $0x28] sm:$0xff]  ;;  %v356_v11 = vand.u32 4294901760, %v280_v8  ;;  %v282_v12 = vld [vmem:[%s6191_s1 + $0x30] sm:$0x1f]  ;;  %vm290_vm1 = vcmask 433152  }
  0x25   : > { %v4168_v13 = vpack.c.bf16 %v347_v4, %v344_v3  ;;  %s247_s29 = scalar_select %p246_p5, %s4150_s12, 37  ;;  %v359_v14 = vand.u32 4294901760, %v281_v10  ;;  %v4172_v15 = vsel %vm339_vm0, %v282_v12, 0  ;;  %v4174_v16 = vsub.f32 %v276_v0, %v344_v3 }
  0x26   : > { %v4176_v17 = vpack.c.bf16 %v353_v9, %v350_v7  ;;  %v4178_v18 = vsub.f32 %v277_v1, %v347_v4  ;;  %v4180_v19 = vsub.f32 %v278_v2, %v350_v7  ;;  %v4185_v21 = vsub.f32 %v279_v6, %v353_v9  ;;  %s4062_s9 = smov 125   ;;  %s4063_s10 = smov 3  }
  0x27   : > { %3566 = vmatprep.subr.bf16.mxu1 %v4168_v13  ;;  %3602 = vmatprep.subr.bf16.mxu0 %v4168_v13  ;;  %s3129_s30 = sshll.u32 %s247_s29, 3  ;;  %v578_v20 = vand.u32 4294901760, %v4174_v16  ;;  %v4187_v22 = vsub.f32 %v280_v8, %v356_v11  ;;  %v4196_v23 = vpack.c.bf16 %v359_v14, %v356_v11  ;;  %v4199_v24 = vand.u32 4294901760, %v4172_v15  ;;  %s3164_s16 = sld [smem:[#allocation2 + $0x3]] }
  0x28   : > { %3568 = vmatpush3.bf16.msra.mxu1 %v4168_v13  ;;  %3604 = vmatpush3.bf16.msra.mxu0 %v4168_v13  ;;  %s4194_s8 = scalar_lea.vmem %s6190_s0, %s3129_s30  ;;  %v585_v25 = vand.u32 4294901760, %v4178_v18  ;;  %v592_v29 = vand.u32 4294901760, %v4180_v19  ;;  %v4214_v30 = vsub.f32 %v281_v10, %v359_v14  ;;  %v599_v36 = vand.u32 4294901760, %v4185_v21  ;;  %s3165_s17 = sld [smem:[#allocation2 + $0x6]] }
  0x29   : > { %v4203_v26 = vld [vmem:[%s4194_s8 + $0x8] sm:$0xff]  ;;  %v4206_v27 = vld [vmem:[%s4194_s8] sm:$0xff]  ;;  %3570 = vmatprep.subr.bf16.mxu1 %v4176_v17  ;;  %3606 = vmatprep.subr.bf16.mxu0 %v4176_v17  ;;  %v579_v28 = vsub.f32 %v4174_v16, %v578_v20  ;;  %v4219_v31 = vld [vmem:[%s4194_s8 + $0x10] sm:$0xff]  ;;  %v6196_v42 = vand.u32 4294901760, %v4187_v22  ;;  %s3168_s20 = sld [smem:[#allocation2 + $0x4]]  ;;  %s3169_s23 = sld [smem:[#allocation2 + $0x7]] }
  0x2a   : > { %6254 = vst [vmem:[#allocation6_spill] sm:$0xff] %v4206_v27  ;;  %1941 = vperm.xlu0 %3839, %v4203_v26   ;;  %1937 = vperm.xlu1 %3838, %v4206_v27   ;;  %6255 = vst [vmem:[#allocation7_spill] sm:$0xff] %v4219_v31  ;;  %v4222_v32 = vld [vmem:[%s4194_s8 + $0x18] sm:$0xff]  ;;  %v292_v33 = vsel %vm290_vm1, %v4206_v27, 0  ;;  %v586_v34 = vsub.f32 %v4178_v18, %v585_v25  ;;  %v295_v35 = vsel %vm290_vm1, %v4203_v26, 0  ;;  %v4231_v37 = vld [vmem:[%s4194_s8 + $0x50] sm:$0xff] }
  0x2b   : > { %v4233_v38 = vand.u32 4294901760, %v292_v33  ;;  %v580_v39 = vand.u32 4294901760, %v579_v28  ;;  %v4235_v40 = vand.u32 4294901760, %v295_v35  ;;  %v4238_v41 = vld [vmem:[%s4194_s8 + $0x20] sm:$0xff]  ;;  %v298_v44 = vsel %vm290_vm1, %v4219_v31, 0  ;;  %v4262_v51 = vld [vmem:[%s4194_s8 + $0x28] sm:$0xff] }
  0x2c   : > { %3572 = vmatpush3.bf16.msra.mxu1 %v4176_v17  ;;  %3608 = vmatpush3.bf16.msra.mxu0 %v4176_v17  ;;  %v587_v43 = vand.u32 4294901760, %v586_v34  ;;  %v301_v45 = vsel %vm290_vm1, %v4222_v32, 0  ;;  %v304_v46 = vsel %vm290_vm1, %v4238_v41, 0  ;;  %v4257_v49 = vand.u32 4294901760, %v298_v44  ;;  %v4275_v56 = vld [vmem:[%s4194_s8 + $0x60] sm:$0xff]  ;;  %v4299_v5 = vld [vmem:[%s4194_s8 + $0x30] sm:$0xff] }
  0x2d   : > { %3574 = vmatprep.subr.bf16.mxu1 %v4196_v23  ;;  %3610 = vmatprep.subr.bf16.mxu0 %v4196_v23  ;;  %v4252_v47 = vsub.f32 %v292_v33, %v4233_v38  ;;  %v4255_v48 = vsub.f32 %v295_v35, %v4235_v40  ;;  %v4259_v50 = vand.u32 4294901760, %v301_v45  ;;  %v4266_v53 = vand.u32 4294901760, %v304_v46  ;;  %v4302_v6 = vld [vmem:[%s4194_s8 + $0x38] sm:$0xff]  ;;  %v4314_v12 = vld [vmem:[%s4194_s8 + $0x70] sm:$0xff]  ;;  %v4319_v34 = vld [vmem:[%s4194_s8 + $0x40] sm:$0xff]  ;;  %s3172_s24 = sld [smem:[#allocation2 + $0x5]] }
  0x2e   : > { %1977 = vperm.xlu0 %3839, %v4231_v37   ;;  %1945 = vperm.xlu1 %3838, %v4219_v31   ;;  %v3577_v52 = vpack.c.bf16 %v587_v43, %v580_v39  ;;  %v593_v54 = vsub.f32 %v4180_v19, %v592_v29  ;;  %v600_v55 = vsub.f32 %v4185_v21, %v599_v36  ;;  %v307_v0 = vsel %vm290_vm1, %v4262_v51, 0  ;;  %s3173_s27 = sld [smem:[#allocation2 + $0x8]]  ;;  %s3167_s29 = sld [smem:[#allocation2 + $0x1]] }
  0x2f   : > { %6256 = vst [vmem:[#allocation8_spill] sm:$0xff] %v4252_v47  ;;  %6257 = vst [vmem:[#allocation9_spill] sm:$0xff] %v4255_v48  ;;  %v417_v57 = vand.u32 4294901760, %v4252_v47  ;;  %v427_v58 = vand.u32 4294901760, %v4255_v48  ;;  %v4280_v59 = vsub.f32 %v298_v44, %v4257_v49  ;;  %v4283_v60 = vsub.f32 %v301_v45, %v4259_v50  ;;  %s2273_s28 = sld [smem:[#allocation2]]  ;;  %s3171_s30 = sld [smem:[#allocation2 + $0x2]] }
  0x30   : > { %3576 = vmatpush3.bf16.msra.mxu1 %v4196_v23  ;;  %3612 = vmatpush3.bf16.msra.mxu0 %v4196_v23  ;;  %v4288_v61 = vsub.f32 %v304_v46, %v4266_v53  ;;  %v594_v62 = vand.u32 4294901760, %v593_v54  ;;  %v601_v63 = vand.u32 4294901760, %v600_v55  ;;  %v3613_v7 = vpack.c.bf16 %v585_v25, %v578_v20  ;;  %v4342_v54 = vld [vmem:[%s4194_s8 + $0x48] sm:$0xff]  ;;  %s5289_s6 = sld [smem:[#allocation2 + $0x9]]  ;;  %s5291_s7 = sld [smem:[#allocation2 + $0xa]] }
  0x31   : > { %6258 = vst [vmem:[#allocation10_spill] sm:$0xff] %v4280_v59  ;;  %6259 = vst [vmem:[#allocation11_spill] sm:$0xff] %v4283_v60  ;;  %3349 = vmatprep.subr.mxu1 %v4199_v24  ;;  %3463 = vmatprep.subr.mxu0 %v4199_v24  ;;  %v418_v1 = vsub.f32 %v4252_v47, %v417_v57  ;;  %v428_v2 = vsub.f32 %v4255_v48, %v427_v58  ;;  %v437_v3 = vand.u32 4294901760, %v4280_v59  ;;  %s5300_s11 = sld [smem:[#allocation2 + $0xd]]  ;;  %s5302_s13 = sld [smem:[#allocation2 + $0xe]] }
  0x32   : > { %6260 = vst [vmem:[#allocation12_spill] sm:$0xff] %v4288_v61  ;;  %v447_v4 = vand.u32 4294901760, %v4283_v60  ;;  %1985 = vperm.xlu0 %3839, %v4275_v56   ;;  %1949 = vperm.xlu1 %3838, %v4222_v32   ;;  %v457_v8 = vand.u32 4294901760, %v4288_v61  ;;  %v4309_v9 = vpack.c.bf16 %v601_v63, %v594_v62  ;;  %v4311_v10 = vand.u32 4294901760, %v307_v0  ;;  %s5308_s14 = sld [smem:[#allocation2 + $0xf]]  ;;  %s4065_s15 = smov 76  }
  0x33   : > { %3465 = vmatprep.mubr.f32.mxu0 %v417_v57  ;;  %v419_v11 = vand.u32 4294901760, %v418_v1  ;;  %v429_v14 = vand.u32 4294901760, %v428_v2  ;;  %v438_v28 = vsub.f32 %v4280_v59, %v437_v3  ;;  %v310_v35 = vsel %vm290_vm1, %v4299_v5, 0 }
  0x34   : > { %v448_v33 = vsub.f32 %v4283_v60, %v447_v4  ;;  %3350 = vmatpush3.msra.mxu1 %v4199_v24  ;;  %3464 = vmatpush3.msra.mxu0 %v4199_v24  ;;  %v458_v20 = vsub.f32 %v4288_v61, %v457_v8  ;;  %v4325_v25 = vsub.f32 %v307_v0, %v4311_v10  ;;  %v313_v39 = vsel %vm290_vm1, %v4302_v6, 0 }
  0x35   : > { %3351 = vmatprep.mubr.f32.mxu1 %v419_v11  ;;  %3578 = vmatprep.subr.bf16.mxu1 %v3577_v52  ;;  %v439_v43 = vand.u32 4294901760, %v438_v28  ;;  %v4335_v44 = vpack.c.bf16 %v599_v36, %v592_v29  ;;  %v4337_v45 = vand.u32 4294901760, %v310_v35  ;;  %v4339_v46 = vand.u32 4294901760, %v313_v39 }
  0x36   : > { %6261 = vst [vmem:[#allocation13_spill] sm:$0xff] %v4325_v25  ;;  %3466 = vmatmul.mubr.f32.vlgmr.msra.gmra.mrb[0].mxu0 %v427_v58  ;;  %1993 = vperm.xlu0 %3839, %v4314_v12   ;;  %v449_v55 = vand.u32 4294901760, %v448_v33  ;;  %v467_v57 = vand.u32 4294901760, %v4325_v25  ;;  %v316_v62 = vsel %vm290_vm1, %v4319_v34, 0  ;;  %v607_v29 = vsub.f32 %v4187_v22, %v6196_v42 }
  0x37   : > { %1953 = vperm.xlu1 %3838, %v4238_v41   ;;  %3352 = vmatmul.mubr.f32.vlgmr.msra.gmra.mrb[0].mxu1 %v429_v14  ;;  %v4353_v36 = vsub.f32 %v310_v35, %v4337_v45  ;;  %v4356_v58 = vsub.f32 %v313_v39, %v4339_v46  ;;  %v4358_v63 = vand.u32 4294901760, %v316_v62  ;;  %v613_v0 = vand.u32 4294901760, %v4214_v30 }
  0x38   : > { %3580 = vmatpush3.bf16.msra.mxu1 %v3577_v52  ;;  %3614 = vmatprep.subr.bf16.mxu0 %v3613_v7  ;;  %v459_v1 = vand.u32 4294901760, %v458_v20  ;;  %v468_v2 = vsub.f32 %v4325_v25, %v467_v57  ;;  %v608_v11 = vand.u32 4294901760, %v607_v29  ;;  %v319_v14 = vsel %vm290_vm1, %v4342_v54, 0  ;;  %v4371_v52 = vld [vmem:[%s4194_s8 + $0x58] sm:$0xff]  ;;  %v4392_v25 = vld [vmem:[%s4194_s8 + $0x68] sm:$0xff] }
  0x39   : > { %6262 = vst [vmem:[#allocation14_spill] sm:$0xff] %v4353_v36  ;;  %6263 = vst [vmem:[#allocation15_spill] sm:$0xff] %v4356_v58  ;;  %3468 = vmatprep.mubr.f32.mxu0 %v437_v3  ;;  %3616 = vmatpush3.bf16.msra.mxu0 %v3613_v7  ;;  %v477_v28 = vand.u32 4294901760, %v4353_v36  ;;  %v487_v33 = vand.u32 4294901760, %v4356_v58  ;;  %v4367_v35 = vsub.f32 %v316_v62, %v4358_v63  ;;  %v4373_v29 = vand.u32 4294901760, %v319_v14 }
  0x3a   : > { %v614_v39 = vsub.f32 %v4214_v30, %v613_v0  ;;  %3354 = vmatprep.mubr.f32.mxu1 %v439_v43  ;;  %3469 = vmatmul.mubr.f32.gmra.mrb[2].mxu0 %v447_v4  ;;  %v469_v20 = vand.u32 4294901760, %v468_v2  ;;  %vm1840_vm2 = vcmp.eq.f32.partialorder %v4206_v27, 0.0  ;;  %v4378_v3 = vsub.f32 %v4172_v15, %v4199_v24 }
  0x3b   : > { %6264 = vst [vmem:[#allocation16_spill] sm:$0xff] %v4367_v35  ;;  %1957 = vperm.xlu1 %3838, %v4262_v51   ;;  %3355 = vmatmul.mubr.f32.gmra.mrb[2].mxu1 %v449_v55  ;;  %v478_v7 = vsub.f32 %v4353_v36, %v477_v28  ;;  %v488_v62 = vsub.f32 %v4356_v58, %v487_v33  ;;  %v497_v43 = vand.u32 4294901760, %v4367_v35  ;;  %v322_v42 = vsel %vm290_vm1, %v4231_v37, 0 }
  0x3c   : > { %v615_v4 = vand.u32 4294901760, %v614_v39  ;;  %3471 = vmatprep.mubr.f32.mxu0 %v457_v8  ;;  %3357 = vmatprep.mubr.f32.mxu1 %v459_v1  ;;  %v4385_v2 = vsub.f32 %v319_v14, %v4373_v29  ;;  %v325_v15 = vsel %vm290_vm1, %v4371_v52, 0  ;;  %v6202_v1 = vmov 0  }
  0x3d   : > { %3582 = vmatprep.subr.bf16.mxu1 %v4309_v9  ;;  %3618 = vmatprep.subr.bf16.mxu0 %v4335_v44  ;;  %v479_v55 = vand.u32 4294901760, %v478_v7  ;;  %v498_v39 = vsub.f32 %v4367_v35, %v497_v43  ;;  %v4400_v14 = vsel %vm1840_vm2, 1, %v6202_v1  ;;  %v489_v58 = vand.u32 4294901760, %v488_v62 }
  0x3e   : > { %6265 = vst [vmem:[#allocation17_spill] sm:$0xff] %v4385_v2  ;;  %v3585_v8 = vpack.c.bf16 %v615_v4, %v608_v11  ;;  %3472 = vmatmul.mubr.f32.gmra.mrb[4].mxu0 %v467_v57  ;;  %3584 = vmatpush3.bf16.msra.mxu1 %v4309_v9  ;;  %v507_v36 = vand.u32 4294901760, %v4385_v2  ;;  %v4404_v61 = vand.u32 4294901760, %v322_v42  ;;  %v4406_v60 = vand.u32 4294901760, %v325_v15 }
  0x3f   : > { %1961 = vperm.xlu1 %3838, %v4299_v5   ;;  %3358 = vmatmul.mubr.f32.gmra.mrb[4].mxu1 %v469_v20  ;;  %v499_v11 = vand.u32 4294901760, %v498_v39  ;;  %v328_v7 = vsel %vm290_vm1, %v4275_v56, 0  ;;  %v4412_v4 = vand.u32 4294901760, %v4378_v3  ;;  %v331_v9 = vsel %vm290_vm1, %v4392_v25, 0 }
  0x40   : > { %3474 = vmatprep.mubr.f32.mxu0 %v477_v28  ;;  %3620 = vmatpush3.bf16.msra.mxu0 %v4335_v44  ;;  %v508_v57 = vsub.f32 %v4385_v2, %v507_v36  ;;  %v4419_v62 = vsub.f32 %v322_v42, %v4404_v61  ;;  %v4422_v20 = vsub.f32 %v325_v15, %v4406_v60  ;;  %v4424_v39 = vand.u32 4294901760, %v328_v7  ;;  %v4435_v42 = vld [vmem:[%s4194_s8 + $0x78] sm:$0xff] }
  0x41   : > { %3360 = vmatprep.mubr.f32.mxu1 %v479_v55  ;;  %3586 = vmatprep.subr.bf16.mxu1 %v3585_v8  ;;  %v6268_v1 = vand.u32 4294901760, %v4187_v22  ;;  %v621_v28 = vsub.f32 %v4378_v3, %v4412_v4  ;;  %v4430_v35 = vand.u32 4294901760, %v331_v9  ;;  %v334_v44 = vsel %vm290_vm1, %v4314_v12, 0 }
  0x42   : > { %6266 = vst [vmem:[#allocation18_spill] sm:$0xff] %v4419_v62  ;;  %6267 = vst [vmem:[#allocation19_spill] sm:$0xff] %v4422_v20  ;;  %3475 = vmatmul.mubr.f32.gmra.mrb[6].mxu0 %v487_v33  ;;  %3588 = vmatpush3.bf16.msra.mxu1 %v3585_v8  ;;  %v517_v15 = vand.u32 4294901760, %v4419_v62  ;;  %v527_v55 = vand.u32 4294901760, %v4422_v20  ;;  %vm1842_vm3 = vcmp.eq.f32.partialorder %v4219_v31, 0.0  ;;  %v4447_v48 = vand.u32 4294901760, %v334_v44 }
  0x43   : > { %v3621_v27 = vpack.c.bf16 %v613_v0, %v6268_v1  ;;  %v4441_v0 = vsub.f32 %v328_v7, %v4424_v39  ;;  %1965 = vperm.xlu1 %3838, %v4302_v6   ;;  %3361 = vmatmul.mubr.f32.gmra.mrb[6].mxu1 %v489_v58  ;;  %v509_v1 = vand.u32 4294901760, %v508_v57  ;;  %v622_v2 = vand.u32 4294901760, %v621_v28 }
  0x44   : > { %v4445_v59 = vsub.f32 %v331_v9, %v4430_v35  ;;  %6270 = vst [vmem:[#allocation21_spill] sm:$0xff] %v4447_v48  ;;  %3477 = vmatprep.mubr.f32.mxu0 %v497_v43  ;;  %3363 = vmatprep.mubr.f32.mxu1 %v499_v11  ;;  %v518_v33 = vsub.f32 %v4419_v62, %v517_v15  ;;  %v337_v7 = vsel %vm290_vm1, %v4435_v42, 0  ;;  %v6271_v57 = vmov 0  }
  0x45   : > { %6269 = vst [vmem:[#allocation20_spill] sm:$0xff] %v4441_v0  ;;  %v528_v8 = vsub.f32 %v4422_v20, %v527_v55  ;;  %v537_v47 = vand.u32 4294901760, %v4441_v0  ;;  %2032 = vrot.lane.b32.xlu0 %v4400_v14, %s4062_s9  ;;  %3622 = vmatprep.subr.bf16.mxu0 %v3621_v27  ;;  %v4458_v9 = vsub.f32 %v334_v44, %v4447_v48  ;;  %v4460_v43 = vand.u32 4294901760, %v337_v7 }
  0x46   : > { %v547_v58 = vand.u32 4294901760, %v4445_v59  ;;  %3478 = vmatmul.mubr.f32.gmra.mrb[8].mxu0 %v507_v36  ;;  %v519_v11 = vand.u32 4294901760, %v518_v33  ;;  %v4465_v28 = vsel %vm1842_vm3, 1, %v6271_v57  ;;  %3387 = vmatprep.subr.mxu1 %v622_v2  ;;  %vm1844_vm4 = vcmp.eq.f32.partialorder %v4238_v41, 0.0 }
  0x47   : > { %v538_v20 = vsub.f32 %v4441_v0, %v537_v47  ;;  %1969 = vperm.xlu1 %3838, %v4319_v34   ;;  %3364 = vmatmul.mubr.f32.gmra.mrb[8].mxu1 %v509_v1  ;;  %v529_v62 = vand.u32 4294901760, %v528_v8  ;;  %v557_v48 = vand.u32 4294901760, %v4458_v9  ;;  %v4473_v36 = vsub.f32 %v337_v7, %v4460_v43  ;;  %v6277_v8 = vld [vmem:[#allocation12_spill] sm:$0xff] }
  0x48   : > { %v548_v44 = vsub.f32 %v4445_v59, %v547_v58  ;;  %3480 = vmatprep.mubr.f32.mxu0 %v517_v15  ;;  %3624 = vmatpush3.bf16.msra.mxu0 %v3621_v27  ;;  %v4482_v1 = vsel %vm1844_vm4, 1, %v6271_v57  ;;  %v3589_v15 = vpack.c.bf16 %v4178_v18, %v4174_v16  ;;  %vm1846_vm5 = vcmp.eq.f32.partialorder %v4299_v5, 0.0 }
  0x49   : > { %v539_v33 = vand.u32 4294901760, %v538_v20  ;;  %3366 = vmatprep.mubr.f32.mxu1 %v519_v11  ;;  %2036 = vrot.lane.b32.xlu0 %v4465_v28, %s4062_s9  ;;  %v558_v31 = vsub.f32 %v4458_v9, %v557_v48  ;;  %v567_v0 = vand.u32 4294901760, %v4473_v36  ;;  %vm1848_vm6 = vcmp.eq.f32.partialorder %v4319_v34, 0.0  ;;  %v6283_v7 = vld [vmem:[#allocation18_spill] sm:$0xff] }
  0x4a   : > { %3481 = vmatmul.mubr.f32.gmra.mrb[10].mxu0 %v527_v55  ;;  %3388 = vmatpush3.msra.mxu1 %v622_v2  ;;  %v549_v27 = vand.u32 4294901760, %v548_v44  ;;  %v4493_v55 = vsel %vm1846_vm5, 1, %v6271_v57  ;;  %v4501_v18 = vsel %vm1848_vm6, 1, %v6271_v57  ;;  %vm1850_vm7 = vcmp.eq.f32.partialorder %v4231_v37, 0.0  ;;  %v6287_v44 = vld [vmem:[#allocation7_spill] sm:$0xff] }
  0x4b   : > { %1973 = vperm.xlu1 %3838, %v4342_v54   ;;  %3367 = vmatmul.mubr.f32.gmra.mrb[10].mxu1 %v529_v62  ;;  %v568_v20 = vsub.f32 %v4473_v36, %v567_v0  ;;  %v559_v2 = vand.u32 4294901760, %v558_v31  ;;  %v4514_v31 = vsel %vm1850_vm7, 1, %v6271_v57  ;;  %vm1852_vm8 = vcmp.eq.f32.partialorder %v4275_v56, 0.0  ;;  %v6274_v62 = vld [vmem:[#allocation9_spill] sm:$0xff] }
  0x4c   : > { %3483 = vmatprep.mubr.f32.mxu0 %v537_v47  ;;  %3369 = vmatprep.mubr.f32.mxu1 %v539_v33  ;;  %v3593_v47 = vpack.c.bf16 %v4185_v21, %v4180_v19  ;;  %vm1841_vm9 = vcmp.eq.f32.partialorder %v4203_v26, 0.0  ;;  %vm1854_vm10 = vcmp.eq.f32.partialorder %v4314_v12, 0.0  ;;  %vm1843_vm11 = vcmp.eq.f32.partialorder %v4222_v32, 0.0 }
  0x4d   : > { %2040 = vrot.lane.b32.xlu0 %v4482_v1, %s4062_s9  ;;  %3501 = vmatprep.subr.mxu0 %v4412_v4  ;;  %v569_v16 = vand.u32 4294901760, %v568_v20  ;;  %v4540_v19 = vsel %vm1841_vm9, 1, %v6271_v57  ;;  %v4545_v21 = vsel %vm1854_vm10, 1, %v6271_v57  ;;  %vm1845_vm12 = vcmp.eq.f32.partialorder %v4262_v51, 0.0 }
  0x4e   : > { %3484 = vmatmul.mubr.f32.gmra.mrb[12].mxu0 %v547_v58  ;;  %3590 = vmatprep.subr.bf16.mxu1 %v3589_v15  ;;  %vm1847_vm13 = vcmp.eq.f32.partialorder %v4302_v6, 0.0  ;;  %vm1849_vm14 = vcmp.eq.f32.partialorder %v4342_v54, 0.0  ;;  %vm1851_vm15 = vcmp.eq.f32.partialorder %v4371_v52, 0.0  ;;  %vm1853_vm0 = vcmp.eq.f32.partialorder %v4392_v25, 0.0 }
  0x4f   : > { %1981 = vperm.xlu1 %3838, %v4371_v52   ;;  %3370 = vmatmul.mubr.f32.gmra.mrb[12].mxu1 %v549_v27  ;;  %vm1855_vm1 = vcmp.eq.f32.partialorder %v4435_v42, 0.0  ;;  %vm1826_vm6 = vcmp.ne.f32.partialorder %v6287_v44, 0.0 }
  0x50   : > { %3486 = vmatprep.mubr.f32.mxu0 %v557_v48  ;;  %3502 = vmatpush3.msra.mxu0 %v4412_v4  ;;  %v4528_v48 = vsel %vm1852_vm8, 1, %v6271_v57  ;;  %v6273_v4 = vld [vmem:[#allocation8_spill] sm:$0xff] }
  0x51   : > { %3372 = vmatprep.mubr.f32.mxu1 %v559_v2  ;;  %2044 = vrot.lane.b32.xlu0 %v4493_v55, %s4062_s9 }
  0x52   : > { %3487 = vmatmul.mubr.f32.gmra.mrb[14].mxu0 %v567_v0  ;;  %3626 = vmatprep.subr.bf16.mxu0 %v4168_v13  ;;  %v1871_v0 = vsel %vm1855_vm1, 1, %v6271_v57 }
  0x53   : > { %1989 = vperm.xlu1 %3838, %v4392_v25   ;;  %3373 = vmatmul.mubr.f32.gmra.mrb[14].mxu1 %v569_v16 }
  0x54   : > { %3503 = vmatprep.mubr.f32.mxu0 %v4233_v38  ;;  %3389 = vmatprep.mubr.f32.mxu1 %v4233_v38 }
  0x55   : > { %2048 = vrot.lane.b32.xlu0 %v4501_v18, %s4062_s9 }
  0x56   : > { %3504 = vmatmul.mubr.f32.vlgmr.msra.gmra.mrb[0].mxu0 %v4235_v40 }
  0x57   : > { %1997 = vperm.xlu1 %3838, %v4435_v42   ;;  %3390 = vmatmul.mubr.f32.vlgmr.msra.gmra.mrb[0].mxu1 %v4235_v40 }
  0x58   : > { %3592 = vmatpush3.bf16.msra.mxu1 %v3589_v15  ;;  %3506 = vmatprep.mubr.f32.mxu0 %v4257_v49 }
  0x59   : > { %3628 = vmatpush3.bf16.msra.mxu0 %v4168_v13  ;;  %3392 = vmatprep.mubr.f32.mxu1 %v4257_v49  ;;  %v3597_v13 = vpack.c.bf16 %v4214_v30, %v4187_v22  ;;  %v4556_v22 = vsel %vm1843_vm11, 1, %v6271_v57  ;;  %v1863_v30 = vsel %vm1847_vm13, 1, %v6271_v57  ;;  %vm1828_vm11 = vcmp.ne.f32.partialorder %v4238_v41, 0.0 }
  0x5a   : > { %3507 = vmatmul.mubr.f32.gmra.mrb[2].mxu0 %v4259_v50  ;;  %2052 = vrot.lane.b32.xlu0 %v4514_v31, %s4062_s9 }
  0x5b   : > { %3393 = vmatmul.mubr.f32.gmra.mrb[2].mxu1 %v4259_v50  ;;  %3509 = vmatprep.mubr.f32.mxu0 %v4266_v53 }
  0x5c   : > { %3395 = vmatprep.mubr.f32.mxu1 %v4266_v53  ;;  %3594 = vmatprep.subr.bf16.mxu1 %v3593_v47 }
  0x5d   : > { %3596 = vmatpush3.bf16.msra.mxu1 %v3593_v47  ;;  %3630 = vmatprep.subr.bf16.mxu0 %v4176_v17 }
  0x5e   : > { %3510 = vmatmul.mubr.f32.gmra.mrb[4].mxu0 %v4311_v10  ;;  %2056 = vrot.lane.b32.xlu0 %v4528_v48, %s4062_s9 }
  0x5f   : > { %3396 = vmatmul.mubr.f32.gmra.mrb[4].mxu1 %v4311_v10  ;;  %3512 = vmatprep.mubr.f32.mxu0 %v4337_v45 }
  0x60   : > { %3632 = vmatpush3.bf16.msra.mxu0 %v4176_v17  ;;  %3398 = vmatprep.mubr.f32.mxu1 %v4337_v45  ;;  %v4569_v17 = vsel %vm1845_vm12, 1, %v6271_v57 }
  0x61   : > { %3598 = vmatprep.subr.bf16.mxu1 %v3597_v13  ;;  %2034 = vrot.lane.b32.xlu1 %v4540_v19, %s4062_s9 }
  0x62   : > { %3513 = vmatmul.mubr.f32.gmra.mrb[6].mxu0 %v4339_v46  ;;  %2060 = vrot.lane.b32.xlu0 %v4545_v21, %s4062_s9 }
  0x63   : > { %3399 = vmatmul.mubr.f32.gmra.mrb[6].mxu1 %v4339_v46  ;;  %3515 = vmatprep.mubr.f32.mxu0 %v4358_v63 }
  0x64   : > { %3401 = vmatprep.mubr.f32.mxu1 %v4358_v63  ;;  %3600 = vmatpush3.bf16.msra.mxu1 %v3597_v13 }
  0x65   : > { %3634 = vmatprep.subr.bf16.mxu0 %v4196_v23  ;;  %2038 = vrot.lane.b32.xlu1 %v4556_v22, %s4062_s9 }
  0x66   : > { %3516 = vmatmul.mubr.f32.gmra.mrb[8].mxu0 %v4373_v29  ;;  %1872 = vrot.lane.b32.xlu0 %v4400_v14, %s4063_s10  ;;  %v6272_v14 = vld [vmem:[#allocation21_spill] sm:$0xff] }
  0x67   : > { %3402 = vmatmul.mubr.f32.gmra.mrb[8].mxu1 %v4373_v29  ;;  %3518 = vmatprep.mubr.f32.mxu0 %v4404_v61 }
  0x68   : > { %3636 = vmatpush3.bf16.msra.mxu0 %v4196_v23  ;;  %3404 = vmatprep.mubr.f32.mxu1 %v4404_v61  ;;  %v1865_v23 = vsel %vm1849_vm14, 1, %v6271_v57 }
  0x69   : > { %3425 = vmatprep.subr.mxu1 %v4378_v3  ;;  %2042 = vrot.lane.b32.xlu1 %v4569_v17, %s4062_s9 }
  0x6a   : > { %3519 = vmatmul.mubr.f32.gmra.mrb[10].mxu0 %v4406_v60  ;;  %1876 = vrot.lane.b32.xlu0 %v4465_v28, %s4063_s10 }
  0x6b   : > { %3405 = vmatmul.mubr.f32.gmra.mrb[10].mxu1 %v4406_v60  ;;  %3521 = vmatprep.mubr.f32.mxu0 %v4424_v39 }
  0x6c   : > { %3407 = vmatprep.mubr.f32.mxu1 %v4424_v39  ;;  %3426 = vmatpush3.msra.mxu1 %v4378_v3  ;;  %v1867_v3 = vsel %vm1851_vm15, 1, %v6271_v57 }
  0x6d   : > { %3539 = vmatprep.subr.mxu0 %v4199_v24  ;;  %2046 = vrot.lane.b32.xlu1 %v1863_v30, %s4062_s9 }
  0x6e   : > { %3522 = vmatmul.mubr.f32.gmra.mrb[12].mxu0 %v4430_v35  ;;  %1880 = vrot.lane.b32.xlu0 %v4482_v1, %s4063_s10 }
  0x6f   : > { %3408 = vmatmul.mubr.f32.gmra.mrb[12].mxu1 %v4430_v35  ;;  %3524 = vmatprep.mubr.f32.mxu0 %v6272_v14 }
  0x70   : > { %3540 = vmatpush3.msra.mxu0 %v4199_v24  ;;  %3410 = vmatprep.mubr.f32.mxu1 %v6272_v14  ;;  %v1869_v24 = vsel %vm1853_vm0, 1, %v6271_v57  ;;  %vm6225_vm0 = vcmp.ne.f32.partialorder %v4299_v5, 0.0 }
  0x71   : > { %2050 = vrot.lane.b32.xlu1 %v1865_v23, %s4062_s9 }
  0x72   : > { %3525 = vmatmul.mubr.f32.gmra.mrb[14].mxu0 %v4460_v43  ;;  %1884 = vrot.lane.b32.xlu0 %v4493_v55, %s4063_s10 }
  0x73   : > { %3411 = vmatmul.mubr.f32.gmra.mrb[14].mxu1 %v4460_v43  ;;  %3541 = vmatprep.mubr.f32.mxu0 %v4233_v38  ;;  %v6275_v38 = vld [vmem:[#allocation10_spill] sm:$0xff] }
  0x74   : > { %3427 = vmatprep.mubr.f32.mxu1 %v6273_v4 }
  0x75   : > { %2054 = vrot.lane.b32.xlu1 %v1867_v3, %s4062_s9 }
  0x76   : > { %3542 = vmatmul.mubr.f32.vlgmr.msra.gmra.mrb[0].mxu0 %v4235_v40  ;;  %1888 = vrot.lane.b32.xlu0 %v4501_v18, %s4063_s10  ;;  %v6276_v40 = vld [vmem:[#allocation11_spill] sm:$0xff] }
  0x77   : > { %3428 = vmatmul.mubr.f32.vlgmr.msra.gmra.mrb[0].mxu1 %v6274_v62  ;;  %3544 = vmatprep.mubr.f32.mxu0 %v4257_v49  ;;  %v6278_v49 = vld [vmem:[#allocation13_spill] sm:$0xff] }
  0x78   : > { %3430 = vmatprep.mubr.f32.mxu1 %v6275_v38 }
  0x79   : > { %2058 = vrot.lane.b32.xlu1 %v1869_v24, %s4062_s9 }
  0x7a   : > { %3545 = vmatmul.mubr.f32.gmra.mrb[2].mxu0 %v4259_v50  ;;  %1892 = vrot.lane.b32.xlu0 %v4514_v31, %s4063_s10  ;;  %v6279_v50 = vld [vmem:[#allocation14_spill] sm:$0xff] }
  0x7b   : > { %3431 = vmatmul.mubr.f32.gmra.mrb[2].mxu1 %v6276_v40  ;;  %3547 = vmatprep.mubr.f32.mxu0 %v4266_v53  ;;  %v6280_v53 = vld [vmem:[#allocation15_spill] sm:$0xff] }
  0x7c   : > { %3433 = vmatprep.mubr.f32.mxu1 %v6277_v8 }
  0x7d   : > { %2062 = vrot.lane.b32.xlu1 %v1871_v0, %s4062_s9  ;;  %s5295_s9 = sld [smem:[#allocation2 + $0xb]] }
  0x7e   : > { %3548 = vmatmul.mubr.f32.gmra.mrb[4].mxu0 %v4311_v10  ;;  %1896 = vrot.lane.b32.xlu0 %v4528_v48, %s4063_s10  ;;  %v6281_v10 = vld [vmem:[#allocation16_spill] sm:$0xff] }
  0x7f   : > { %3434 = vmatmul.mubr.f32.gmra.mrb[4].mxu1 %v6278_v49  ;;  %3550 = vmatprep.mubr.f32.mxu0 %v4337_v45  ;;  %v6282_v45 = vld [vmem:[#allocation17_spill] sm:$0xff] }
  0x80   : > { %3436 = vmatprep.mubr.f32.mxu1 %v6279_v50  ;;  %v6290_v50 = vmov 0 }
  0x81   : > { %1874 = vrot.lane.b32.xlu1 %v4540_v19, %s4063_s10 }
  0x82   : > { %3551 = vmatmul.mubr.f32.gmra.mrb[6].mxu0 %v4339_v46  ;;  %1900 = vrot.lane.b32.xlu0 %v4545_v21, %s4063_s10  ;;  %v6284_v46 = vld [vmem:[#allocation19_spill] sm:$0xff] }
  0x83   : > { %3437 = vmatmul.mubr.f32.gmra.mrb[6].mxu1 %v6280_v53  ;;  %3553 = vmatprep.mubr.f32.mxu0 %v4358_v63  ;;  %v6285_v63 = vld [vmem:[#allocation20_spill] sm:$0xff] }
  0x84   : > { %3439 = vmatprep.mubr.f32.mxu1 %v6281_v10 }
  0x85   : > { %1878 = vrot.lane.b32.xlu1 %v4556_v22, %s4063_s10 }
  0x86   : > { %3554 = vmatmul.mubr.f32.gmra.mrb[8].mxu0 %v4373_v29 }
  0x87   : > { %3440 = vmatmul.mubr.f32.gmra.mrb[8].mxu1 %v6282_v45  ;;  %3556 = vmatprep.mubr.f32.mxu0 %v4404_v61 }
  0x88   : > { %3442 = vmatprep.mubr.f32.mxu1 %v6283_v7  ;;  %v6292_v7 = vmov 0 }
  0x89   : > { %1882 = vrot.lane.b32.xlu1 %v4569_v17, %s4063_s10 }
  0x8a   : > { %3557 = vmatmul.mubr.f32.gmra.mrb[10].mxu0 %v4406_v60 }
  0x8b   : > { %3443 = vmatmul.mubr.f32.gmra.mrb[10].mxu1 %v6284_v46  ;;  %3559 = vmatprep.mubr.f32.mxu0 %v4424_v39 }
  0x8c   : > { %3445 = vmatprep.mubr.f32.mxu1 %v6285_v63 }
  0x8d   : > { %1886 = vrot.lane.b32.xlu1 %v1863_v30, %s4063_s10 }
  0x8e   : > { %3560 = vmatmul.mubr.f32.gmra.mrb[12].mxu0 %v4430_v35 }
  0x8f   : > { %3446 = vmatmul.mubr.f32.gmra.mrb[12].mxu1 %v4445_v59  ;;  %3562 = vmatprep.mubr.f32.mxu0 %v6272_v14 }
  0x90   : > { %3448 = vmatprep.mubr.f32.mxu1 %v4458_v9 }
  0x91   : > { %1890 = vrot.lane.b32.xlu1 %v1865_v23, %s4063_s10 }
  0x92   : > { %3563 = vmatmul.mubr.f32.gmra.mrb[14].mxu0 %v4460_v43  ;;  %v6286_v43 = vld [vmem:[#allocation6_spill] sm:$0xff] }
  0x93   : > { %3449 = vmatmul.mubr.f32.gmra.mrb[14].mxu1 %v4473_v36  ;;  %vm1824_vm2 = vcmp.ne.f32.partialorder %v6286_v43, 0.0 }
  0x95   : > { %1894 = vrot.lane.b32.xlu1 %v1867_v3, %s4063_s10 }
  0x99   : > { %1898 = vrot.lane.b32.xlu1 %v1869_v24, %s4063_s10 }
  0x9d   : > { %1902 = vrot.lane.b32.xlu1 %v1871_v0, %s4063_s10 }
  0xa9   : > { %v4663_v60 = vpop.permute.xlu0 %1941  ;;  %v4665_v61 = vpop.permute.xlu1 %1937 }
  0xaa   : > { %vm2000_vm3 = vcmp.eq.f32.partialorder %v6286_v43, %v4665_v61 }
  0xad   : > { %v4667_v59 = vpop.permute.xlu0 %1977  ;;  %v4669_v35 = vpop.permute.xlu1 %1945 }
  0xae   : > { %vm2002_vm8 = vcmp.eq.f32.partialorder %v6287_v44, %v4669_v35 }
  0xb1   : > { %v4671_v29 = vpop.permute.xlu0 %1985  ;;  %v4673_v39 = vpop.permute.xlu1 %1949 }
  0xb5   : > { %v4675_v58 = vpop.permute.xlu0 %1993 }
  0xb6   : > { %v4677_v9 = vpop.permute.xlu1 %1953 }
  0xb7   : > { %vm2004_vm13 = vcmp.eq.f32.partialorder %v4238_v41, %v4677_v9 }
  0xb9   : > { %v2033_v11 = vpop.permute.xlu0 %2032 }
  0xba   : > { %v4682_v28 = vpop.permute.xlu1 %1957  ;;  %vm2064_vm4 = vcmp.ne.s32.totalorder %v2033_v11, 0 }
  0xbb   : > { %vm2080_vm5 = vmand %vm1824_vm2, %vm2064_vm4 }
  0xbc   : > { %vm2096_vm7 = vmand %vm2080_vm5, %vm2000_vm3 }
  0xbd   : > { %v2037_v36 = vpop.permute.xlu0 %2036  ;;  %v2112_v33 = vsel %vm2096_vm7, 1, %v6271_v57 }
  0xbe   : > { %v4693_v1 = vpop.permute.xlu1 %1961  ;;  %vm2066_vm9 = vcmp.ne.s32.totalorder %v2037_v36, 0  ;;  %2128 = vrot.lane.b32.xlu0 %v2112_v33, %s4063_s10 }
  0xbf   : > { %vm2082_vm10 = vmand %vm1826_vm6, %vm2066_vm9  ;;  %vm6224_vm4 = vcmp.eq.f32.partialorder %v4299_v5, %v4693_v1  ;;  %vm6218_vm9 = vcmp.ne.f32.partialorder %v4319_v34, 0.0 }
  0xc0   : > { %vm2098_vm12 = vmand %vm2082_vm10, %vm2002_vm8 }
  0xc1   : > { %v2041_v15 = vpop.permute.xlu0 %2040  ;;  %v2114_v27 = vsel %vm2098_vm12, 1, %v6271_v57 }
  0xc2   : > { %v4705_v20 = vpop.permute.xlu1 %1965  ;;  %vm2068_vm14 = vcmp.ne.s32.totalorder %v2041_v15, 0  ;;  %2132 = vrot.lane.b32.xlu0 %v2114_v27, %s4063_s10  ;;  %v6310_v27 = vmov 0 }
  0xc3   : > { %vm2084_vm15 = vmand %vm1828_vm11, %vm2068_vm14 }
  0xc4   : > { %vm2100_vm1 = vmand %vm2084_vm15, %vm2004_vm13 }
  0xc5   : > { %v2045_v2 = vpop.permute.xlu0 %2044  ;;  %v2116_v55 = vsel %vm2100_vm1, 1, %v6271_v57  ;;  %vm6220_vm1 = vcmp.ne.f32.partialorder %v4231_v37, 0.0 }
  0xc6   : > { %v4717_v16 = vpop.permute.xlu1 %1969  ;;  %vm2070_vm5 = vcmp.ne.s32.totalorder %v2045_v2, 0  ;;  %2136 = vrot.lane.b32.xlu0 %v2116_v55, %s4063_s10  ;;  %v6318_v2 = vmov 0 }
  0xc7   : > { %vm2086_vm7 = vmand %vm6225_vm0, %vm2070_vm5  ;;  %vm6219_vm12 = vcmp.eq.f32.partialorder %v4319_v34, %v4717_v16 }
  0xc8   : > { %vm2102_vm10 = vmand %vm2086_vm7, %vm6224_vm4  ;;  %vm6223_vm7 = vcmp.eq.f32.partialorder %v4231_v37, %v4667_v59  ;;  %vm6227_vm4 = vcmp.eq.f32.partialorder %v4222_v32, %v4673_v39 }
  0xc9   : > { %v2049_v18 = vpop.permute.xlu0 %2048  ;;  %v2118_v31 = vsel %vm2102_vm10, 1, %v6271_v57 }
  0xca   : > { %v4729_v47 = vpop.permute.xlu1 %1973  ;;  %vm2072_vm14 = vcmp.ne.s32.totalorder %v2049_v18, 0  ;;  %2140 = vrot.lane.b32.xlu0 %v2118_v31, %s4063_s10 }
  0xcb   : > { %vm2088_vm15 = vmand %vm6218_vm9, %vm2072_vm14  ;;  %vm6221_vm9 = vcmp.ne.f32.partialorder %v4275_v56, 0.0 }
  0xcc   : > { %vm2104_vm5 = vmand %vm2088_vm15, %vm6219_vm12  ;;  %vm6222_vm12 = vcmp.eq.f32.partialorder %v4275_v56, %v4671_v29 }
  0xcd   : > { %v2053_v48 = vpop.permute.xlu0 %2052  ;;  %v2120_v13 = vsel %vm2104_vm5, 1, %v6271_v57 }
  0xce   : > { %v4741_v19 = vpop.permute.xlu1 %1981  ;;  %vm2074_vm10 = vcmp.ne.s32.totalorder %v2053_v48, 0  ;;  %2144 = vrot.lane.b32.xlu0 %v2120_v13, %s4063_s10  ;;  %v6342_v48 = vmov 0 }
  0xcf   : > { %vm2090_vm14 = vmand %vm6220_vm1, %vm2074_vm10 }
  0xd0   : > { %vm2106_vm15 = vmand %vm2090_vm14, %vm6223_vm7  ;;  %vm6235_vm14 = vcmp.ne.f32.partialorder %v4203_v26, 0.0 }
  0xd1   : > { %v2057_v21 = vpop.permute.xlu0 %2056  ;;  %v2122_v22 = vsel %vm2106_vm15, 1, %v6271_v57  ;;  %vm6226_vm15 = vcmp.eq.f32.partialorder %v4203_v26, %v4663_v60 }
  0xd2   : > { %v4753_v17 = vpop.permute.xlu1 %1989  ;;  %vm2076_vm5 = vcmp.ne.s32.totalorder %v2057_v21, 0  ;;  %2148 = vrot.lane.b32.xlu0 %v2122_v22, %s4063_s10  ;;  %v6346_v22 = vmov 0 }
  0xd3   : > { %vm2092_vm10 = vmand %vm6221_vm9, %vm2076_vm5 }
  0xd4   : > { %vm2108_vm1 = vmand %vm2092_vm10, %vm6222_vm12 }
  0xd5   : > { %v4761_v30 = vpop.permute.xlu0 %2060  ;;  %v2124_v23 = vsel %vm2108_vm1, 1, %v6271_v57  ;;  %vm6231_vm1 = vcmp.ne.f32.partialorder %v4222_v32, 0.0 }
  0xd6   : > { %v4764_v14 = vpop.permute.xlu1 %1997  ;;  %2152 = vrot.lane.b32.xlu0 %v2124_v23, %s4063_s10 }
  0xd9   : > { %v1873_v3 = vpop.permute.xlu0 %1872 }
  0xda   : > { %v2035_v4 = vpop.permute.xlu1 %2034  ;;  %vm1904_vm5 = vcmp.ne.s32.totalorder %v1873_v3, 0 }
  0xdb   : > { %vm2065_vm9 = vcmp.ne.s32.totalorder %v2035_v4, 0  ;;  %vm1920_vm10 = vmand %vm1824_vm2, %vm1904_vm5 }
  0xdc   : > { %vm2081_vm12 = vmand %vm6235_vm14, %vm2065_vm9 }
  0xdd   : > { %v1877_v24 = vpop.permute.xlu0 %1876  ;;  %vm2097_vm7 = vmand %vm2081_vm12, %vm6226_vm15  ;;  %vm6228_vm15 = vcmp.ne.f32.partialorder %v4262_v51, 0.0 }
  0xde   : > { %v2039_v62 = vpop.permute.xlu1 %2038  ;;  %vm1906_vm0 = vcmp.ne.s32.totalorder %v1877_v24, 0  ;;  %v2113_v38 = vsel %vm2097_vm7, 1, %v6271_v57  ;;  %vm4784_vm2 = vmand %vm1920_vm10, %vm2000_vm3  ;;  %vm6229_vm3 = vcmp.eq.f32.partialorder %v4262_v51, %v4682_v28 }
  0xdf   : > { %vm2067_vm9 = vcmp.ne.s32.totalorder %v2039_v62, 0  ;;  %vm1922_vm5 = vmand %vm1826_vm6, %vm1906_vm0  ;;  %2130 = vrot.lane.b32.xlu1 %v2113_v38, %s4063_s10 }
  0xe0   : > { %vm2083_vm12 = vmand %vm6231_vm1, %vm2067_vm9 }
  0xe1   : > { %v1881_v40 = vpop.permute.xlu0 %1880  ;;  %vm2099_vm7 = vmand %vm2083_vm12, %vm6227_vm4  ;;  %vm6230_vm4 = vcmp.ne.f32.partialorder %v4302_v6, 0.0 }
  0xe2   : > { %v2043_v8 = vpop.permute.xlu1 %2042  ;;  %vm1908_vm10 = vcmp.ne.s32.totalorder %v1881_v40, 0  ;;  %v2115_v49 = vsel %vm2099_vm7, 1, %v6271_v57  ;;  %vm4803_vm6 = vmand %vm1922_vm5, %vm2002_vm8  ;;  %vm6232_vm8 = vcmp.eq.f32.partialorder %v4302_v6, %v4705_v20 }
  0xe3   : > { %v6291_v50 = vsel %vm4803_vm6, 4294967295, %v6290_v50  ;;  %vm2069_vm0 = vcmp.ne.s32.totalorder %v2043_v8, 0  ;;  %vm1924_vm9 = vmand %vm1828_vm11, %vm1908_vm10  ;;  %2134 = vrot.lane.b32.xlu1 %v2115_v49, %s4063_s10 }
  0xe4   : > { %vm2085_vm12 = vmand %vm6228_vm15, %vm2069_vm0  ;;  %vm6294_vm0 = vcmp.ne.f32.partialorder %v4299_v5, 0.0 }
  0xe5   : > { %v1885_v53 = vpop.permute.xlu0 %1884  ;;  %vm2101_vm7 = vmand %vm2085_vm12, %vm6229_vm3  ;;  %vm6233_vm3 = vcmp.ne.f32.partialorder %v4342_v54, 0.0 }
  0xe6   : > { %v2047_v10 = vpop.permute.xlu1 %2046  ;;  %vm1910_vm5 = vcmp.ne.s32.totalorder %v1885_v53, 0  ;;  %v2117_v45 = vsel %vm2101_vm7, 1, %v6271_v57  ;;  %vm4822_vm11 = vmand %vm1924_vm9, %vm2004_vm13  ;;  %vm6234_vm13 = vcmp.eq.f32.partialorder %v4342_v54, %v4729_v47 }
  0xe7   : > { %v6293_v7 = vsel %vm4822_vm11, 4294967295, %v6292_v7  ;;  %vm2071_vm10 = vcmp.ne.s32.totalorder %v2047_v10, 0  ;;  %vm1926_vm15 = vmand %vm6294_vm0, %vm1910_vm5  ;;  %2138 = vrot.lane.b32.xlu1 %v2117_v45, %s4063_s10  ;;  %vm6295_vm5 = vcmp.eq.f32.partialorder %v4299_v5, %v4693_v1  ;;  %v6308_v1 = vmov 0 }
  0xe8   : > { %vm2087_vm12 = vmand %vm6230_vm4, %vm2071_vm10  ;;  %vm6298_vm4 = vcmp.ne.f32.partialorder %v4319_v34, 0.0 }
  0xe9   : > { %v1889_v46 = vpop.permute.xlu0 %1888  ;;  %vm2103_vm7 = vmand %vm2087_vm12, %vm6232_vm8  ;;  %vm6236_vm8 = vcmp.ne.f32.partialorder %v4371_v52, 0.0 }
  0xea   : > { %v2051_v41 = vpop.permute.xlu1 %2050  ;;  %vm1912_vm9 = vcmp.ne.s32.totalorder %v1889_v46, 0  ;;  %v2119_v63 = vsel %vm2103_vm7, 1, %v6271_v57  ;;  %vm4841_vm0 = vmand %vm1926_vm15, %vm6295_vm5  ;;  %vm6299_vm5 = vcmp.eq.f32.partialorder %v4319_v34, %v4717_v16 }
  0xeb   : > { %vm2073_vm10 = vcmp.ne.s32.totalorder %v2051_v41, 0  ;;  %vm1928_vm1 = vmand %vm6298_vm4, %vm1912_vm9  ;;  %2142 = vrot.lane.b32.xlu1 %v2119_v63, %s4063_s10 }
  0xec   : > { %vm2089_vm12 = vmand %vm6233_vm3, %vm2073_vm10  ;;  %vm6302_vm10 = vcmp.ne.f32.partialorder %v4231_v37, 0.0 }
  0xed   : > { %vm2105_vm7 = vmand %vm2089_vm12, %vm6234_vm13  ;;  %v1893_v5 = vpop.permute.xlu0 %1892  ;;  %vm6237_vm12 = vcmp.eq.f32.partialorder %v4371_v52, %v4741_v19  ;;  %vm6239_vm13 = vcmp.ne.f32.partialorder %v4392_v25, 0.0 }
  0xee   : > { %v2055_v35 = vpop.permute.xlu1 %2054  ;;  %v2121_v9 = vsel %vm2105_vm7, 1, %v6271_v57  ;;  %vm1914_vm15 = vcmp.ne.s32.totalorder %v1893_v5, 0  ;;  %vm4858_vm4 = vmand %vm1928_vm1, %vm6299_vm5 }
  0xef   : > { %vm2075_vm9 = vcmp.ne.s32.totalorder %v2055_v35, 0  ;;  %2146 = vrot.lane.b32.xlu1 %v2121_v9, %s4063_s10  ;;  %vm1930_vm3 = vmand %vm6302_vm10, %vm1914_vm15  ;;  %vm6303_vm15 = vcmp.eq.f32.partialorder %v4231_v37, %v4667_v59 }
  0xf0   : > { %vm2091_vm7 = vmand %vm6236_vm8, %vm2075_vm9  ;;  %vm6306_vm9 = vcmp.ne.f32.partialorder %v4275_v56, 0.0 }
  0xf1   : > { %vm2107_vm1 = vmand %vm2091_vm7, %vm6237_vm12  ;;  %v1897_v34 = vpop.permute.xlu0 %1896  ;;  %vm6238_vm7 = vcmp.eq.f32.partialorder %v4392_v25, %v4753_v17  ;;  %vm6240_vm12 = vcmp.ne.f32.partialorder %v4314_v12, 0.0 }
  0xf2   : > { %v2059_v11 = vpop.permute.xlu1 %2058  ;;  %v2123_v44 = vsel %vm2107_vm1, 1, %v6271_v57  ;;  %vm1916_vm5 = vcmp.ne.s32.totalorder %v1897_v34, 0  ;;  %vm4877_vm10 = vmand %vm1930_vm3, %vm6303_vm15 }
  0xf3   : > { %vm2077_vm14 = vcmp.ne.s32.totalorder %v2059_v11, 0  ;;  %2150 = vrot.lane.b32.xlu1 %v2123_v44, %s4063_s10  ;;  %vm1932_vm8 = vmand %vm6306_vm9, %vm1916_vm5  ;;  %vm6307_vm5 = vcmp.eq.f32.partialorder %v4275_v56, %v4671_v29  ;;  %v6314_v56 = vmov 0 }
  0xf4   : > { %vm2093_vm1 = vmand %vm6239_vm13, %vm2077_vm14  ;;  %vm6241_vm14 = vcmp.eq.f32.partialorder %v4314_v12, %v4675_v58  ;;  %vm6313_vm13 = vcmp.eq.f32.partialorder %v4203_v26, %v4663_v60 }
  0xf5   : > { %vm2109_vm3 = vmand %vm2093_vm1, %vm6238_vm7  ;;  %v1901_v37 = vpop.permute.xlu0 %1900 }
  0xf6   : > { %v4892_v59 = vpop.permute.xlu1 %2062  ;;  %v2125_v33 = vsel %vm2109_vm3, 1, %v6271_v57  ;;  %vm1918_vm15 = vcmp.ne.s32.totalorder %v1901_v37, 0  ;;  %vm4898_vm9 = vmand %vm1932_vm8, %vm6307_vm5  ;;  %vm6312_vm5 = vcmp.ne.f32.partialorder %v4203_v26, 0.0  ;;  %v6322_v26 = vmov 0 }
  0xf7   : > { %v6309_v1 = vsel %vm4898_vm9, 4294967295, %v6308_v1  ;;  %2154 = vrot.lane.b32.xlu1 %v2125_v33, %s4063_s10  ;;  %vm1934_vm1 = vmand %vm6240_vm12, %vm1918_vm15  ;;  %vm6316_vm12 = vcmp.ne.f32.partialorder %v4222_v32, 0.0 }
  0xf8   : > { %vm4910_vm3 = vmand %vm1934_vm1, %vm6241_vm14  ;;  %vm6317_vm1 = vcmp.eq.f32.partialorder %v4222_v32, %v4673_v39 }
  0xf9   : > { %v6311_v27 = vsel %vm4910_vm3, 4294967295, %v6310_v27 }
  0xfa   : > { %v1875_v15 = vpop.permute.xlu1 %1874 }
  0xfb   : > { %vm1905_vm8 = vcmp.ne.s32.totalorder %v1875_v15, 0 }
  0xfc   : > { %vm1921_vm7 = vmand %vm6312_vm5, %vm1905_vm8  ;;  %vm6320_vm5 = vcmp.ne.f32.partialorder %v4262_v51, 0.0 }
  0xfd   : > { %vm4919_vm9 = vmand %vm1921_vm7, %vm6313_vm13  ;;  %vm6321_vm7 = vcmp.eq.f32.partialorder %v4262_v51, %v4682_v28 }
  0xfe   : > { %v6315_v56 = vsel %vm4919_vm9, 4294967295, %v6314_v56  ;;  %v1879_v29 = vpop.permute.xlu1 %1878 }
  0xff   : > { %vm1907_vm15 = vcmp.ne.s32.totalorder %v1879_v29, 0 }
 0x100   : > { %vm1923_vm11 = vmand %vm6316_vm12, %vm1907_vm15  ;;  %vm6324_vm15 = vcmp.ne.f32.partialorder %v4302_v6, 0.0 }
 0x101   : > { %vm4928_vm14 = vmand %vm1923_vm11, %vm6317_vm1  ;;  %vm6325_vm1 = vcmp.eq.f32.partialorder %v4302_v6, %v4705_v20 }
 0x102   : > { %v6319_v2 = vsel %vm4928_vm14, 4294967295, %v6318_v2  ;;  %v1883_v55 = vpop.permute.xlu1 %1882 }
 0x103   : > { %vm1909_vm8 = vcmp.ne.s32.totalorder %v1883_v55, 0 }
 0x104   : > { %vm1925_vm13 = vmand %vm6320_vm5, %vm1909_vm8  ;;  %vm6328_vm5 = vcmp.ne.f32.partialorder %v4342_v54, 0.0 }
 0x105   : > { %vm4937_vm3 = vmand %vm1925_vm13, %vm6321_vm7  ;;  %vm6329_vm7 = vcmp.eq.f32.partialorder %v4342_v54, %v4729_v47 }
 0x106   : > { %v6323_v26 = vsel %vm4937_vm3, 4294967295, %v6322_v26  ;;  %v1887_v60 = vpop.permute.xlu1 %1886 }
 0x107   : > { %vm1911_vm12 = vcmp.ne.s32.totalorder %v1887_v60, 0 }
 0x108   : > { %vm1927_vm11 = vmand %vm6324_vm15, %vm1911_vm12  ;;  %vm6332_vm15 = vcmp.ne.f32.partialorder %v4371_v52, 0.0 }
 0x109   : > { %vm4946_vm14 = vmand %vm1927_vm11, %vm6325_vm1  ;;  %vm6333_vm1 = vcmp.eq.f32.partialorder %v4371_v52, %v4741_v19  ;;  %v6340_v52 = vmov 0  ;;  %v6344_v19 = vmov 0 }
 0x10a   : > { %v1891_v39 = vpop.permute.xlu1 %1890 }
 0x10b   : > { %vm1913_vm8 = vcmp.ne.s32.totalorder %v1891_v39, 0 }
 0x10c   : > { %vm1929_vm13 = vmand %vm6328_vm5, %vm1913_vm8  ;;  %vm6336_vm5 = vcmp.ne.f32.partialorder %v4392_v25, 0.0 }
 0x10d   : > { %vm4955_vm3 = vmand %vm1929_vm13, %vm6329_vm7  ;;  %vm6337_vm7 = vcmp.eq.f32.partialorder %v4392_v25, %v4753_v17  ;;  %v5016_v17 = vld [vmem:[%s6192_s2] ss:$0 sm:$0xff] }
 0x10e   : > { %v1895_v28 = vpop.permute.xlu1 %1894 }
 0x10f   : > { %vm1915_vm12 = vcmp.ne.s32.totalorder %v1895_v28, 0 }
 0x110   : > { %vm1931_vm11 = vmand %vm6332_vm15, %vm1915_vm12  ;;  %vm1839_vm12 = vcmp.ne.f32.partialorder %v4435_v42, 0.0 }
 0x111   : > { %vm4964_vm6 = vmand %vm1931_vm11, %vm6333_vm1  ;;  %vm6242_vm11 = vcmp.eq.f32.partialorder %v4435_v42, %v4764_v14 }
 0x112   : > { %v1899_v20 = vpop.permute.xlu1 %1898 }
 0x113   : > { %vm1917_vm8 = vcmp.ne.s32.totalorder %v1899_v20, 0 }
 0x114   : > { %vm1933_vm13 = vmand %vm6336_vm5, %vm1917_vm8 }
 0x115   : > { %vm4973_vm9 = vmand %vm1933_vm13, %vm6337_vm7 }
 0x116   : > { %v1903_v16 = vpop.permute.xlu1 %1902 }
 0x117   : > { %vm1919_vm15 = vcmp.ne.s32.totalorder %v1903_v16, 0 }
 0x118   : > { %vm1935_vm1 = vmand %vm1839_vm12, %vm1919_vm15 }
 0x119   : > { %vm4985_vm8 = vmand %vm1935_vm1, %vm6242_vm11 }
 0x11a   : > { %v6341_v52 = vsel %vm4985_vm8, 4294967295, %v6340_v52 }
 0x130   : > { %v4989_v25 = vpop.permute.xlu0 %2128 }
 0x134   : > { %v4991_v18 = vpop.permute.xlu0 %2132 }
 0x138   : > { %v4993_v31 = vpop.permute.xlu0 %2136 }
 0x13c   : > { %v2141_v47 = vpop.permute.xlu0 %2140 }
 0x13d   : > { %vm2166_vm5 = vcmp.ne.s32.totalorder %v2141_v47, 0 }
 0x13e   : > { %vm4997_vm13 = vmor %vm4841_vm0, %vm2166_vm5  ;;  %vm6243_vm0 = vcmask 105472  }
 0x13f   : > { %v6343_v48 = vsel %vm4997_vm13, 4294967295, %v6342_v48 }
 0x140   : > { %v2145_v13 = vpop.permute.xlu0 %2144 }
 0x141   : > { %vm2168_vm7 = vcmp.ne.s32.totalorder %v2145_v13, 0 }
 0x142   : > { %vm5003_vm15 = vmor %vm4858_vm4, %vm2168_vm7 }
 0x143   : > { %v6345_v19 = vsel %vm5003_vm15, 4294967295, %v6344_v19  ;;  %vm6356_vm15 = vcmp.eq.f32.partialorder %v4314_v12, %v4675_v58 }
 0x144   : > { %v2149_v21 = vpop.permute.xlu0 %2148 }
 0x145   : > { %vm2170_vm1 = vcmp.ne.s32.totalorder %v2149_v21, 0 }
 0x146   : > { %vm5009_vm11 = vmor %vm4877_vm10, %vm2170_vm1  ;;  %vm2078_vm1 = vcmp.ne.s32.totalorder %v4761_v30, 0 }
 0x147   : > { %v6347_v22 = vsel %vm5009_vm11, 4294967295, %v6346_v22  ;;  %vm6355_vm11 = vcmp.eq.f32.partialorder %v4435_v42, %v4764_v14 }
 0x149   : > { %v3543_v23 = vpop.f32.mrb[0].mxu0 }
 0x14a   : > { %v3429_v3 = vpop.f32.mrb[0].mxu1  ;;  %v1418_v4 = vpop.f32.mrb[1].mxu0 }
 0x14b   : > { %v3637_v24 = vadd.f32 %v3429_v3, %v5016_v17  ;;  %v853_v62 = vpop.f32.mrb[1].mxu1 }
 0x14c   : > { %v3639_v38 = vadd.f32 %v5016_v17, %v853_v62 }
 0x14d   : > { %v3546_v40 = vpop.f32.mrb[2].mxu0  ;;  %v5020_v8 = vadd.f32 %v3637_v24, %v3543_v23 }
 0x14e   : > { %v3432_v49 = vpop.f32.mrb[2].mxu1  ;;  %v1430_v53 = vpop.f32.mrb[3].mxu0  ;;  %v5022_v10 = vadd.f32 %v3639_v38, %v1418_v4 }
 0x14f   : > { %v3641_v45 = vadd.f32 %v3432_v49, %v5016_v17  ;;  %v867_v46 = vpop.f32.mrb[3].mxu1  ;;  %v1516_v41 = vsel %vm6243_vm0, %v5020_v8, -inf }
 0x150   : > { %v3643_v63 = vadd.f32 %v5016_v17, %v867_v46  ;;  %1517 = vmax.xlane.f32.xlu0 %v1516_v41  ;;  %v1513_v36 = vsel %vm6243_vm0, %v5022_v10, -inf }
 0x151   : > { %v5028_v61 = vpop.permute.xlu1 %2130  ;;  %v3549_v5 = vpop.f32.mrb[4].mxu0  ;;  %v5030_v35 = vadd.f32 %v3641_v45, %v3546_v40 }
 0x152   : > { %v3435_v9 = vpop.f32.mrb[4].mxu1  ;;  %v1442_v43 = vpop.f32.mrb[5].mxu0  ;;  %v5032_v34 = vadd.f32 %v3643_v63, %v1430_v53 }
 0x153   : > { %v3645_v11 = vadd.f32 %v3435_v9, %v5016_v17  ;;  %v881_v44 = vpop.f32.mrb[5].mxu1  ;;  %v1522_v37 = vsel %vm6243_vm0, %v5030_v35, -inf }
 0x154   : > { %v3647_v33 = vadd.f32 %v5016_v17, %v881_v44  ;;  %1514 = vmax.xlane.f32.xlu0 %v1513_v36  ;;  %1523 = vmax.xlane.f32.xlu1 %v1522_v37  ;;  %v1519_v47 = vsel %vm6243_vm0, %v5032_v34, -inf }
 0x155   : > { %v5040_v15 = vpop.permute.xlu1 %2134  ;;  %v3552_v29 = vpop.f32.mrb[6].mxu0  ;;  %v5042_v55 = vadd.f32 %v3645_v11, %v3549_v5 }
 0x156   : > { %v3438_v60 = vpop.f32.mrb[6].mxu1  ;;  %v1454_v39 = vpop.f32.mrb[7].mxu0  ;;  %v5044_v28 = vadd.f32 %v3647_v33, %v1442_v43 }
 0x157   : > { %v3649_v20 = vadd.f32 %v3438_v60, %v5016_v17  ;;  %v895_v16 = vpop.f32.mrb[7].mxu1  ;;  %v1528_v53 = vsel %vm6243_vm0, %v5042_v55, -inf }
 0x158   : > { %v3651_v13 = vadd.f32 %v5016_v17, %v895_v16  ;;  %1520 = vmax.xlane.f32.xlu1 %v1519_v47  ;;  %v1525_v21 = vsel %vm6243_vm0, %v5044_v28, -inf }
 0x159   : > { %v5052_v23 = vpop.permute.xlu1 %2138  ;;  %v3555_v3 = vpop.f32.mrb[8].mxu0  ;;  %1526 = vmax.xlane.f32.xlu0 %v1525_v21  ;;  %v5054_v4 = vadd.f32 %v3649_v20, %v3552_v29 }
 0x15a   : > { %v3441_v24 = vpop.f32.mrb[8].mxu1  ;;  %v1466_v62 = vpop.f32.mrb[9].mxu0  ;;  %v5056_v38 = vadd.f32 %v3651_v13, %v1454_v39 }
 0x15b   : > { %v3653_v40 = vadd.f32 %v3441_v24, %v5016_v17  ;;  %v909_v49 = vpop.f32.mrb[9].mxu1  ;;  %v1534_v33 = vsel %vm6243_vm0, %v5054_v4, -inf }
 0x15c   : > { %v3655_v45 = vadd.f32 %v5016_v17, %v909_v49  ;;  %1529 = vmax.xlane.f32.xlu1 %v1528_v53  ;;  %v1531_v46 = vsel %vm6243_vm0, %v5056_v38, -inf }
 0x15d   : > { %v2143_v41 = vpop.permute.xlu1 %2142  ;;  %v3558_v63 = vpop.f32.mrb[10].mxu0  ;;  %1532 = vmax.xlane.f32.xlu0 %v1531_v46  ;;  %v5064_v5 = vadd.f32 %v3653_v40, %v3555_v3 }
 0x15e   : > { %vm2167_vm4 = vcmp.ne.s32.totalorder %v2143_v41, 0  ;;  %v3444_v9 = vpop.f32.mrb[10].mxu1  ;;  %v1478_v43 = vpop.f32.mrb[11].mxu0  ;;  %v5066_v11 = vadd.f32 %v3655_v45, %v1466_v62 }
 0x15f   : > { %vm5070_vm10 = vmor %vm4946_vm14, %vm2167_vm4  ;;  %v3657_v36 = vadd.f32 %v3444_v9, %v5016_v17  ;;  %v923_v37 = vpop.f32.mrb[11].mxu1  ;;  %v1540_v62 = vsel %vm6243_vm0, %v5064_v5, -inf }
 0x160   : > { %v3659_v29 = vadd.f32 %v5016_v17, %v923_v37  ;;  %1535 = vmax.xlane.f32.xlu1 %v1534_v33  ;;  %v1537_v60 = vsel %vm6243_vm0, %v5066_v11, -inf }
 0x161   : > { %v2147_v39 = vpop.permute.xlu1 %2146  ;;  %v3561_v20 = vpop.f32.mrb[12].mxu0  ;;  %1538 = vmax.xlane.f32.xlu0 %v1537_v60  ;;  %v5080_v32 = vadd.f32 %v3657_v36, %v3558_v63 }
 0x162   : > { %vm2169_vm14 = vcmp.ne.s32.totalorder %v2147_v39, 0  ;;  %v3447_v16 = vpop.f32.mrb[12].mxu1  ;;  %v1490_v47 = vpop.f32.mrb[13].mxu0  ;;  %v5082_v13 = vadd.f32 %v3659_v29, %v1478_v43 }
 0x163   : > { %vm5086_vm5 = vmor %vm4955_vm3, %vm2169_vm14  ;;  %v3661_v3 = vadd.f32 %v3447_v16, %v5016_v17  ;;  %v937_v24 = vpop.f32.mrb[13].mxu1  ;;  %v1546_v37 = vsel %vm6243_vm0, %v5080_v32, -inf  ;;  %vm6354_vm14 = vcmp.ne.f32.partialorder %v4314_v12, 0.0  ;;  %v4064_v12 = vmov 0.0  }
 0x164   : > { %v3663_v40 = vadd.f32 %v5016_v17, %v937_v24  ;;  %1541 = vmax.xlane.f32.xlu1 %v1540_v62  ;;  %v1543_v49 = vsel %vm6243_vm0, %v5082_v13, -inf }
 0x165   : > { %v2151_v53 = vpop.permute.xlu1 %2150  ;;  %v3564_v45 = vpop.f32.mrb[14].mxu0  ;;  %1544 = vmax.xlane.f32.xlu0 %v1543_v49  ;;  %v5096_v51 = vadd.f32 %v3661_v3, %v3561_v20 }
 0x166   : > { %vm2171_vm3 = vcmp.ne.s32.totalorder %v2151_v53, 0  ;;  %v3450_v46 = vpop.f32.mrb[14].mxu1  ;;  %v1502_v41 = vpop.f32.mrb[15].mxu0  ;;  %v5098_v63 = vadd.f32 %v3663_v40, %v1490_v47 }
 0x167   : > { %vm5102_vm7 = vmor %vm4964_vm6, %vm2171_vm3  ;;  %v3665_v43 = vadd.f32 %v3450_v46, %v5016_v17  ;;  %v951_v36 = vpop.f32.mrb[15].mxu1  ;;  %v1552_v39 = vsel %vm6243_vm0, %v5096_v51, -inf  ;;  %vm2079_vm6 = vcmp.ne.s32.totalorder %v4892_v59, 0 }
 0x168   : > { %v3667_v33 = vadd.f32 %v5016_v17, %v951_v36  ;;  %1547 = vmax.xlane.f32.xlu1 %v1546_v37  ;;  %v1549_v29 = vsel %vm6243_vm0, %v5098_v63, -inf  ;;  %vm2095_vm4 = vmand %vm1839_vm12, %vm2079_vm6  ;;  %vm2160_vm12 = vcmp.ne.s32.totalorder %v4989_v25, 0 }
 0x169   : > { %1550 = vmax.xlane.f32.xlu0 %v1549_v29  ;;  %v5112_v60 = vadd.f32 %v3665_v43, %v3564_v45  ;;  %vm2094_vm3 = vmand %vm6354_vm14, %vm2078_vm1  ;;  %vm2161_vm1 = vcmp.ne.s32.totalorder %v5028_v61, 0  ;;  %v5170_v61 = vpop.permute.xlu1 %2154 }
 0x16a   : > { %v5114_v6 = vadd.f32 %v3667_v33, %v1502_v41  ;;  %vm2111_vm8 = vmand %vm2095_vm4, %vm6355_vm11  ;;  %vm2162_vm11 = vcmp.ne.s32.totalorder %v4991_v18, 0  ;;  %vm6357_vm4 = vnez %v6315_v56 }
 0x16b   : > { %v1558_v17 = vsel %vm6243_vm0, %v5112_v60, -inf  ;;  %vm2110_vm13 = vmand %vm2094_vm3, %vm6356_vm15  ;;  %v2127_v16 = vsel %vm2111_vm8, 1, %v6271_v57  ;;  %vm2224_vm8 = vcmask 48152   ;;  %vm2163_vm3 = vcmp.ne.s32.totalorder %v5040_v15, 0 }
 0x16c   : > { %1553 = vmax.xlane.f32.xlu1 %v1552_v39  ;;  %v1555_v20 = vsel %vm6243_vm0, %v5114_v6, -inf  ;;  %v2126_v30 = vsel %vm2110_vm13, 1, %v6271_v57  ;;  %vm2176_vm6 = vmor %vm4784_vm2, %vm2160_vm12  ;;  %vm6358_vm13 = vnez %v6291_v50  ;;  %vm2164_vm0 = vcmp.ne.s32.totalorder %v4993_v31, 0  ;;  %v5168_v31 = vpop.permute.xlu0 %2152 }
 0x16d   : > { %1556 = vmax.xlane.f32.xlu0 %v1555_v20  ;;  %vm2177_vm15 = vmor %vm6357_vm4, %vm2161_vm1  ;;  %v3148_v42 = vsel %vm2176_vm6, 1.0, %v4064_v12  ;;  %vm6359_vm2 = vnez %v6319_v2  ;;  %vm6360_vm6 = vnez %v6293_v7  ;;  %vm2165_vm4 = vcmp.ne.s32.totalorder %v5052_v23, 0 }
 0x16e   : > { %vm2178_vm14 = vmor %vm6358_vm13, %vm2162_vm11  ;;  %v2225_v57 = vsel %vm2224_vm8, %v3148_v42, -inf  ;;  %v3149_v58 = vsel %vm2177_vm15, 1.0, %v4064_v12  ;;  %vm6361_vm11 = vnez %v6323_v26 }
 0x16f   : > { %vm2179_vm12 = vmor %vm6359_vm2, %vm2163_vm3  ;;  %v3150_v14 = vsel %vm2178_vm14, 1.0, %v4064_v12  ;;  %v2228_v0 = vsel %vm2224_vm8, %v3149_v58, -inf }
 0x170   : > { %1559 = vmax.xlane.f32.xlu1 %v1558_v17  ;;  %vm2180_vm1 = vmor %vm6360_vm6, %vm2164_vm0  ;;  %v2231_v50 = vsel %vm2224_vm8, %v3150_v14, -inf  ;;  %v3151_v59 = vsel %vm2179_vm12, 1.0, %v4064_v12  ;;  %vm6362_vm0 = vcmask 105472  }
 0x171   : > { %vm2181_vm15 = vmor %vm6361_vm11, %vm2165_vm4  ;;  %v3152_v56 = vsel %vm2180_vm1, 1.0, %v4064_v12  ;;  %v2234_v2 = vsel %vm2224_vm8, %v3151_v59, -inf }
 0x172   : > { %v2237_v7 = vsel %vm2224_vm8, %v3152_v56, -inf  ;;  %v3153_v25 = vsel %vm2181_vm15, 1.0, %v4064_v12  ;;  %vm6363_vm13 = vmmov %vm6362_vm0 }
 0x173   : > { %v2240_v18 = vsel %vm2224_vm8, %v3153_v25, -inf  ;;  %vm6364_vm14 = vmmov %vm6362_vm0 }
 0x174   : > { %vm6365_vm3 = vmmov %vm6362_vm0 }
 0x175   : > { %vm6366_vm2 = vmmov %vm6362_vm0 }
 0x176   : > { %vm6367_vm12 = vmmov %vm6362_vm0 }
 0x177   : > { %vm6368_vm6 = vmmov %vm6362_vm0 }
 0x178   : > { %vm6369_vm1 = vmmov %vm6362_vm0 }
 0x179   : > { %vm6370_vm4 = vmmov %vm6362_vm0 }
 0x17a   : > { %vm6371_vm11 = vmmov %vm6362_vm0 }
 0x17b   : > { %vm6372_vm15 = vmmov %vm6362_vm0 }
 0x181   : > { %2158 = vrot.lane.b32.xlu1 %v2127_v16, %s4063_s10 }
 0x183   : > { %2156 = vrot.lane.b32.xlu0 %v2126_v30, %s4063_s10  ;;  %s5297_s10 = sld [smem:[#allocation2 + $0xc]] }
 0x1a2   : > { %2226 = vmax.xlane.f32.xlu0 %v2225_v57 }
 0x1a5   : > { %2229 = vmax.xlane.f32.xlu1 %v2228_v0 }
 0x1a6   : > { %2232 = vmax.xlane.f32.xlu0 %v2231_v50 }
 0x1a9   : > { %2235 = vmax.xlane.f32.xlu1 %v2234_v2 }
 0x1aa   : > { %2238 = vmax.xlane.f32.xlu0 %v2237_v7 }
 0x1ad   : > { %2241 = vmax.xlane.f32.xlu1 %v2240_v18 }
 0x1dd   : > { %v1518_v26 = vpop.xlane.xlu0 %1517 }
 0x1de   : > { %v1562_v15 = vsub.f32 %v5020_v8, %v1518_v26 }
 0x1e0   : > { %v1579_v23 = vmul.f32 1.442695, %v1562_v15 }
 0x1e1   : > { %v1515_v47 = vpop.xlane.xlu0 %1514  ;;  %v1524_v3 = vpop.xlane.xlu1 %1523 }
 0x1e2   : > { %3840 = vpow2.f32 %v1579_v23  ;;  %v1561_v24 = vsub.f32 %v5022_v10, %v1515_v47  ;;  %v1564_v62 = vsub.f32 %v5030_v35, %v1524_v3 }
 0x1e4   : > { %v1577_v40 = vmul.f32 1.442695, %v1561_v24  ;;  %v1583_v49 = vmul.f32 1.442695, %v1564_v62 }
 0x1e5   : > { %v1521_v53 = vpop.xlane.xlu1 %1520 }
 0x1e6   : > { %3842 = vpow2.f32 %v1577_v40  ;;  %v1563_v45 = vsub.f32 %v5032_v34, %v1521_v53  ;;  %v1527_v37 = vpop.xlane.xlu0 %1526  ;;  %v5182_v34 = vld [vmem:[%s6193_s3] ss:$0 sm:$0xff] }
 0x1e7   : > { %3844 = vpow2.f32 %v1583_v49  ;;  %v1565_v39 = vsub.f32 %v5044_v28, %v1527_v37 }
 0x1e8   : > { %v1581_v46 = vmul.f32 1.442695, %v1563_v45 }
 0x1e9   : > { %v1530_v41 = vpop.xlane.xlu1 %1529  ;;  %v1585_v57 = vmul.f32 1.442695, %v1565_v39 }
 0x1ea   : > { %3846 = vpow2.f32 %v1581_v46  ;;  %v1566_v8 = vsub.f32 %v5042_v55, %v1530_v41  ;;  %v1533_v58 = vpop.xlane.xlu0 %1532 }
 0x1eb   : > { %v1567_v2 = vsub.f32 %v5056_v38, %v1533_v58 }
 0x1ec   : > { %v3841_v43 = vpop.eup %3840  ;;  %v1587_v36 = vmul.f32 1.442695, %v1566_v8 }
 0x1ed   : > { %v1536_v33 = vpop.xlane.xlu1 %1535  ;;  %v1612_v10 = vsel %vm6362_vm0, %v3841_v43, 0.0  ;;  %v1665_v17 = vmul.f32 %v3841_v43, %v5182_v34  ;;  %v1589_v23 = vmul.f32 1.442695, %v1567_v2 }
 0x1ee   : > { %3848 = vpow2.f32 %v1587_v36  ;;  %v1568_v35 = vsub.f32 %v5054_v4, %v1536_v33  ;;  %1613 = vadd.xlane.f32.xlu1 %v1612_v10 }
 0x1ef   : > { %v1683_v14 = vsel %vm6365_vm3, %v1665_v17, 0.0  ;;  %vm6375_vm3 = vmmov %vm6362_vm0 }
 0x1f0   : > { %v3843_v29 = vpop.eup %3842  ;;  %v1591_v16 = vmul.f32 1.442695, %v1568_v35 }
 0x1f1   : > { %v3845_v20 = vpop.eup %3844  ;;  %v1609_v55 = vsel %vm6363_vm13, %v3843_v29, 0.0  ;;  %v1542_v42 = vpop.xlane.xlu1 %1541  ;;  %v1664_v28 = vmul.f32 %v3843_v29, %v5182_v34  ;;  %vm6373_vm13 = vmmov %vm6362_vm0 }
 0x1f2   : > { %v1618_v30 = vsel %vm6364_vm14, %v3845_v20, 0.0  ;;  %1610 = vadd.xlane.f32.xlu0 %v1609_v55  ;;  %3850 = vpow2.f32 %v1591_v16  ;;  %v1570_v50 = vsub.f32 %v5064_v5, %v1542_v42  ;;  %v1539_v5 = vpop.xlane.xlu0 %1538  ;;  %v1667_v3 = vmul.f32 %v3845_v20, %v5182_v34  ;;  %vm6374_vm14 = vmmov %vm6362_vm0 }
 0x1f3   : > { %1619 = vadd.xlane.f32.xlu1 %v1618_v30  ;;  %3852 = vpow2.f32 %v1585_v57  ;;  %v1680_v7 = vsel %vm6367_vm12, %v1664_v28, 0.0  ;;  %v1569_v40 = vsub.f32 %v5066_v11, %v1539_v5  ;;  %vm6377_vm12 = vmmov %vm6362_vm0 }
 0x1f4   : > { %v3847_v4 = vpop.eup %3846  ;;  %v1595_v25 = vmul.f32 1.442695, %v1570_v50  ;;  %v1689_v49 = vsel %vm6371_vm11, %v1667_v3, 0.0  ;;  %vm6381_vm11 = vmmov %vm6362_vm0 }
 0x1f5   : > { %v1666_v0 = vmul.f32 %v3847_v4, %v5182_v34  ;;  %v1548_v18 = vpop.xlane.xlu1 %1547  ;;  %v1615_v47 = vsel %vm6369_vm1, %v3847_v4, 0.0  ;;  %v1593_v43 = vmul.f32 1.442695, %v1569_v40  ;;  %vm6379_vm1 = vmmov %vm6362_vm0 }
 0x1f6   : > { %1684 = vadd.xlane.f32.xlu0 %v1683_v14  ;;  %3854 = vpow2.f32 %v1595_v25  ;;  %v1572_v38 = vsub.f32 %v5080_v32, %v1548_v18  ;;  %v1545_v32 = vpop.xlane.xlu0 %1544 }
 0x1f7   : > { %v1686_v59 = vsel %vm6366_vm2, %v1666_v0, 0.0  ;;  %3856 = vpow2.f32 %v1589_v23  ;;  %v1571_v35 = vsub.f32 %v5082_v13, %v1545_v32  ;;  %vm6376_vm2 = vmmov %vm6362_vm0 }
 0x1f8   : > { %v3849_v56 = vpop.eup %3848  ;;  %1687 = vadd.xlane.f32.xlu1 %v1686_v59  ;;  %v1599_v45 = vmul.f32 1.442695, %v1572_v38 }
 0x1f9   : > { %v1624_v26 = vsel %vm6368_vm6, %v3849_v56, 0.0  ;;  %v1669_v15 = vmul.f32 %v3849_v56, %v5182_v34  ;;  %v1554_v46 = vpop.xlane.xlu1 %1553  ;;  %v1597_v30 = vmul.f32 1.442695, %v1571_v35  ;;  %vm6378_vm6 = vmmov %vm6362_vm0 }
 0x1fa   : > { %1681 = vadd.xlane.f32.xlu0 %v1680_v7  ;;  %3858 = vpow2.f32 %v1599_v45  ;;  %v1574_v11 = vsub.f32 %v5096_v51, %v1554_v46  ;;  %v1551_v51 = vpop.xlane.xlu0 %1550  ;;  %v3155_v45 = vsel %vm5070_vm10, 1.0, %v4064_v12 }
 0x1fb   : > { %v1695_v24 = vsel %vm6370_vm4, %v1669_v15, 0.0  ;;  %3860 = vpow2.f32 %v1593_v43  ;;  %v1573_v14 = vsub.f32 %v5098_v63, %v1551_v51  ;;  %vm6380_vm4 = vmmov %vm6362_vm0  ;;  %v3157_v43 = vsel %vm5086_vm5, 1.0, %v4064_v12 }
 0x1fc   : > { %1625 = vadd.xlane.f32.xlu1 %v1624_v26  ;;  %v3851_v62 = vpop.eup %3850  ;;  %v1603_v20 = vmul.f32 1.442695, %v1574_v11  ;;  %v2252_v44 = vsel %vm2224_vm8, %v3157_v43, -inf  ;;  %vm6390_vm5 = vnez %v6343_v48 }
 0x1fd   : > { %v3853_v53 = vpop.eup %3852  ;;  %v1630_v41 = vsel %vm6372_vm15, %v3851_v62, 0.0  ;;  %v1671_v8 = vmul.f32 %v3851_v62, %v5182_v34  ;;  %v1560_v55 = vpop.xlane.xlu1 %1559  ;;  %v1601_v2 = vmul.f32 1.442695, %v1573_v14  ;;  %vm6382_vm15 = vmmov %vm6362_vm0  ;;  %v3154_v11 = vsel %vm6390_vm5, 1.0, %v4064_v12  ;;  %v3937_v14 = vld [vmem:[%s4194_s8 + $0x10] sm:$0xff] }
 0x1fe   : > { %1616 = vadd.xlane.f32.xlu0 %v1615_v47  ;;  %v1621_v36 = vsel %vm6362_vm0, %v3853_v53, 0.0  ;;  %v1668_v37 = vmul.f32 %v3853_v53, %v5182_v34  ;;  %3862 = vpow2.f32 %v1603_v20  ;;  %v1576_v13 = vsub.f32 %v5112_v60, %v1560_v55  ;;  %v1557_v60 = vpop.xlane.xlu0 %1556 }
 0x1ff   : > { %v1701_v33 = vsel %vm6373_vm13, %v1671_v8, 0.0  ;;  %3864 = vpow2.f32 %v1597_v30  ;;  %v1575_v26 = vsub.f32 %v5114_v6, %v1557_v60  ;;  %vm6383_vm13 = vmmov %vm6362_vm0  ;;  %v2246_v8 = vsel %vm2224_vm8, %v3155_v45, -inf }
 0x200   : > { %1696 = vadd.xlane.f32.xlu1 %v1695_v24  ;;  %v3855_v10 = vpop.eup %3854  ;;  %v1692_v29 = vsel %vm6374_vm14, %v1668_v37, 0.0  ;;  %v1607_v50 = vmul.f32 1.442695, %v1576_v13  ;;  %vm6384_vm14 = vmmov %vm6362_vm0  ;;  %v3159_v37 = vsel %vm5102_vm7, 1.0, %v4064_v12  ;;  %v2243_v9 = vsel %vm2224_vm8, %v3154_v11, -inf }
 0x201   : > { %v3857_v39 = vpop.eup %3856  ;;  %v1636_v17 = vsel %vm6375_vm3, %v3855_v10, 0.0  ;;  %v1673_v16 = vmul.f32 %v3855_v10, %v5182_v34  ;;  %v1605_v3 = vmul.f32 1.442695, %v1575_v26  ;;  %vm6385_vm3 = vmmov %vm6362_vm0  ;;  %vm6391_vm7 = vnez %v6345_v19 }
 0x202   : > { %1690 = vadd.xlane.f32.xlu0 %v1689_v49  ;;  %v1627_v42 = vsel %vm6376_vm2, %v3857_v39, 0.0  ;;  %v1670_v4 = vmul.f32 %v3857_v39, %v5182_v34  ;;  %3866 = vpow2.f32 %v1607_v50  ;;  %vm6386_vm2 = vmmov %vm6362_vm0  ;;  %v3156_v54 = vsel %vm6391_vm7, 1.0, %v4064_v12 }
 0x203   : > { %v1707_v57 = vsel %vm6377_vm12, %v1673_v16, 0.0  ;;  %3868 = vpow2.f32 %v1601_v2  ;;  %vm6387_vm12 = vmmov %vm6362_vm0  ;;  %v5313_v50 = vstv %s3165_s17  ;;  %v3938_v2 = vld [vmem:[%s4194_s8] sm:$0xff] }
 0x204   : > { %1631 = vadd.xlane.f32.xlu1 %v1630_v41  ;;  %v3859_v58 = vpop.eup %3858  ;;  %v1698_v0 = vsel %vm6378_vm6, %v1670_v4, 0.0  ;;  %3870 = vpow2.f32 %v1605_v3  ;;  %vm6388_vm6 = vmmov %vm6362_vm0  ;;  %6397 = vst [vmem:[#allocation21_spill] sm:$0xff] %v5313_v50  ;;  %v3132_v60 = vadd.f32 -2.0, %v3938_v2  ;;  %v5333_v3 = vstv %s3171_s30 }
 0x205   : > { %v3861_v28 = vpop.eup %3860  ;;  %v1642_v59 = vsel %vm6379_vm1, %v3859_v58, 0.0  ;;  %v1675_v56 = vmul.f32 %v3859_v58, %v5182_v34  ;;  %vm2173_vm1 = vcmp.ne.s32.totalorder %v5170_v61, 0  ;;  %v2258_v61 = vsel %vm2224_vm8, %v3159_v37, -inf }
 0x206   : > { %1622 = vadd.xlane.f32.xlu0 %v1621_v36  ;;  %v1633_v7 = vsel %vm6380_vm4, %v3861_v28, 0.0  ;;  %v1672_v25 = vmul.f32 %v3861_v28, %v5182_v34  ;;  %vm2189_vm10 = vmor %vm4973_vm9, %vm2173_vm1  ;;  %v5306_v58 = vstv %s3164_s16  ;;  %v5311_v28 = vstv %s3168_s20  ;;  %s3196_s20 = sshll.u32 (%p4121_p4), %s4109_s21, 7 }
 0x207   : > { %v1713_v63 = vsel %vm6381_vm11, %v1675_v56, 0.0  ;;  %vm6389_vm4 = vmmov %vm6362_vm0  ;;  %v3161_v10 = vsel %vm2189_vm10, 1.0, %v4064_v12  ;;  %vm2172_vm11 = vcmp.ne.s32.totalorder %v5168_v31, 0  ;;  %v2157_v31 = vpop.permute.xlu0 %2156  ;;  %v5317_v56 = vstv %s3172_s24 }
 0x208   : > { %1702 = vadd.xlane.f32.xlu1 %v1701_v33  ;;  %v3863_v18 = vpop.eup %3862  ;;  %v1704_v15 = vsel %vm6382_vm15, %v1672_v25, 0.0  ;;  %v2159_v33 = vpop.permute.xlu1 %2158  ;;  %v2264_v35 = vsel %vm2224_vm8, %v3161_v10, -inf  ;;  %vm6392_vm15 = vnez %v6341_v52  ;;  %vm6396_vm10 = vmmov %vm6386_vm2  ;;  %6399 = vst [vmem:[#allocation9_spill] sm:$0xff] %v5317_v56  ;;  %v5322_v25 = vstv %s2273_s28 }
 0x209   : > { %v3865_v23 = vpop.eup %3864  ;;  %v1648_v5 = vsel %vm6362_vm0, %v3863_v18, 0.0  ;;  %v1677_v47 = vmul.f32 %v3863_v18, %v5182_v34  ;;  %vm2175_vm9 = vcmp.ne.s32.totalorder %v2159_v33, 0  ;;  %v3939_v18 = vld [vmem:[%s4194_s8 + $0x18] sm:$0xff]  ;;  %v5352_v45 = vmul.f32 %v3132_v60, %v5306_v58 }
 0x20a   : > { %1693 = vadd.xlane.f32.xlu0 %v1692_v29  ;;  %v1639_v38 = vsel %vm6383_vm13, %v3865_v23, 0.0  ;;  %v1674_v24 = vmul.f32 %v3865_v23, %v5182_v34  ;;  %vm2191_vm0 = vmor %vm6392_vm15, %vm2175_vm9  ;;  %v2249_v29 = vsel %vm2224_vm8, %v3156_v54, -inf  ;;  %vm6393_vm13 = vnez %v6347_v22 }
 0x20b   : > { %v1719_v62 = vsel %vm6384_vm14, %v1677_v47, 0.0  ;;  %v3158_v39 = vsel %vm6393_vm13, 1.0, %v4064_v12  ;;  %vm6394_vm14 = vnez %v6309_v1  ;;  %v3163_v20 = vsel %vm2191_vm0, 1.0, %v4064_v12 }
 0x20c   : > { %1637 = vadd.xlane.f32.xlu1 %v1636_v17  ;;  %v3867_v40 = vpop.eup %3866  ;;  %v1710_v6 = vsel %vm6385_vm3, %v1674_v24, 0.0  ;;  %vm2188_vm3 = vmor %vm6394_vm14, %vm2172_vm11  ;;  %v2255_v55 = vsel %vm2224_vm8, %v3158_v39, -inf  ;;  %v2270_v17 = vsel %vm2224_vm8, %v3163_v20, -inf  ;;  %v3135_v26 = vadd.f32 -2.0, %v3939_v18  ;;  %v3941_v20 = vld [vmem:[%s4194_s8 + $0x38] sm:$0xff] }
 0x20d   : > { %v3869_v49 = vpop.eup %3868  ;;  %v1654_v53 = vsel %vm6386_vm2, %v3867_v40, 0.0  ;;  %v1679_v48 = vmul.f32 %v3867_v40, %v5182_v34  ;;  %v3160_v52 = vsel %vm2188_vm3, 1.0, %v4064_v12  ;;  %v5340_v40 = vstv %s5291_s7 }
 0x20e   : > { %1628 = vadd.xlane.f32.xlu0 %v1627_v42  ;;  %v1645_v46 = vsel %vm6387_vm12, %v3869_v49, 0.0  ;;  %v1676_v41 = vmul.f32 %v3869_v49, %v5182_v34  ;;  %v3871_v36 = vpop.eup %3870  ;;  %vm2174_vm12 = vcmp.ne.s32.totalorder %v2157_v31, 0  ;;  %v2261_v22 = vsel %vm2224_vm8, %v3160_v52, -inf }
 0x20f   : > { %v1651_v21 = vsel %vm6389_vm4, %v3871_v36, 0.0  ;;  %v1725_v19 = vsel %vm6386_vm2, %v1679_v48, 0.0  ;;  %v1678_v1 = vmul.f32 %v3871_v36, %v5182_v34  ;;  %v5346_v49 = vstv %s5295_s9 }
 0x210   : > { %1708 = vadd.xlane.f32.xlu1 %v1707_v57  ;;  %v1716_v32 = vsel %vm6388_vm6, %v1676_v41, 0.0  ;;  %vm6395_vm6 = vnez %v6311_v27  ;;  %v5358_v41 = vstv %s5300_s11  ;;  %v5364_v43 = vmul.f32 %v3132_v60, %v5317_v56 }
 0x211   : > { %vm2190_vm1 = vmor %vm6395_vm6, %vm2174_vm12  ;;  %v1722_v16 = vsel %vm6396_vm10, %v1678_v1, 0.0  ;;  %v5381_v11 = vmul.f32 %v3135_v26, %v5317_v56  ;;  %v3139_v31 = vadd.f32 -2.0, %v3941_v20 }
 0x212   : > { %1699 = vadd.xlane.f32.xlu0 %v1698_v0  ;;  %v3162_v30 = vsel %vm2190_vm1, 1.0, %v4064_v12  ;;  %v3936_v12 = vld [vmem:[%s4194_s8 + $0x8] sm:$0xff]  ;;  %v3134_v0 = vadd.f32 -2.0, %v3937_v14 }
 0x213   : > { %v2267_v51 = vsel %vm2224_vm8, %v3162_v30, -inf  ;;  %v3133_v13 = vadd.f32 -2.0, %v3936_v12  ;;  %6401 = vst [vmem:[#allocation11_spill] sm:$0xff] %v5381_v11  ;;  %vm2817_vm8 = vcmask 7168  }
 0x214   : > { %1643 = vadd.xlane.f32.xlu1 %v1642_v59  ;;  %v5315_v59 = vstv %s3169_s23  ;;  %v5404_v48 = vmul.f32 %v3134_v0, %v5317_v56 }
 0x215   : > { %6398 = vst [vmem:[#allocation8_spill] sm:$0xff] %v5315_v59  ;;  %v5331_v47 = vmul.f32 %v3133_v13, %v5311_v28 }
 0x216   : > { %1634 = vadd.xlane.f32.xlu0 %v1633_v7  ;;  %v5320_v7 = vstv %s3173_s27  ;;  %s6097_s27 = scalar_lea.vmem (%p4121_p4), %s6195_s5, %s3196_s20  }
 0x217   : > { %6400 = vst [vmem:[#allocation10_spill] sm:$0xff] %v5320_v7 }
 0x218   : > { %1714 = vadd.xlane.f32.xlu1 %v1713_v63  ;;  %v5325_v63 = vmul.f32 %v3133_v13, %v5306_v58 }
 0x21a   : > { %1705 = vadd.xlane.f32.xlu0 %v1704_v15 }
 0x21c   : > { %1649 = vadd.xlane.f32.xlu1 %v1648_v5  ;;  %v5328_v5 = vstv %s3167_s29 }
 0x21e   : > { %1640 = vadd.xlane.f32.xlu0 %v1639_v38  ;;  %v3940_v38 = vld [vmem:[%s4194_s8 + $0x28] sm:$0xff] }
 0x21f   : > { %v3137_v24 = vadd.f32 -2.0, %v3940_v38  ;;  %v3944_v38 = vld [vmem:[%s4194_s8 + $0x30] sm:$0xff] }
 0x220   : > { %1720 = vadd.xlane.f32.xlu1 %v1719_v62  ;;  %v5337_v62 = vstv %s5289_s6 }
 0x221   : > { %v5375_v37 = vmul.f32 %v3137_v24, %v5306_v58  ;;  %v5390_v10 = vmul.f32 %v3137_v24, %v5311_v28 }
 0x222   : > { %1711 = vadd.xlane.f32.xlu0 %v1710_v6  ;;  %v5343_v6 = vmul.f32 %v3133_v13, %v5317_v56 }
 0x224   : > { %1655 = vadd.xlane.f32.xlu1 %v1654_v53  ;;  %v5349_v53 = vstv %s5297_s10 }
 0x226   : > { %1646 = vadd.xlane.f32.xlu0 %v1645_v46  ;;  %v5355_v46 = vmul.f32 %v3132_v60, %v5311_v28 }
 0x228   : > { %2247 = vmax.xlane.f32.xlu1 %v2246_v8  ;;  %v5361_v8 = vstv %s5302_s13 }
 0x22a   : > { %1717 = vadd.xlane.f32.xlu0 %v1716_v32  ;;  %v5367_v32 = vmul.f32 %v3135_v26, %v5306_v58 }
 0x22c   : > { %2253 = vmax.xlane.f32.xlu1 %v2252_v44  ;;  %v5372_v44 = vstv %s5308_s14 }
 0x22e   : > { %1652 = vadd.xlane.f32.xlu0 %v1651_v21  ;;  %v5378_v21 = vmul.f32 %v3135_v26, %v5311_v28  ;;  %v5465_v26 = vmul.f32 %v3139_v31, %v5306_v58 }
 0x22f   : > { %v5285_v4 = vpop.xlane.xlu0 %2226 }
 0x230   : > { %2259 = vmax.xlane.f32.xlu1 %v2258_v61  ;;  %v5387_v61 = vmul.f32 %v3134_v0, %v5306_v58  ;;  %v5397_v54 = vmul.f32 %v5313_v50, %v5285_v4  ;;  %v5412_v39 = vmul.f32 %v5320_v7, %v5285_v4  ;;  %6409 = vst [vmem:[#allocation19_spill] sm:$0xff] %v5465_v26 }
 0x232   : > { %2244 = vmax.xlane.f32.xlu0 %v2243_v9  ;;  %v5283_v42 = vpop.xlane.xlu1 %2229  ;;  %v5393_v9 = vmul.f32 %v3137_v24, %v5317_v56  ;;  %v3138_v24 = vadd.f32 -2.0, %v3944_v38 }
 0x233   : > { %v5293_v27 = vpop.xlane.xlu0 %2232  ;;  %v5425_v52 = vmul.f32 %v5320_v7, %v5283_v42 }
 0x234   : > { %2265 = vmax.xlane.f32.xlu1 %v2264_v35  ;;  %v5401_v35 = vmul.f32 %v3134_v0, %v5311_v28  ;;  %v3943_v0 = vld [vmem:[%s4194_s8 + $0x48] sm:$0xff] }
 0x235   : > { %v3141_v2 = vadd.f32 -2.0, %v3943_v0 }
 0x236   : > { %2250 = vmax.xlane.f32.xlu0 %v2249_v29  ;;  %v5287_v34 = vpop.xlane.xlu1 %2235  ;;  %v5408_v29 = vmul.f32 %v5315_v59, %v5285_v4 }
 0x237   : > { %v2239_v15 = vpop.xlane.xlu0 %2238  ;;  %v5441_v30 = vmul.f32 %v5313_v50, %v5287_v34  ;;  %v5450_v12 = vmul.f32 %v5320_v7, %v5287_v34 }
 0x238   : > { %1726 = vadd.xlane.f32.xlu1 %v1725_v19  ;;  %v5416_v19 = vmul.f32 %v5313_v50, %v5283_v42  ;;  %v5453_v13 = vmul.f32 %v5313_v50, %v2239_v15  ;;  %v5462_v18 = vmul.f32 %v5320_v7, %v2239_v15 }
 0x239   : > { %6405 = vst [vmem:[#allocation15_spill] sm:$0xff] %v5450_v12  ;;  %v5519_v12 = vmul.f32 %v3138_v24, %v5317_v56 }
 0x23a   : > { %2256 = vmax.xlane.f32.xlu0 %v2255_v55  ;;  %v5304_v57 = vpop.xlane.xlu1 %2241  ;;  %v5421_v55 = vmul.f32 %v5315_v59, %v5283_v42  ;;  %v3942_v42 = vld [vmem:[%s4194_s8 + $0x20] sm:$0xff]  ;;  %6406 = vst [vmem:[#allocation16_spill] sm:$0xff] %v5453_v13  ;;  %6408 = vst [vmem:[#allocation18_spill] sm:$0xff] %v5462_v18 }
 0x23b   : > { %v3136_v4 = vadd.f32 -2.0, %v3942_v42  ;;  %v5473_v20 = vmul.f32 %v5313_v50, %v5304_v57  ;;  %v5477_v42 = vmul.f32 %v5315_v59, %v5304_v57  ;;  %v5484_v18 = vmul.f32 %v5320_v7, %v5304_v57  ;;  %6420 = vst [vmem:[#allocation29_spill] sm:$0xff] %v5519_v12 }
 0x23c   : > { %2271 = vmax.xlane.f32.xlu1 %v2270_v17  ;;  %v5429_v17 = vmul.f32 %v5313_v50, %v5293_v27  ;;  %v3945_v50 = vld [vmem:[%s4194_s8 + $0x58] sm:$0xff]  ;;  %v5502_v57 = vmul.f32 %v3141_v2, %v5311_v28 }
 0x23d   : > { %v5487_v38 = vmul.f32 %v3136_v4, %v5306_v58  ;;  %v5490_v13 = vmul.f32 %v3136_v4, %v5311_v28 }
 0x23e   : > { %2262 = vmax.xlane.f32.xlu0 %v2261_v22  ;;  %6402 = vst [vmem:[#allocation12_spill] sm:$0xff] %v5429_v17  ;;  %v5433_v22 = vmul.f32 %v5315_v59, %v5293_v27  ;;  %6416 = vst [vmem:[#allocation25_spill] sm:$0xff] %v5502_v57  ;;  %v5516_v57 = vmul.f32 %v3138_v24, %v5311_v28 }
 0x23f   : > { %6412 = vst [vmem:[#allocation7_spill] sm:$0xff] %v5487_v38  ;;  %6413 = vst [vmem:[#allocation22_spill] sm:$0xff] %v5490_v13  ;;  %v5506_v13 = vmul.f32 %v3141_v2, %v5317_v56 }
 0x240   : > { %6403 = vst [vmem:[#allocation13_spill] sm:$0xff] %v5433_v22  ;;  %6419 = vst [vmem:[#allocation28_spill] sm:$0xff] %v5516_v57 }
 0x241   : > { %6417 = vst [vmem:[#allocation26_spill] sm:$0xff] %v5506_v13 }
 0x242   : > { %1723 = vadd.xlane.f32.xlu0 %v1722_v16  ;;  %v5437_v16 = vmul.f32 %v5320_v7, %v5293_v27  ;;  %v5456_v27 = vmul.f32 %v5315_v59, %v2239_v15  ;;  %v5480_v15 = vmul.f32 %v3139_v31, %v5317_v56 }
 0x244   : > { %6404 = vst [vmem:[#allocation14_spill] sm:$0xff] %v5437_v16  ;;  %6407 = vst [vmem:[#allocation17_spill] sm:$0xff] %v5456_v27 }
 0x245   : > { %6411 = vst [vmem:[#allocation6_spill] sm:$0xff] %v5480_v15 }
 0x246   : > { %2268 = vmax.xlane.f32.xlu0 %v2267_v51  ;;  %v5445_v51 = vmul.f32 %v5315_v59, %v5287_v34  ;;  %v5468_v34 = vmul.f32 %v3139_v31, %v5311_v28  ;;  %v5499_v31 = vmul.f32 %v3141_v2, %v5306_v58 }
 0x248   : > { %6410 = vst [vmem:[#allocation20_spill] sm:$0xff] %v5468_v34  ;;  %v3143_v34 = vadd.f32 -2.0, %v3945_v50  ;;  %6415 = vst [vmem:[#allocation24_spill] sm:$0xff] %v5499_v31  ;;  %v5509_v50 = vmul.f32 %v3138_v24, %v5306_v58 }
 0x24a   : > { %6418 = vst [vmem:[#allocation27_spill] sm:$0xff] %v5509_v50  ;;  %v5524_v50 = vmul.f32 %v3143_v34, %v5306_v58  ;;  %v5530_v11 = vmul.f32 %v3143_v34, %v5311_v28  ;;  %v5533_v57 = vmul.f32 %v3143_v34, %v5317_v56 }
 0x24c   : > { %6421 = vst [vmem:[#allocation30_spill] sm:$0xff] %v5524_v50  ;;  %6422 = vst [vmem:[#allocation31_spill] sm:$0xff] %v5530_v11  ;;  %v3948_v50 = vld [vmem:[%s4194_s8 + $0x50] sm:$0xff] }
 0x24d   : > { %6423 = vst [vmem:[#allocation32_spill] sm:$0xff] %v5533_v57  ;;  %v5542_v16 = vadd.f32 -2.0, %v3948_v50 }
 0x27b   : > { %v1614_v23 = vpop.xlane.xlu1 %1613 }
 0x27c   : > { %3872 = vrcp.f32 %v1614_v23 }
 0x27f   : > { %v5369_v36 = vpop.xlane.xlu0 %1610 }
 0x280   : > { %v5383_v33 = vpop.xlane.xlu1 %1619  ;;  %3874 = vrcp.f32 %v5369_v36 }
 0x281   : > { %3876 = vrcp.f32 %v5383_v33 }
 0x283   : > { %v1685_v1 = vpop.xlane.xlu0 %1684 }
 0x285   : > { %v5458_v14 = vpop.xlane.xlu1 %1687 }
 0x286   : > { %v3873_v60 = vpop.eup %3872 }
 0x287   : > { %v1745_v0 = vmul.f32 %v3873_v60, %v1614_v23  ;;  %v1682_v27 = vpop.xlane.xlu0 %1681  ;;  %v5496_v23 = vmul.f32 %v3136_v4, %v5317_v56 }
 0x289   : > { %v1761_v59 = vsub.f32 2.0, %v1745_v0  ;;  %v5493_v26 = vpop.xlane.xlu1 %1625  ;;  %6414 = vst [vmem:[#allocation23_spill] sm:$0xff] %v5496_v23  ;;  %v3946_v0 = vld [vmem:[%s4194_s8 + $0x40] sm:$0xff] }
 0x28a   : > { %v3875_v7 = vpop.eup %3874  ;;  %3878 = vrcp.f32 %v5493_v26  ;;  %v3140_v38 = vadd.f32 -2.0, %v3946_v0  ;;  %v3947_v0 = vld [vmem:[%s4194_s8 + $0x68] sm:$0xff] }
 0x28b   : > { %v3877_v4 = vpop.eup %3876  ;;  %v1744_v23 = vmul.f32 %v3875_v7, %v5369_v36  ;;  %v1777_v15 = vmul.f32 %v3873_v60, %v1761_v59  ;;  %v5513_v31 = vpop.xlane.xlu0 %1616  ;;  %v3145_v13 = vadd.f32 -2.0, %v3947_v0 }
 0x28c   : > { %v1747_v2 = vmul.f32 %v3877_v4, %v5383_v33  ;;  %3880 = vrcp.f32 %v5513_v31  ;;  %v5536_v33 = vmul.f32 %v3140_v38, %v5306_v58  ;;  %v5539_v12 = vmul.f32 %v3140_v38, %v5311_v28 }
 0x28d   : > { %v1760_v36 = vsub.f32 2.0, %v1744_v23  ;;  %v1793_v59 = vmul.f32 %v1777_v15, %v1685_v1  ;;  %v5527_v60 = vpop.xlane.xlu1 %1696 }
 0x28e   : > { %v1763_v24 = vsub.f32 2.0, %v1747_v2  ;;  %6424 = vst [vmem:[#allocation33_spill] sm:$0xff] %v5536_v33  ;;  %6425 = vst [vmem:[#allocation34_spill] sm:$0xff] %v5539_v12  ;;  %v5548_v2 = vmul.f32 %v3140_v38, %v5317_v56  ;;  %v5551_v33 = vmul.f32 %v3145_v13, %v5306_v58  ;;  %v5554_v12 = vmul.f32 %v3145_v13, %v5311_v28 }
 0x28f   : > { %v2276_v1 = vmul.f32 %v5322_v25, %v1793_v59  ;;  %v2396_v15 = vmul.f32 %v5328_v5, %v1793_v59  ;;  %v2516_v23 = vmul.f32 %v5333_v3, %v1793_v59  ;;  %v1776_v0 = vmul.f32 %v3875_v7, %v1760_v36  ;;  %v1691_v11 = vpop.xlane.xlu0 %1690 }
 0x290   : > { %v1779_v34 = vmul.f32 %v3877_v4, %v1763_v24  ;;  %6426 = vst [vmem:[#allocation35_spill] sm:$0xff] %v5554_v12  ;;  %v5565_v38 = vmul.f32 %v3145_v13, %v5317_v56  ;;  %v5569_v4 = vmul.f32 %v5542_v16, %v5306_v58 }
 0x291   : > { %v2310_v50 = vadd.f32 %v5325_v63, %v2276_v1  ;;  %v2430_v57 = vadd.f32 %v5331_v47, %v2396_v15  ;;  %v2550_v22 = vadd.f32 %v5343_v6, %v2516_v23  ;;  %v1792_v17 = vmul.f32 %v1776_v0, %v1682_v27  ;;  %v5559_v59 = vpop.xlane.xlu1 %1631 }
 0x292   : > { %v5561_v7 = vmul.f32 %v1779_v34, %v1691_v11  ;;  %3882 = vrcp.f32 %v5559_v59  ;;  %6427 = vst [vmem:[#allocation36_spill] sm:$0xff] %v5565_v38  ;;  %6428 = vst [vmem:[#allocation37_spill] sm:$0xff] %v5569_v4 }
 0x293   : > { %v2344_v63 = vadd.f32 %v5416_v19, %v2310_v50  ;;  %v2464_v47 = vadd.f32 %v5421_v55, %v2430_v57  ;;  %v2584_v6 = vadd.f32 %v5425_v52, %v2550_v22  ;;  %v2275_v27 = vmul.f32 %v5322_v25, %v1792_v17  ;;  %v5575_v36 = vpop.xlane.xlu0 %1622 }
 0x294   : > { %v3879_v11 = vpop.eup %3878  ;;  %v2395_v24 = vmul.f32 %v5328_v5, %v1792_v17  ;;  %v2515_v13 = vmul.f32 %v5333_v3, %v1792_v17  ;;  %v2278_v1 = vmul.f32 %v5322_v25, %v5561_v7  ;;  %v2398_v15 = vmul.f32 %v5328_v5, %v5561_v7 }
 0x295   : > { %v2362_v19 = vadd.f32 %v5337_v62, %v2344_v63  ;;  %v2482_v55 = vadd.f32 %v5340_v40, %v2464_v47  ;;  %v2602_v52 = vadd.f32 %v5346_v49, %v2584_v6  ;;  %v2309_v22 = vadd.f32 %v5352_v45, %v2275_v27  ;;  %v5587_v57 = vpop.xlane.xlu1 %1702 }
 0x296   : > { %v3881_v23 = vpop.eup %3880  ;;  %v2429_v0 = vadd.f32 %v5355_v46, %v2395_v24  ;;  %v2549_v17 = vadd.f32 %v5364_v43, %v2515_v13  ;;  %v1749_v34 = vmul.f32 %v3879_v11, %v5493_v26  ;;  %v2312_v50 = vadd.f32 %v5367_v32, %v2278_v1 }
 0x297   : > { %v2378_v4 = vmax.f32 %v2362_v19, 0.0  ;;  %v2498_v38 = vmax.f32 %v2482_v55, 0.0  ;;  %v2618_v63 = vmax.f32 %v2602_v52, 0.0  ;;  %v2343_v47 = vadd.f32 %v5397_v54, %v2309_v22  ;;  %v5594_v12 = vpop.xlane.xlu0 %1693 }
 0x298   : > { %v2463_v45 = vadd.f32 %v5408_v29, %v2429_v0  ;;  %v2583_v6 = vadd.f32 %v5412_v39, %v2549_v17  ;;  %v1765_v27 = vsub.f32 2.0, %v1749_v34  ;;  %v1746_v46 = vmul.f32 %v3881_v23, %v5513_v31 }
 0x299   : > { %v2636_v43 = vmul.f32 %v5349_v53, %v2378_v4  ;;  %v2654_v26 = vmul.f32 %v5358_v41, %v2498_v38  ;;  %v2688_v32 = vmul.f32 %v5361_v8, %v2618_v63  ;;  %v2361_v24 = vadd.f32 %v5337_v62, %v2343_v47  ;;  %v5603_v13 = vpop.xlane.xlu1 %1637 }
 0x29a   : > { %v2481_v54 = vadd.f32 %v5340_v40, %v2463_v45  ;;  %v2601_v1 = vadd.f32 %v5346_v49, %v2583_v6  ;;  %v1762_v29 = vsub.f32 2.0, %v1746_v46  ;;  %v1781_v19 = vmul.f32 %v3879_v11, %v1765_v27 }
 0x29b   : > { %v2670_v39 = vadd.f32 %v2654_v26, %v2636_v43  ;;  %v2377_v55 = vmax.f32 %v2361_v24, 0.0  ;;  %v2346_v31 = vadd.f32 %v5441_v30, %v2312_v50  ;;  %v2432_v4 = vadd.f32 %v5378_v21, %v2398_v15  ;;  %v5609_v52 = vpop.xlane.xlu0 %1628 }
 0x29c   : > { %v5611_v38 = vpop.eup %3882  ;;  %v2497_v22 = vmax.f32 %v2481_v54, 0.0  ;;  %v2617_v0 = vmax.f32 %v2601_v1, 0.0  ;;  %v1778_v17 = vmul.f32 %v3881_v23, %v1762_v29  ;;  %v1797_v34 = vmul.f32 %v1781_v19, %v5527_v60 }
 0x29d   : > { %v2704_v63 = vadd.f32 %v2688_v32, %v2670_v39  ;;  %v2635_v47 = vmul.f32 %v5349_v53, %v2377_v55  ;;  %v2364_v11 = vadd.f32 %v5337_v62, %v2346_v31  ;;  %v2466_v45 = vadd.f32 %v5445_v51, %v2432_v4  ;;  %v5617_v6 = vpop.xlane.xlu1 %1708 }
 0x29e   : > { %v2653_v21 = vmul.f32 %v5358_v41, %v2497_v22  ;;  %v2687_v30 = vmul.f32 %v5361_v8, %v2617_v0  ;;  %v1794_v15 = vmul.f32 %v1778_v17, %v5458_v14  ;;  %v2280_v50 = vmul.f32 %v5322_v25, %v1797_v34  ;;  %v6429_v17 = vld [vmem:[#allocation12_spill] sm:$0xff] }
 0x29f   : > { %v2722_v23 = vadd.f32 %v5372_v44, %v2704_v63  ;;  %v2400_v60 = vmul.f32 %v5328_v5, %v1797_v34  ;;  %v2520_v27 = vmul.f32 %v5333_v3, %v1797_v34  ;;  %v2380_v46 = vmax.f32 %v2364_v11, 0.0  ;;  %v5626_v43 = vpop.xlane.xlu0 %1699  ;;  %v6430_v63 = vld [vmem:[#allocation13_spill] sm:$0xff] }
 0x2a0   : > { %v2669_v51 = vadd.f32 %v2653_v21, %v2635_v47  ;;  %v2277_v26 = vmul.f32 %v5322_v25, %v1794_v15  ;;  %v2397_v32 = vmul.f32 %v5328_v5, %v1794_v15  ;;  %v2517_v24 = vmul.f32 %v5333_v3, %v1794_v15  ;;  %v6431_v47 = vld [vmem:[#allocation14_spill] sm:$0xff] }
 0x2a1   : > { %3884 = vtanh.f32 %v2722_v23  ;;  %v2314_v14 = vadd.f32 %v5375_v37, %v2280_v50  ;;  %v2434_v54 = vadd.f32 %v5390_v10, %v2400_v60  ;;  %v2554_v1 = vadd.f32 %v5393_v9, %v2520_v27  ;;  %v5634_v29 = vpop.xlane.xlu1 %1643 }
 0x2a2   : > { %v2703_v19 = vadd.f32 %v2687_v30, %v2669_v51  ;;  %v2311_v39 = vadd.f32 %v5387_v61, %v2277_v26  ;;  %v2431_v55 = vadd.f32 %v5401_v35, %v2397_v32  ;;  %v2551_v31 = vadd.f32 %v5404_v48, %v2517_v24 }
 0x2a3   : > { %v2348_v4 = vadd.f32 %v5473_v20, %v2314_v14  ;;  %v2468_v22 = vadd.f32 %v5477_v42, %v2434_v54  ;;  %v2588_v0 = vadd.f32 %v5484_v18, %v2554_v1  ;;  %v2484_v37 = vadd.f32 %v5340_v40, %v2466_v45  ;;  %v5643_v10 = vpop.xlane.xlu0 %1634  ;;  %v6432_v1 = vld [vmem:[#allocation11_spill] sm:$0xff] }
 0x2a4   : > { %v2721_v9 = vadd.f32 %v5372_v44, %v2703_v19  ;;  %v2345_v34 = vadd.f32 %v6429_v17, %v2311_v39  ;;  %v2465_v61 = vadd.f32 %v6430_v63, %v2431_v55  ;;  %v2585_v35 = vadd.f32 %v6431_v47, %v2551_v31  ;;  %v3949_v47 = vld [vmem:[%s4194_s8 + $0x60] sm:$0xff] }
 0x2a5   : > { %v2366_v48 = vadd.f32 %v5337_v62, %v2348_v4  ;;  %v2486_v20 = vadd.f32 %v5340_v40, %v2468_v22  ;;  %v2606_v42 = vadd.f32 %v5346_v49, %v2588_v0  ;;  %v2500_v11 = vmax.f32 %v2484_v37, 0.0  ;;  %v5652_v18 = vpop.xlane.xlu1 %1714 }
 0x2a6   : > { %3886 = vtanh.f32 %v2721_v9  ;;  %v2363_v45 = vadd.f32 %v5337_v62, %v2345_v34  ;;  %v2483_v21 = vadd.f32 %v5340_v40, %v2465_v61  ;;  %v2603_v30 = vadd.f32 %v5346_v49, %v2585_v35  ;;  %v6433_v9 = vld [vmem:[#allocation15_spill] sm:$0xff] }
 0x2a7   : > { %v2382_v15 = vmax.f32 %v2366_v48, 0.0  ;;  %v2502_v50 = vmax.f32 %v2486_v20, 0.0  ;;  %v2622_v23 = vmax.f32 %v2606_v42, 0.0  ;;  %v2518_v60 = vmul.f32 %v5333_v3, %v5561_v7  ;;  %v5659_v27 = vpop.xlane.xlu0 %1705 }
 0x2a8   : > { %v2379_v51 = vmax.f32 %v2363_v45, 0.0  ;;  %v2499_v26 = vmax.f32 %v2483_v21, 0.0  ;;  %v2619_v32 = vmax.f32 %v2603_v30, 0.0  ;;  %v5663_v24 = vmul.f32 %v5542_v16, %v5311_v28  ;;  %v3950_v21 = vld [vmem:[%s4194_s8 + $0x78] sm:$0xff] }
 0x2a9   : > { %v2640_v14 = vmul.f32 %v5349_v53, %v2382_v15  ;;  %v2658_v54 = vmul.f32 %v5358_v41, %v2502_v50  ;;  %v2552_v19 = vadd.f32 %v6432_v1, %v2518_v60  ;;  %v2638_v39 = vmul.f32 %v5349_v53, %v2380_v46  ;;  %v5669_v55 = vpop.xlane.xlu1 %1649 }
 0x2aa   : > { %v2637_v7 = vmul.f32 %v5349_v53, %v2379_v51  ;;  %v2655_v31 = vmul.f32 %v5358_v41, %v2499_v26  ;;  %v2692_v4 = vmul.f32 %v5361_v8, %v2622_v23  ;;  %v2656_v22 = vmul.f32 %v5358_v41, %v2500_v11 }
 0x2ab   : > { %v3885_v0 = vpop.eup %3884  ;;  %v2674_v37 = vadd.f32 %v2658_v54, %v2640_v14  ;;  %v2586_v17 = vadd.f32 %v6433_v9, %v2552_v19  ;;  %v1751_v34 = vmul.f32 %v5611_v38, %v5559_v59  ;;  %3888 = vrcp.f32 %v5575_v36  ;;  %v5679_v46 = vpop.xlane.xlu0 %1640  ;;  %v3951_v14 = vld [vmem:[%s4194_s8 + $0x70] sm:$0xff]  ;;  %s238_s8 = sand.u32 1, %s4017_s18   ;;  %s2842_s18 = ssub.s32 (%p4121_p4), 38, %s4150_s12 }
 0x2ac   : > { %v2671_v63 = vadd.f32 %v2655_v31, %v2637_v7  ;;  %v2689_v61 = vmul.f32 %v5361_v8, %v2619_v32  ;;  %3890 = vrcp.f32 %v5603_v13  ;;  %2771 = vrot.lane.b32.xlu1 %v3885_v0, %s4065_s15  ;;  %v3144_v35 = vadd.f32 -2.0, %v3949_v47  ;;  %v6440_v47 = vld [vmem:[#allocation19_spill] sm:$0xff]  ;;  %s3127_s16 = sshll.u32 %s238_s8, 7  ;;  %p2843_p6 = scmp.lt.s32.totalorder (%p4121_p4), %s2842_s18, 16 }
 0x2ad   : > { %v2708_v48 = vadd.f32 %v2692_v4, %v2674_v37  ;;  %v2604_v20 = vadd.f32 %v5346_v49, %v2586_v17  ;;  %v1767_v42 = vsub.f32 2.0, %v1751_v34  ;;  %3892 = vrcp.f32 %v5609_v52  ;;  %v5687_v59 = vpop.xlane.xlu1 %1720  ;;  %s6056_s17 = scalar_lea.vmem [#allocation4], %s3127_s16  }
 0x2ae   : > { %v2705_v11 = vadd.f32 %v2689_v61, %v2671_v63  ;;  %3894 = vrcp.f32 %v5634_v29  ;;  %v5692_v45 = vmul.f32 %v5542_v16, %v5317_v56  ;;  %v3147_v30 = vadd.f32 -2.0, %v3950_v21 }
 0x2af   : > { %v2620_v15 = vmax.f32 %v2604_v20, 0.0  ;;  %v2672_v50 = vadd.f32 %v2656_v22, %v2638_v39  ;;  %v1783_v23 = vmul.f32 %v5611_v38, %v1767_v42  ;;  %3896 = vrcp.f32 %v5643_v10  ;;  %v5697_v60 = vpop.xlane.xlu0 %1711 }
 0x2b0   : > { %v3887_v51 = vpop.eup %3886  ;;  %v2723_v26 = vadd.f32 %v5372_v44, %v2705_v11  ;;  %v2726_v32 = vadd.f32 %v5372_v44, %v2708_v48  ;;  %3898 = vrcp.f32 %v5669_v55  ;;  %v5703_v16 = vadd.f32 -2.0, %v3951_v14  ;;  %v6441_v48 = vld [vmem:[#allocation20_spill] sm:$0xff]  ;;  %v6445_v14 = vld [vmem:[#allocation10_spill] sm:$0xff] }
 0x2b1   : > { %v2690_v54 = vmul.f32 %v5361_v8, %v2620_v15  ;;  %v1799_v1 = vmul.f32 %v1783_v23, %v5587_v57  ;;  %2769 = vrot.lane.b32.xlu0 %v3887_v51, %s4065_s15  ;;  %v5708_v38 = vpop.xlane.xlu1 %1655  ;;  %v5711_v19 = vmul.f32 %v3144_v35, %v5306_v58  ;;  %v5714_v39 = vmul.f32 %v3144_v35, %v5311_v28  ;;  %v6443_v15 = vld [vmem:[#allocation8_spill] sm:$0xff]  ;;  %v6444_v51 = vld [vmem:[#allocation6_spill] sm:$0xff] }
 0x2b2   : > { %6434 = vst [vmem:[#allocation12_spill] sm:$0xff] %v5703_v16  ;;  %3900 = vtanh.f32 %v2723_v26  ;;  %v5717_v7 = vmul.f32 %v3144_v35, %v5317_v56  ;;  %v5720_v31 = vmul.f32 %v3147_v30, %v5306_v58  ;;  %v5723_v4 = vmul.f32 %v3147_v30, %v5311_v28 }
 0x2b3   : > { %v2706_v57 = vadd.f32 %v2690_v54, %v2672_v50  ;;  %v2282_v22 = vmul.f32 %v5322_v25, %v1799_v1  ;;  %v2402_v0 = vmul.f32 %v5328_v5, %v1799_v1  ;;  %v2522_v37 = vmul.f32 %v5333_v3, %v1799_v1  ;;  %v5743_v42 = vpop.xlane.xlu0 %1646 }
 0x2b4   : > { %6435 = vst [vmem:[#allocation13_spill] sm:$0xff] %v5720_v31  ;;  %6436 = vst [vmem:[#allocation14_spill] sm:$0xff] %v5723_v4  ;;  %3902 = vtanh.f32 %v2726_v32  ;;  %v5729_v9 = vmul.f32 %v3147_v30, %v5317_v56  ;;  %v5733_v17 = vmul.f32 %v5703_v16, %v5306_v58  ;;  %v5737_v34 = vmul.f32 %v5703_v16, %v5311_v28  ;;  %v6442_v30 = vld [vmem:[#allocation21_spill] sm:$0xff]  ;;  %v6455_v56 = vld [vmem:[#allocation27_spill] sm:$0xff] }
 0x2b5   : > { %v3889_v63 = vpop.eup %3888  ;;  %v2724_v61 = vadd.f32 %v5372_v44, %v2706_v57  ;;  %v2316_v35 = vadd.f32 %v6440_v47, %v2282_v22  ;;  %v2436_v20 = vadd.f32 %v6441_v48, %v2402_v0  ;;  %3904 = vrcp.f32 %v5679_v46  ;;  %v2248_v11 = vpop.xlane.xlu1 %2247 }
 0x2b6   : > { %6437 = vst [vmem:[#allocation11_spill] sm:$0xff] %v5729_v9  ;;  %6438 = vst [vmem:[#allocation15_spill] sm:$0xff] %v5733_v17  ;;  %v3891_v21 = vpop.eup %3890  ;;  %v1748_v58 = vmul.f32 %v3889_v63, %v5575_v36  ;;  %3906 = vrcp.f32 %v5708_v38  ;;  %v2334_v28 = vmul.f32 %v6442_v30, %v2248_v11  ;;  %v2454_v50 = vmul.f32 %v6443_v15, %v2248_v11 }
 0x2b7   : > { %6439 = vst [vmem:[#allocation38_spill] sm:$0xff] %v5737_v34  ;;  %v3893_v23 = vpop.eup %3892  ;;  %3908 = vtanh.f32 %v2724_v61  ;;  %v2556_v26 = vadd.f32 %v6444_v51, %v2522_v37  ;;  %v1753_v32 = vmul.f32 %v3891_v21, %v5603_v13  ;;  %v2574_v54 = vmul.f32 %v6445_v14, %v2248_v11 }
 0x2b8   : > { %v3895_v1 = vpop.eup %3894  ;;  %v1764_v57 = vsub.f32 2.0, %v1748_v58  ;;  %v1750_v22 = vmul.f32 %v3893_v23, %v5609_v52  ;;  %3910 = vrcp.f32 %v5743_v42  ;;  %v2350_v36 = vadd.f32 %v2334_v28, %v2316_v35 }
 0x2b9   : > { %v3897_v0 = vpop.eup %3896  ;;  %v1769_v47 = vsub.f32 2.0, %v1753_v32  ;;  %v1755_v48 = vmul.f32 %v3895_v1, %v5634_v29  ;;  %v2470_v34 = vadd.f32 %v2454_v50, %v2436_v20  ;;  %v5755_v17 = vadd.f32 %v2574_v54, %v2556_v26 }
 0x2ba   : > { %v5757_v61 = vpop.eup %3898  ;;  %v1780_v37 = vmul.f32 %v3889_v63, %v1764_v57  ;;  %v1766_v13 = vsub.f32 2.0, %v1750_v22  ;;  %v1752_v11 = vmul.f32 %v3897_v0, %v5643_v10  ;;  %v5761_v58 = vadd.f32 %v5337_v62, %v2350_v36 }
 0x2bb   : > { %v1785_v52 = vmul.f32 %v3891_v21, %v1769_v47  ;;  %v1771_v51 = vsub.f32 2.0, %v1755_v48  ;;  %v1757_v35 = vmul.f32 %v5757_v61, %v5669_v55  ;;  %v5766_v28 = vadd.f32 %v5340_v40, %v2470_v34  ;;  %v6450_v21 = vld [vmem:[#allocation25_spill] sm:$0xff] }
 0x2bc   : > { %v3901_v29 = vpop.eup %3900  ;;  %v1796_v20 = vmul.f32 %v1780_v37, %v5594_v12  ;;  %v1782_v50 = vmul.f32 %v3893_v23, %v1766_v13  ;;  %v1768_v26 = vsub.f32 2.0, %v1752_v11  ;;  %v6446_v37 = vld [vmem:[#allocation7_spill] sm:$0xff]  ;;  %v6447_v11 = vld [vmem:[#allocation22_spill] sm:$0xff] }
 0x2bd   : > { %v1801_v10 = vmul.f32 %v1785_v52, %v5617_v6  ;;  %v1787_v32 = vmul.f32 %v3895_v1, %v1771_v51  ;;  %v1773_v54 = vsub.f32 2.0, %v1757_v35  ;;  %2773 = vrot.lane.b32.xlu1 %v3901_v29, %s4065_s15  ;;  %v6448_v51 = vld [vmem:[#allocation23_spill] sm:$0xff] }
 0x2be   : > { %v3903_v57 = vpop.eup %3902  ;;  %v2279_v55 = vmul.f32 %v5322_v25, %v1796_v20  ;;  %v2399_v34 = vmul.f32 %v5328_v5, %v1796_v20  ;;  %v2519_v22 = vmul.f32 %v5333_v3, %v1796_v20  ;;  %v1798_v12 = vmul.f32 %v1782_v50, %v5626_v43  ;;  %v6449_v20 = vld [vmem:[#allocation24_spill] sm:$0xff] }
 0x2bf   : > { %v3905_v23 = vpop.eup %3904  ;;  %v2284_v36 = vmul.f32 %v5322_v25, %v1801_v10  ;;  %v2404_v6 = vmul.f32 %v5328_v5, %v1801_v10  ;;  %v2524_v1 = vmul.f32 %v5333_v3, %v1801_v10  ;;  %v1803_v47 = vmul.f32 %v1787_v32, %v5652_v18  ;;  %v6451_v10 = vld [vmem:[#allocation26_spill] sm:$0xff] }
 0x2c0   : > { %v5781_v48 = vpop.eup %3906  ;;  %v2313_v13 = vadd.f32 %v6446_v37, %v2279_v55  ;;  %v2433_v52 = vadd.f32 %v6447_v11, %v2399_v34  ;;  %v2553_v35 = vadd.f32 %v6448_v51, %v2519_v22  ;;  %v2281_v29 = vmul.f32 %v5322_v25, %v1798_v12  ;;  %v6452_v55 = vld [vmem:[#allocation16_spill] sm:$0xff]  ;;  %v6453_v37 = vld [vmem:[#allocation17_spill] sm:$0xff]  ;;  %v6454_v11 = vld [vmem:[#allocation18_spill] sm:$0xff] }
 0x2c1   : > { %v3909_v43 = vpop.eup %3908  ;;  %v5788_v50 = vadd.f32 %v6449_v20, %v2284_v36  ;;  %v5791_v63 = vadd.f32 %v6450_v21, %v2404_v6  ;;  %v5794_v16 = vadd.f32 %v6451_v10, %v2524_v1  ;;  %v2401_v18 = vmul.f32 %v5328_v5, %v1798_v12  ;;  %v6456_v21 = vld [vmem:[#allocation28_spill] sm:$0xff] }
 0x2c2   : > { %v5797_v32 = vpop.eup %3910  ;;  %v2347_v34 = vadd.f32 %v6452_v55, %v2313_v13  ;;  %v2467_v22 = vadd.f32 %v6453_v37, %v2433_v52  ;;  %v2587_v51 = vadd.f32 %v6454_v11, %v2553_v35  ;;  %v5803_v9 = vadd.f32 %v6455_v56, %v2281_v29  ;;  %2775 = vrot.lane.b32.xlu0 %v3909_v43, %s4065_s15  ;;  %v6457_v29 = vld [vmem:[#allocation29_spill] sm:$0xff]  ;;  %v6458_v43 = vld [vmem:[#allocation30_spill] sm:$0xff]  ;;  %v6459_v55 = vld [vmem:[#allocation31_spill] sm:$0xff] }
 0x2c3   : > { %v5807_v36 = vadd.f32 %v6456_v21, %v2401_v18  ;;  %v2521_v6 = vmul.f32 %v5333_v3, %v1798_v12  ;;  %v2286_v1 = vmul.f32 %v5322_v25, %v1803_v47  ;;  %v2406_v20 = vmul.f32 %v5328_v5, %v1803_v47 }
 0x2c4   : > { %v2365_v13 = vadd.f32 %v5337_v62, %v2347_v34  ;;  %v2485_v52 = vadd.f32 %v5340_v40, %v2467_v22  ;;  %v2605_v35 = vadd.f32 %v5346_v49, %v2587_v51  ;;  %v2526_v56 = vmul.f32 %v5333_v3, %v1803_v47  ;;  %v6460_v34 = vld [vmem:[#allocation32_spill] sm:$0xff] }
 0x2c5   : > { %v5817_v10 = vadd.f32 %v6457_v29, %v2521_v6  ;;  %v5820_v18 = vadd.f32 %v6458_v43, %v2286_v1  ;;  %v5823_v12 = vadd.f32 %v6459_v55, %v2406_v20  ;;  %v1784_v37 = vmul.f32 %v3897_v0, %v1768_v26  ;;  %v6461_v29 = vld [vmem:[#allocation33_spill] sm:$0xff]  ;;  %v6462_v43 = vld [vmem:[#allocation34_spill] sm:$0xff] }
 0x2c6   : > { %v2381_v11 = vmax.f32 %v2365_v13, 0.0  ;;  %v2501_v21 = vmax.f32 %v2485_v52, 0.0  ;;  %v2621_v4 = vmax.f32 %v2605_v35, 0.0  ;;  %v5826_v31 = vadd.f32 %v6460_v34, %v2526_v56  ;;  %2779 = vrot.lane.b32.xlu0 %v3903_v57, %s4065_s15  ;;  %v2254_v56 = vpop.xlane.xlu1 %2253 }
 0x2c7   : > { %v1800_v47 = vmul.f32 %v1784_v37, %v5659_v27  ;;  %v1754_v22 = vmul.f32 %v3905_v23, %v5679_v46  ;;  %v1789_v51 = vmul.f32 %v5757_v61, %v1773_v54  ;;  %v5834_v6 = vmul.f32 %v5781_v48, %v5708_v38  ;;  %v1718_v54 = vpop.xlane.xlu0 %1717 }
 0x2c8   : > { %v2639_v0 = vmul.f32 %v5349_v53, %v2381_v11  ;;  %v2657_v26 = vmul.f32 %v5358_v41, %v2501_v21  ;;  %v2691_v1 = vmul.f32 %v5361_v8, %v2621_v4  ;;  %v1756_v20 = vmul.f32 %v5797_v32, %v5743_v42 }
 0x2c9   : > { %v2283_v57 = vmul.f32 %v5322_v25, %v1800_v47  ;;  %v2403_v27 = vmul.f32 %v5328_v5, %v1800_v47  ;;  %v2523_v46 = vmul.f32 %v5333_v3, %v1800_v47  ;;  %v1770_v61 = vsub.f32 2.0, %v1754_v22 }
 0x2ca   : > { %v2673_v13 = vadd.f32 %v2657_v26, %v2639_v0  ;;  %v1805_v38 = vmul.f32 %v1789_v51, %v5687_v59  ;;  %v1775_v52 = vsub.f32 2.0, %v5834_v6  ;;  %v1772_v35 = vsub.f32 2.0, %v1756_v20  ;;  %v6465_v20 = vld [vmem:[#allocation35_spill] sm:$0xff] }
 0x2cb   : > { %v5847_v4 = vadd.f32 %v6461_v29, %v2283_v57  ;;  %v5850_v42 = vadd.f32 %v6462_v43, %v2403_v27  ;;  %v5853_v55 = vadd.f32 %v5548_v2, %v2523_v46  ;;  %v1786_v37 = vmul.f32 %v3905_v23, %v1770_v61  ;;  %v5880_v61 = vpop.xlane.xlu0 %1652  ;;  %v2260_v29 = vpop.xlane.xlu1 %2259  ;;  %v6467_v43 = vld [vmem:[#allocation37_spill] sm:$0xff] }
 0x2cc   : > { %v2707_v11 = vadd.f32 %v2691_v1, %v2673_v13  ;;  %v2288_v21 = vmul.f32 %v5322_v25, %v1805_v38  ;;  %v2408_v34 = vmul.f32 %v5328_v5, %v1805_v38  ;;  %v2528_v59 = vmul.f32 %v5333_v3, %v1805_v38 }
 0x2cd   : > { %v1802_v47 = vmul.f32 %v1786_v37, %v5697_v60  ;;  %v2608_v22 = vadd.f32 %v5346_v49, %v5755_v17  ;;  %v6463_v51 = vmax.f32 %v5761_v58, 0.0  ;;  %v6464_v2 = vmax.f32 %v5766_v28, 0.0  ;;  %v6466_v60 = vld [vmem:[#allocation36_spill] sm:$0xff] }
 0x2ce   : > { %v2725_v26 = vadd.f32 %v5372_v44, %v2707_v11  ;;  %v5869_v1 = vadd.f32 %v5551_v33, %v2288_v21  ;;  %v5872_v57 = vadd.f32 %v6465_v20, %v2408_v34  ;;  %v5875_v27 = vadd.f32 %v6466_v60, %v2528_v59 }
 0x2cf   : > { %v2642_v0 = vmul.f32 %v5349_v53, %v6463_v51  ;;  %v2660_v23 = vmul.f32 %v5358_v41, %v6464_v2  ;;  %v2285_v17 = vmul.f32 %v5322_v25, %v1802_v47  ;;  %v2405_v58 = vmul.f32 %v5328_v5, %v1802_v47  ;;  %v2245_v20 = vpop.xlane.xlu0 %2244 }
 0x2d0   : > { %v2525_v46 = vmul.f32 %v5333_v3, %v1802_v47  ;;  %v2624_v28 = vmax.f32 %v2608_v22, 0.0  ;;  %3912 = vtanh.f32 %v2725_v26  ;;  %v1788_v33 = vmul.f32 %v5797_v32, %v1772_v35 }
 0x2d1   : > { %v2676_v13 = vadd.f32 %v2660_v23, %v2642_v0  ;;  %v2336_v38 = vmul.f32 %v6442_v30, %v2254_v56  ;;  %v5885_v37 = vadd.f32 %v6467_v43, %v2285_v17  ;;  %v5888_v11 = vadd.f32 %v5663_v24, %v2405_v58 }
 0x2d2   : > { %v5891_v21 = vadd.f32 %v5692_v45, %v2525_v46  ;;  %v2694_v34 = vmul.f32 %v5361_v8, %v2624_v28  ;;  %v1804_v59 = vmul.f32 %v1788_v33, %v1718_v54  ;;  %v2456_v22 = vmul.f32 %v6443_v15, %v2254_v56 }
 0x2d3   : > { %v2352_v47 = vadd.f32 %v2336_v38, %v5788_v50  ;;  %v2576_v32 = vmul.f32 %v6445_v14, %v2254_v56  ;;  %3914 = vrcp.f32 %v5880_v61  ;;  %v2338_v51 = vmul.f32 %v6442_v30, %v2260_v29 }
 0x2d4   : > { %v2710_v35 = vadd.f32 %v2694_v34, %v2676_v13  ;;  %v2458_v24 = vmul.f32 %v6443_v15, %v2260_v29  ;;  %v2287_v0 = vmul.f32 %v5322_v25, %v1804_v59  ;;  %v2407_v45 = vmul.f32 %v5328_v5, %v1804_v59 }
 0x2d5   : > { %v2527_v2 = vmul.f32 %v5333_v3, %v1804_v59  ;;  %v2370_v54 = vadd.f32 %v5337_v62, %v2352_v47  ;;  %v2472_v23 = vadd.f32 %v2456_v22, %v5791_v63  ;;  %v2592_v56 = vadd.f32 %v2576_v32, %v5794_v16 }
 0x2d6   : > { %v2728_v50 = vadd.f32 %v5372_v44, %v2710_v35  ;;  %v2354_v26 = vadd.f32 %v2338_v51, %v5820_v18  ;;  %v5909_v60 = vadd.f32 %v5711_v19, %v2287_v0  ;;  %v5912_v17 = vadd.f32 %v5714_v39, %v2407_v45  ;;  %v2266_v35 = vpop.xlane.xlu1 %2265 }
 0x2d7   : > { %v5915_v58 = vadd.f32 %v5717_v7, %v2527_v2  ;;  %v2386_v46 = vmax.f32 %v2370_v54, 0.0  ;;  %v2490_v28 = vadd.f32 %v5340_v40, %v2472_v23  ;;  %v2610_v63 = vadd.f32 %v5346_v49, %v2592_v56 }
 0x2d8   : > { %3916 = vtanh.f32 %v2728_v50  ;;  %v2372_v16 = vadd.f32 %v5337_v62, %v2354_v26  ;;  %v2474_v13 = vadd.f32 %v2458_v24, %v5823_v12  ;;  %v2578_v19 = vmul.f32 %v6445_v14, %v2260_v29 }
 0x2d9   : > { %v2644_v18 = vmul.f32 %v5349_v53, %v2386_v46  ;;  %v2333_v39 = vmul.f32 %v6442_v30, %v2245_v20  ;;  %v2506_v33 = vmax.f32 %v2490_v28, 0.0  ;;  %v2626_v38 = vmax.f32 %v2610_v63, 0.0 }
 0x2da   : > { %v2388_v7 = vmax.f32 %v2372_v16, 0.0  ;;  %v2453_v43 = vmul.f32 %v6443_v15, %v2245_v20  ;;  %v3913_v34 = vpop.eup %3912  ;;  %v2492_v59 = vadd.f32 %v5340_v40, %v2474_v13  ;;  %v2594_v47 = vadd.f32 %v2578_v19, %v5826_v31 }
 0x2db   : > { %v2349_v22 = vadd.f32 %v2333_v39, %v5803_v9  ;;  %v2573_v32 = vmul.f32 %v6445_v14, %v2245_v20  ;;  %v2662_v12 = vmul.f32 %v5358_v41, %v2506_v33  ;;  %v2696_v29 = vmul.f32 %v5361_v8, %v2626_v38  ;;  %2777 = vrot.lane.b32.xlu1 %v3913_v34, %s4065_s15 }
 0x2dc   : > { %v2646_v51 = vmul.f32 %v5349_v53, %v2388_v7  ;;  %v2469_v24 = vadd.f32 %v2453_v43, %v5807_v36  ;;  %v2508_v0 = vmax.f32 %v2492_v59, 0.0  ;;  %v2612_v45 = vadd.f32 %v5346_v49, %v2594_v47 }
 0x2dd   : > { %v2367_v31 = vadd.f32 %v5337_v62, %v2349_v22  ;;  %v2589_v9 = vadd.f32 %v2573_v32, %v5817_v10  ;;  %v5937_v2 = vpop.eup %3914  ;;  %v2678_v54 = vadd.f32 %v2662_v12, %v2644_v18  ;;  %v2340_v23 = vmul.f32 %v6442_v30, %v2266_v35  ;;  %v2251_v18 = vpop.xlane.xlu0 %2250 }
 0x2de   : > { %v2487_v50 = vadd.f32 %v5340_v40, %v2469_v24  ;;  %v2460_v56 = vmul.f32 %v6443_v15, %v2266_v35  ;;  %v5944_v36 = vmul.f32 %v5937_v2, %v5880_v61  ;;  %v2628_v26 = vmax.f32 %v2612_v45, 0.0 }
 0x2df   : > { %v2664_v20 = vmul.f32 %v5358_v41, %v2508_v0  ;;  %v2383_v46 = vmax.f32 %v2367_v31, 0.0  ;;  %v2712_v28 = vadd.f32 %v2696_v29, %v2678_v54  ;;  %v2607_v10 = vadd.f32 %v5346_v49, %v2589_v9 }
 0x2e0   : > { %v2503_v63 = vmax.f32 %v2487_v50, 0.0  ;;  %v2356_v16 = vadd.f32 %v2340_v23, %v5869_v1  ;;  %v1774_v13 = vsub.f32 2.0, %v5944_v36  ;;  %v2698_v39 = vmul.f32 %v5361_v8, %v2628_v26  ;;  %v1727_v26 = vpop.xlane.xlu1 %1726 }
 0x2e1   : > { %v2680_v19 = vadd.f32 %v2664_v20, %v2646_v51  ;;  %v2641_v33 = vmul.f32 %v5349_v53, %v2383_v46  ;;  %v2730_v38 = vadd.f32 %v5372_v44, %v2712_v28  ;;  %v2623_v7 = vmax.f32 %v2607_v10, 0.0  ;;  %v2257_v54 = vpop.xlane.xlu0 %2256 }
 0x2e2   : > { %v3917_v61 = vpop.eup %3916  ;;  %v2659_v43 = vmul.f32 %v5358_v41, %v2503_v63  ;;  %v2374_v34 = vadd.f32 %v5337_v62, %v2356_v16  ;;  %v2476_v47 = vadd.f32 %v2460_v56, %v5872_v57  ;;  %v2580_v1 = vmul.f32 %v6445_v14, %v2266_v35 }
 0x2e3   : > { %v2714_v59 = vadd.f32 %v2698_v39, %v2680_v19  ;;  %v2335_v22 = vmul.f32 %v6442_v30, %v2251_v18  ;;  %2783 = vrot.lane.b32.xlu0 %v3917_v61, %s4065_s15  ;;  %3918 = vtanh.f32 %v2730_v38  ;;  %v2693_v12 = vmul.f32 %v5361_v8, %v2623_v7 }
 0x2e4   : > { %v2675_v32 = vadd.f32 %v2659_v43, %v2641_v33  ;;  %v2390_v29 = vmax.f32 %v2374_v34, 0.0  ;;  %v2494_v24 = vadd.f32 %v5340_v40, %v2476_v47  ;;  %v2596_v0 = vadd.f32 %v2580_v1, %v5875_v27  ;;  %v2272_v1 = vpop.xlane.xlu1 %2271 }
 0x2e5   : > { %v2732_v51 = vadd.f32 %v5372_v44, %v2714_v59  ;;  %v2351_v45 = vadd.f32 %v2335_v22, %v5847_v4  ;;  %v2455_v31 = vmul.f32 %v6443_v15, %v2251_v18  ;;  %v2575_v9 = vmul.f32 %v6445_v14, %v2251_v18  ;;  %v2263_v7 = vpop.xlane.xlu0 %2262 }
 0x2e6   : > { %v2709_v57 = vadd.f32 %v2693_v12, %v2675_v32  ;;  %v2648_v35 = vmul.f32 %v5349_v53, %v2390_v29  ;;  %v2510_v50 = vmax.f32 %v2494_v24, 0.0  ;;  %v2614_v23 = vadd.f32 %v5346_v49, %v2596_v0  ;;  %v6468_v12 = vld [vmem:[#allocation13_spill] sm:$0xff] }
 0x2e7   : > { %3920 = vtanh.f32 %v2732_v51  ;;  %v2369_v56 = vadd.f32 %v5337_v62, %v2351_v45  ;;  %v2471_v27 = vadd.f32 %v2455_v31, %v5850_v42  ;;  %v2591_v4 = vadd.f32 %v2575_v9, %v5853_v55  ;;  %v6469_v51 = vld [vmem:[#allocation14_spill] sm:$0xff]  ;;  %v6470_v45 = vld [vmem:[#allocation11_spill] sm:$0xff] }
 0x2e8   : > { %v2727_v20 = vadd.f32 %v5372_v44, %v2709_v57  ;;  %v1791_v46 = vmul.f32 %v5781_v48, %v1775_v52  ;;  %v2630_v28 = vmax.f32 %v2614_v23, 0.0  ;;  %v2666_v63 = vmul.f32 %v5358_v41, %v2510_v50 }
 0x2e9   : > { %v2385_v10 = vmax.f32 %v2369_v56, 0.0  ;;  %v2337_v16 = vmul.f32 %v6442_v30, %v2257_v54  ;;  %v2489_v18 = vadd.f32 %v5340_v40, %v2471_v27  ;;  %v2609_v19 = vadd.f32 %v5346_v49, %v2591_v4 }
 0x2ea   : > { %3922 = vtanh.f32 %v2727_v20  ;;  %v1807_v39 = vmul.f32 %v1791_v46, %v1727_v26  ;;  %v2682_v33 = vadd.f32 %v2666_v63, %v2648_v35  ;;  %v2700_v42 = vmul.f32 %v5361_v8, %v2630_v28 }
 0x2eb   : > { %v2643_v55 = vmul.f32 %v5349_v53, %v2385_v10  ;;  %v2353_v6 = vadd.f32 %v2337_v16, %v5885_v37  ;;  %v2505_v48 = vmax.f32 %v2489_v18, 0.0  ;;  %v2625_v52 = vmax.f32 %v2609_v19, 0.0  ;;  %v1724_v10 = vpop.xlane.xlu0 %1723 }
 0x2ec   : > { %v2290_v61 = vmul.f32 %v5322_v25, %v1807_v39  ;;  %v2410_v38 = vmul.f32 %v5328_v5, %v1807_v39  ;;  %v2716_v43 = vadd.f32 %v2700_v42, %v2682_v33  ;;  %v2530_v34 = vmul.f32 %v5333_v3, %v1807_v39 }
 0x2ed   : > { %v2371_v59 = vadd.f32 %v5337_v62, %v2353_v6  ;;  %v2457_v47 = vmul.f32 %v6443_v15, %v2257_v54  ;;  %v3919_v22 = vpop.eup %3918  ;;  %v2661_v32 = vmul.f32 %v5358_v41, %v2505_v48  ;;  %v2695_v37 = vmul.f32 %v5361_v8, %v2625_v52 }
 0x2ee   : > { %v2324_v29 = vadd.f32 %v6468_v12, %v2290_v61  ;;  %v2444_v24 = vadd.f32 %v6469_v51, %v2410_v38  ;;  %v2734_v0 = vadd.f32 %v5372_v44, %v2716_v43  ;;  %v2564_v57 = vadd.f32 %v6470_v45, %v2530_v34  ;;  %2787 = vrot.lane.b32.xlu0 %v3919_v22, %s4065_s15  ;;  %v6472_v45 = vld [vmem:[#allocation12_spill] sm:$0xff] }
 0x2ef   : > { %v2387_v35 = vmax.f32 %v2371_v59, 0.0  ;;  %v2473_v31 = vadd.f32 %v2457_v47, %v5888_v11  ;;  %v2677_v9 = vadd.f32 %v2661_v32, %v2643_v55  ;;  %v2577_v50 = vmul.f32 %v6445_v14, %v2257_v54  ;;  %v2269_v12 = vpop.xlane.xlu0 %2268 }
 0x2f0   : > { %v2342_v23 = vmul.f32 %v6442_v30, %v2272_v1  ;;  %v2462_v56 = vmul.f32 %v6443_v15, %v2272_v1  ;;  %3924 = vtanh.f32 %v2734_v0  ;;  %v2582_v4 = vmul.f32 %v6445_v14, %v2272_v1  ;;  %v6471_v0 = vld [vmem:[#allocation9_spill] sm:$0xff] }
 0x2f1   : > { %v3921_v26 = vpop.eup %3920  ;;  %v2491_v20 = vadd.f32 %v5340_v40, %v2473_v31  ;;  %v2645_v27 = vmul.f32 %v5349_v53, %v2387_v35  ;;  %v2711_v46 = vadd.f32 %v2695_v37, %v2677_v9  ;;  %v2593_v11 = vadd.f32 %v2577_v50, %v5891_v21 }
 0x2f2   : > { %v2358_v28 = vadd.f32 %v2342_v23, %v2324_v29  ;;  %v2478_v63 = vadd.f32 %v2462_v56, %v2444_v24  ;;  %v2598_v54 = vadd.f32 %v2582_v4, %v2564_v57  ;;  %v2339_v18 = vmul.f32 %v6442_v30, %v2263_v7  ;;  %2791 = vrot.lane.b32.xlu0 %v3921_v26, %s4065_s15 }
 0x2f3   : > { %v2507_v16 = vmax.f32 %v2491_v20, 0.0  ;;  %v2459_v19 = vmul.f32 %v6443_v15, %v2263_v7  ;;  %v2729_v33 = vadd.f32 %v5372_v44, %v2711_v46  ;;  %v2611_v42 = vadd.f32 %v5346_v49, %v2593_v11 }
 0x2f4   : > { %v3923_v39 = vpop.eup %3922  ;;  %v2376_v55 = vadd.f32 %v5337_v62, %v2358_v28  ;;  %v2496_v21 = vadd.f32 %v5340_v40, %v2478_v63  ;;  %v2616_v48 = vadd.f32 %v5346_v49, %v2598_v54  ;;  %v2355_v52 = vadd.f32 %v2339_v18, %v5909_v60  ;;  %v6474_v54 = vld [vmem:[#allocation38_spill] sm:$0xff] }
 0x2f5   : > { %v2663_v6 = vmul.f32 %v5358_v41, %v2507_v16  ;;  %v2475_v61 = vadd.f32 %v2459_v19, %v5912_v17  ;;  %2781 = vrot.lane.b32.xlu1 %v3923_v39, %s4065_s15  ;;  %3926 = vtanh.f32 %v2729_v33  ;;  %v2627_v38 = vmax.f32 %v2611_v42, 0.0 }
 0x2f6   : > { %v2392_v43 = vmax.f32 %v2376_v55, 0.0  ;;  %v2512_v34 = vmax.f32 %v2496_v21, 0.0  ;;  %v2632_v47 = vmax.f32 %v2616_v48, 0.0  ;;  %v2373_v1 = vadd.f32 %v5337_v62, %v2355_v52 }
 0x2f7   : > { %v2679_v59 = vadd.f32 %v2663_v6, %v2645_v27  ;;  %v2493_v22 = vadd.f32 %v5340_v40, %v2475_v61  ;;  %v2697_v32 = vmul.f32 %v5361_v8, %v2627_v38  ;;  %v2579_v17 = vmul.f32 %v6445_v14, %v2263_v7 }
 0x2f8   : > { %v2650_v37 = vmul.f32 %v5349_v53, %v2392_v43  ;;  %v2668_v60 = vmul.f32 %v5358_v41, %v2512_v34  ;;  %v2389_v29 = vmax.f32 %v2373_v1, 0.0  ;;  %v1790_v24 = vmul.f32 %v5937_v2, %v1774_v13 }
 0x2f9   : > { %v2509_v51 = vmax.f32 %v2493_v22, 0.0  ;;  %v2547_v57 = vmul.f32 %v6472_v45, %v6471_v0  ;;  %v2713_v35 = vadd.f32 %v2697_v32, %v2679_v59  ;;  %v2702_v9 = vmul.f32 %v5361_v8, %v2632_v47 }
 0x2fa   : > { %v2684_v31 = vadd.f32 %v2668_v60, %v2650_v37  ;;  %v2595_v50 = vadd.f32 %v2579_v17, %v5915_v58  ;;  %v3925_v23 = vpop.eup %3924  ;;  %v2647_v56 = vmul.f32 %v5349_v53, %v2389_v29  ;;  %v1806_v26 = vmul.f32 %v1790_v24, %v1724_v10  ;;  %v6473_v10 = vld [vmem:[#allocation15_spill] sm:$0xff] }
 0x2fb   : > { %v2665_v7 = vmul.f32 %v5358_v41, %v2509_v51  ;;  %v2341_v20 = vmul.f32 %v6442_v30, %v2269_v12  ;;  %v2731_v36 = vadd.f32 %v5372_v44, %v2713_v35  ;;  %v2461_v27 = vmul.f32 %v6443_v15, %v2269_v12  ;;  %2795 = vrot.lane.b32.xlu0 %v3925_v23, %s4065_s15 }
 0x2fc   : > { %v2718_v2 = vadd.f32 %v2702_v9, %v2684_v31  ;;  %v2613_v13 = vadd.f32 %v5346_v49, %v2595_v50  ;;  %v2289_v4 = vmul.f32 %v5322_v25, %v1806_v26  ;;  %v2409_v58 = vmul.f32 %v5328_v5, %v1806_v26 }
 0x2fd   : > { %v2529_v46 = vmul.f32 %v5333_v3, %v1806_v26  ;;  %v2581_v11 = vmul.f32 %v6445_v14, %v2269_v12  ;;  %3928 = vtanh.f32 %v2731_v36  ;;  %v2681_v63 = vadd.f32 %v2665_v7, %v2647_v56 }
 0x2fe   : > { %v2736_v30 = vadd.f32 %v5372_v44, %v2718_v2  ;;  %v2629_v28 = vmax.f32 %v2613_v13, 0.0  ;;  %v2323_v16 = vadd.f32 %v6473_v10, %v2289_v4  ;;  %v2443_v18 = vadd.f32 %v6474_v54, %v2409_v58 }
 0x2ff   : > { %v2563_v15 = vadd.f32 %v2547_v57, %v2529_v46  ;;  %v3927_v19 = vpop.eup %3926 }
 0x300   : > { %3930 = vtanh.f32 %v2736_v30  ;;  %v2699_v25 = vmul.f32 %v5361_v8, %v2629_v28  ;;  %v2357_v39 = vadd.f32 %v2341_v20, %v2323_v16  ;;  %v2477_v5 = vadd.f32 %v2461_v27, %v2443_v18  ;;  %2785 = vrot.lane.b32.xlu1 %v3927_v19, %s4065_s15 }
 0x301   : > { %v2597_v33 = vadd.f32 %v2581_v11, %v2563_v15 }
 0x302   : > { %v2715_v3 = vadd.f32 %v2699_v25, %v2681_v63  ;;  %v2375_v14 = vadd.f32 %v5337_v62, %v2357_v39  ;;  %v2495_v42 = vadd.f32 %v5340_v40, %v2477_v5 }
 0x303   : > { %v2615_v55 = vadd.f32 %v5346_v49, %v2597_v33 }
 0x304   : > { %v2733_v21 = vadd.f32 %v5372_v44, %v2715_v3  ;;  %v2391_v6 = vmax.f32 %v2375_v14, 0.0  ;;  %v2511_v48 = vmax.f32 %v2495_v42, 0.0 }
 0x305   : > { %v2631_v52 = vmax.f32 %v2615_v55, 0.0 }
 0x306   : > { %3932 = vtanh.f32 %v2733_v21  ;;  %v2649_v61 = vmul.f32 %v5349_v53, %v2391_v6  ;;  %v2667_v38 = vmul.f32 %v5358_v41, %v2511_v48 }
 0x307   : > { %v3929_v43 = vpop.eup %3928  ;;  %v2701_v59 = vmul.f32 %v5361_v8, %v2631_v52 }
 0x308   : > { %v2683_v34 = vadd.f32 %v2667_v38, %v2649_v61  ;;  %2789 = vrot.lane.b32.xlu1 %v3929_v43, %s4065_s15 }
 0x30a   : > { %v3931_v62 = vpop.eup %3930  ;;  %v2717_v40 = vadd.f32 %v2701_v59, %v2683_v34 }
 0x30b   : > { %2799 = vrot.lane.b32.xlu0 %v3931_v62, %s4065_s15 }
 0x30c   : > { %v2735_v49 = vadd.f32 %v5372_v44, %v2717_v40 }
 0x30e   : > { %3934 = vtanh.f32 %v2735_v49 }
 0x310   : > { %v3933_v47 = vpop.eup %3932 }
 0x311   : > { %2793 = vrot.lane.b32.xlu1 %v3933_v47, %s4065_s15 }
 0x318   : > { %v3935_v53 = vpop.eup %3934 }
 0x319   : > { %2797 = vrot.lane.b32.xlu1 %v3935_v53, %s4065_s15 }
 0x31e   : > { %v2772_v41 = vpop.permute.xlu1 %2771 }
 0x31f   : > { %2819 = vst.msk [vmem:[%s6056_s17 + $0x8] sm:$0xff] %vm2817_vm8, %v2772_v41 }
 0x323   : > { %v2770_v8 = vpop.permute.xlu0 %2769 }
 0x324   : > { %2818 = vst.msk [vmem:[%s6056_s17] sm:$0xff] %vm2817_vm8, %v2770_v8 }
 0x32f   : > { %v2774_v44 = vpop.permute.xlu1 %2773 }
 0x330   : > { %2820 = vst.msk [vmem:[%s6056_s17 + $0x10] sm:$0xff] %vm2817_vm8, %v2774_v44 }
 0x334   : > { %v2776_v1 = vpop.permute.xlu0 %2775 }
 0x335   : > { %2821 = vst.msk [vmem:[%s6056_s17 + $0x18] sm:$0xff] %vm2817_vm8, %v2776_v1 }
 0x338   : > { %v2780_v22 = vpop.permute.xlu0 %2779 }
 0x339   : > { %2823 = vst.msk [vmem:[%s6056_s17 + $0x28] sm:$0xff] %vm2817_vm8, %v2780_v22 }
 0x34d   : > { %v2778_v32 = vpop.permute.xlu1 %2777 }
 0x34e   : > { %2822 = vst.msk [vmem:[%s6056_s17 + $0x20] sm:$0xff] %vm2817_vm8, %v2778_v32 }
 0x355   : > { %v2784_v37 = vpop.permute.xlu0 %2783 }
 0x356   : > { %2825 = vst.msk [vmem:[%s6056_s17 + $0x38] sm:$0xff] %vm2817_vm8, %v2784_v37 }
 0x360   : > { %v2788_v60 = vpop.permute.xlu0 %2787 }
 0x361   : > { %2827 = vst.msk [vmem:[%s6056_s17 + $0x48] sm:$0xff] %vm2817_vm8, %v2788_v60 }
 0x364   : > { %v2792_v17 = vpop.permute.xlu0 %2791 }
 0x365   : > { %2829 = vst.msk [vmem:[%s6056_s17 + $0x58] sm:$0xff] %vm2817_vm8, %v2792_v17 }
 0x367   : > { %v2782_v12 = vpop.permute.xlu1 %2781 }
 0x368   : > { %2824 = vst.msk [vmem:[%s6056_s17 + $0x30] sm:$0xff] %vm2817_vm8, %v2782_v12 }
 0x36d   : > { %v2796_v29 = vpop.permute.xlu0 %2795 }
 0x36e   : > { %2831 = vst.msk [vmem:[%s6056_s17 + $0x68] sm:$0xff] %vm2817_vm8, %v2796_v29 }
 0x372   : > { %v2786_v51 = vpop.permute.xlu1 %2785 }
 0x373   : > { %2826 = vst.msk [vmem:[%s6056_s17 + $0x40] sm:$0xff] %vm2817_vm8, %v2786_v51 }
 0x37a   : > { %v2790_v24 = vpop.permute.xlu1 %2789 }
 0x37b   : > { %2828 = vst.msk [vmem:[%s6056_s17 + $0x50] sm:$0xff] %vm2817_vm8, %v2790_v24 }
 0x37d   : > { %v2800_v0 = vpop.permute.xlu0 %2799 }
 0x37e   : > { %2833 = vst.msk [vmem:[%s6056_s17 + $0x78] sm:$0xff] %vm2817_vm8, %v2800_v0 }
 0x383   : > { %v2794_v45 = vpop.permute.xlu1 %2793 }
 0x384   : > { %2830 = vst.msk [vmem:[%s6056_s17 + $0x60] sm:$0xff] %vm2817_vm8, %v2794_v45 }
 0x386   : > { %2840 = sbr.rel (!%p4121_p4) target bundleno = 958 (0x3be), region = 48 }
 0x38b   : > { %v2798_v57 = vpop.permute.xlu1 %2797 }
 0x38c   : > { %2832 = vst.msk [vmem:[%s6056_s17 + $0x70] sm:$0xff] %vm2817_vm8, %v2798_v57 }
 0x38d   : > { %s6482_s18 = smov (!%p2843_p6, %s2842_s18), 16 }
 0x38e   : > { %s3181_s28 = sshll.u32 %s6482_s18, 7 }
 0x38f   : > { %p3184_p7 = scmp.eq.s32.totalorder %s3181_s28, 0 }
 0x390   : > { %s6103_s29 = sshrl.u32 (!%p3184_p7), %s6482_s18, 4 }
 0x391   : > { %2851 = sbr.rel (%p3184_p7) target bundleno = 958 (0x3be), region = 52  ;;  %p3185_p4 = scmp.le.s32.totalorder (!%p3184_p7), %s6103_s29, 0 }
 0x398   : > { %3068 = sbr.rel (%p3185_p4) target bundleno = 937 (0x3a9), region = 129  ;;  %s6475_s21 = smov (!%p3185_p4), %s6097_s27 }
 0x399   : > { %s6476_s26 = smov (!%p3185_p4), %s6056_s17  ;;  %s6112_s12 = smov (!%p3185_p4), 0  }
 0x39a   : > { %s6114_s30 = smov (!%p3185_p4), 0  }
 0x39f LB: >> { %v2943_v35 = vld [vmem:[%s4033_s26] sm:$0xff]  ;;  %v2945_v31 = vld [vmem:[%s4033_s26 + $0x8] sm:$0xff]  ;;  %v2947_v9 = vld [vmem:[%s4033_s26 + $0x10] sm:$0xff]  ;;  %s2975_s6 = sadd.s32 1, %s4037_s12  ;;  %s2937_s30 = sadd.s32 1, %s4041_s30   ;;  %s4041_s30 = sphi %s6114_s30, %s2937_s30   ;;  %s4037_s12 = sphi %s6112_s12, %s6477_s12   ;;  %s4033_s26 = sphi %s6476_s26, %s2980_s26   ;;  %s4029_s21 = sphi %s6475_s21, %s2981_s21  }
 0x3a0   : >> { %2944 = vst [vmem:[%s4029_s21] sm:$0xff] %v2943_v35  ;;  %2946 = vst [vmem:[%s4029_s21 + $0x8] sm:$0xff] %v2945_v31  ;;  %v2949_v50 = vld [vmem:[%s4033_s26 + $0x18] sm:$0xff]  ;;  %v2951_v23 = vld [vmem:[%s4033_s26 + $0x20] sm:$0xff]  ;;  %p2976_p8 = scmp.ge.s32.totalorder %s2975_s6, %s6103_s29  ;;  %p2936_p9 = scmp.ge.s32.totalorder %s2937_s30, %s6103_s29 }
 0x3a1   : >> { %2948 = vst [vmem:[%s4029_s21 + $0x10] sm:$0xff] %v2947_v9  ;;  %v2953_v56 = vld [vmem:[%s4033_s26 + $0x28] sm:$0xff]  ;;  %2950 = vst [vmem:[%s4029_s21 + $0x18] sm:$0xff] %v2949_v50  ;;  %v2955_v7 = vld [vmem:[%s4033_s26 + $0x30] sm:$0xff] }
 0x3a2   : >> { %2952 = vst [vmem:[%s4029_s21 + $0x20] sm:$0xff] %v2951_v23  ;;  %2954 = vst [vmem:[%s4029_s21 + $0x28] sm:$0xff] %v2953_v56  ;;  %v2957_v26 = vld [vmem:[%s4033_s26 + $0x38] sm:$0xff]  ;;  %v2959_v20 = vld [vmem:[%s4033_s26 + $0x40] sm:$0xff]  ;;  %s6484_s6 = smov (%p2976_p8, %s2975_s6), 0  ;;  %2939 = sbr.rel (!%p2936_p9) target bundleno = 927 (0x39f), region = 135 }
 0x3a3   : >> { %2956 = vst [vmem:[%s4029_s21 + $0x30] sm:$0xff] %v2955_v7  ;;  %2958 = vst [vmem:[%s4029_s21 + $0x38] sm:$0xff] %v2957_v26  ;;  %v2961_v36 = vld [vmem:[%s4033_s26 + $0x48] sm:$0xff]  ;;  %v2963_v2 = vld [vmem:[%s4033_s26 + $0x50] sm:$0xff]  ;;  %s3186_s7 = sshll.u32 %s6484_s6, 7  ;;  %s6477_s12 = smov %s6484_s6 }
 0x3a4   : >> { %2960 = vst [vmem:[%s4029_s21 + $0x40] sm:$0xff] %v2959_v20  ;;  %v2965_v13 = vld [vmem:[%s4033_s26 + $0x58] sm:$0xff]  ;;  %2962 = vst [vmem:[%s4029_s21 + $0x48] sm:$0xff] %v2961_v36  ;;  %v2967_v27 = vld [vmem:[%s4033_s26 + $0x60] sm:$0xff] }
 0x3a5   : >> { %2964 = vst [vmem:[%s4029_s21 + $0x50] sm:$0xff] %v2963_v2  ;;  %2966 = vst [vmem:[%s4029_s21 + $0x58] sm:$0xff] %v2965_v13  ;;  %v2969_v4 = vld [vmem:[%s4033_s26 + $0x68] sm:$0xff]  ;;  %v2971_v58 = vld [vmem:[%s4033_s26 + $0x70] sm:$0xff] }
 0x3a6   : >> { %2968 = vst [vmem:[%s4029_s21 + $0x60] sm:$0xff] %v2967_v27  ;;  %2970 = vst [vmem:[%s4029_s21 + $0x68] sm:$0xff] %v2969_v4  ;;  %v2973_v46 = vld [vmem:[%s4033_s26 + $0x78] sm:$0xff]  ;;  %s2980_s26 = scalar_lea.vmem %s6056_s17, %s3186_s7 [#allocation4]  }
 0x3a7   : >> { %2972 = vst [vmem:[%s4029_s21 + $0x70] sm:$0xff] %v2971_v58  ;;  %2974 = vst [vmem:[%s4029_s21 + $0x78] sm:$0xff] %v2973_v46  ;;  %s2981_s21 = scalar_lea.vmem %s6097_s27, %s3186_s7  }
 0x3a9 PF: > { %s6172_s9 = sand.u32 15, %s6482_s18   ;;  %s3197_s10 = sshll.u32 %s6103_s29, 7 }
 0x3aa   : > { %s2986_s11 = scalar_lea.vmem %s6056_s17, %s3197_s10 [#allocation4]   ;;  %s2988_s13 = scalar_lea.vmem %s6097_s27, %s3197_s10  }
 0x3ab   : > { %p3191_p10 = scmp.le.s32.totalorder %s6172_s9, 0 }
 0x3ac   : > { %s4043_s14 = smov (!%p3191_p10), %s2988_s13   ;;  %s4047_s15 = smov (!%p3191_p10), %s2986_s11  }
 0x3ad   : > { %3082 = sbr.rel (%p3191_p10) target bundleno = 958 (0x3be), region = 140  ;;  %s4051_s8 = smov (!%p3191_p10), 0  }
 0x3ae   : > { %s4055_s16 = smov (!%p3191_p10), 0  }
 0x3b4 LB: >> { %v2998_v11 = vld [vmem:[%s4049_s15] sm:$0xff]  ;;  %s3000_s18 = sadd.s32 1, %s4053_s8  ;;  %s2992_s16 = sadd.s32 1, %s4057_s16   ;;  %s4057_s16 = sphi %s4055_s16, %s2992_s16   ;;  %s4053_s8 = sphi %s4051_s8, %s4052_s8   ;;  %s4049_s15 = sphi %s4047_s15, %s3005_s15   ;;  %s4045_s14 = sphi %s4043_s14, %s3006_s14  }
 0x3b5   : >> { %2999 = vst [vmem:[%s4045_s14] sm:$0xff] %v2998_v11  ;;  %p3001_p11 = scmp.ge.s32.totalorder %s3000_s18, %s6172_s9  ;;  %p2991_p12 = scmp.ge.s32.totalorder %s2992_s16, %s6172_s9 }
 0x3b7   : >> { %s6486_s18 = smov (%p3001_p11, %s3000_s18), 0  ;;  %2994 = sbr.rel (!%p2991_p12) target bundleno = 948 (0x3b4), region = 146 }
 0x3b8   : >> { %s3192_s17 = sshll.u32 %s6486_s18, 3  ;;  %s4052_s8 = smov %s6486_s18  }
 0x3b9   : >> { %s3005_s15 = scalar_lea.vmem %s2986_s11, %s3192_s17 [#allocation4]   ;;  %s3006_s14 = scalar_lea.vmem %s2988_s13, %s3192_s17  }
 0x3be PF: > { %p13_p13 = scmp.ge.s32.totalorder %s4111_s22, 5   ;;  %s6478_s18 = smov %s4021_s19 }
 0x3bf   : > { %s6479_s19 = smov %s4119_s25  ;;  %s6480_s20 = smov %s4111_s22 }
 0x3c0   :  { %15 = sbr.rel (!%p13_p13) target bundleno = 2 (0x2), region = 157 }
 0x3c7   :  { %3022 = vsyncpa [#allocation3], 1 }
 0x3c8   :  { %3024 = vsyncpa [#allocation3 + $0x1], 1 }

</bundles_post_ra>
